<compile_context>
chip_gen: v7x
topology: tpu7x:2x2x1
jax: 0.10.0
libtpu: 0.0.40
codegen_flags: <defaults>
</compile_context>

<pallas_src>
import math

import numpy as np
import jax
import jax.numpy as jnp
from jax.experimental import pallas as pl
from jax.experimental.pallas import tpu as pltpu


_H = 64          # spatial size the forward operates at (interpolate target)
_HD = _H // 2    # 32: spatial size after the stride-2 conv


# ----------------------------------------------------------------------------
# Static conv table + block wiring
# ----------------------------------------------------------------------------
_CONV_DEFS = [
    # (name, (Cout, Cin, kh, kw), init)
    ("conv1", (3, 1, 3, 3), "kaiming"), ("conv3", (2, 3, 1, 1), "kaiming"),
    ("conv4", (1, 2, 3, 3), "xavier"),
    ("conv5", (3, 1, 3, 3), "kaiming"), ("conv7", (2, 3, 1, 1), "kaiming"),
    ("conv8", (1, 2, 3, 3), "xavier"),
    ("conv1b", (3, 1, 3, 3), "kaiming"), ("conv3b", (2, 3, 1, 1), "kaiming"),
    ("conv4b", (1, 2, 3, 3), "xavier"),
    ("conv5b", (3, 1, 3, 3), "kaiming"), ("conv7b", (2, 3, 1, 1), "kaiming"),
    ("conv8b", (1, 2, 3, 3), "xavier"),
]

_BLOCKS = [("conv1", "conv3", "conv4"),
           ("conv5", "conv7", "conv8"),
           ("conv1b", "conv3b", "conv4b"),
           ("conv5b", "conv7b", "conv8b")]


# ----------------------------------------------------------------------------
# Constant gather matrices (reflect pad + stride-2 / reflect pad + 2x repeat)
# ----------------------------------------------------------------------------
def _make_gather_mats():
    def refl(t):                      # PyTorch reflect pad=1 index map on [0,64)
        return np.minimum(np.abs(t), 2 * (_H - 1) - t)

    i32 = np.arange(_HD)
    i64 = np.arange(_H)
    rs = np.zeros((3, _HD, _H), np.float32)   # taps[i,:] <- x[refl(2i+d-1), :]
    cs = np.zeros((3, _H, _HD), np.float32)   # taps[:,j] <- x[:, refl(2j+d-1)]
    rb = np.zeros((3, _H, _HD), np.float32)   # out[i,:]  <- z[refl(i+d-1)//2, :]
    cb = np.zeros((3, _HD, _H), np.float32)   # out[:,j]  <- z[:, refl(j+d-1)//2]
    for d in range(3):
        src_s = refl(2 * i32 + d - 1)
        rs[d, i32, src_s] = 1.0
        cs[d, src_s, i32] = 1.0
        src_b = refl(i64 + d - 1) // 2        # 2x nearest-exact repeat folded in
        rb[d, i64, src_b] = 1.0
        cb[d, src_b, i64] = 1.0
    return rs, cs, rb, cb


_RS, _CS, _RB, _CB = _make_gather_mats()


# ----------------------------------------------------------------------------
# Parameter folding (runs in the JAX wrapper, not in the kernel)
# ----------------------------------------------------------------------------
def _fold_params(params, n):
    """Fold conv weights into batch-block-diagonal gather/weight matrices.

    Layouts (per block b, per batch plane p occupying lanes p*64:(p+1)*64):
      CSWBD[b*3+dy] : (64N, 96N)  stride-2 conv taps, 3 out-ch lane-concat
      M1BD[b]       : (96N, 64N)  1x1 conv (3->2 ch) as scaled-identity blocks
      CWBD[b*3+dy]  : (64N, 64N)  output 3x3 conv taps (2 in-ch row-stacked)
      BDN[b]/BMID[b]: (1, 96N)/(1, 64N) bias rows;  BOUT: (4,) scalar biases
    """
    cs = jnp.asarray(_CS)                         # (3, 64, 32)
    cb = jnp.asarray(_CB)                         # (3, 32, 64)
    eye_n = jnp.eye(n, dtype=jnp.float32)
    eye32 = jnp.eye(_HD, dtype=jnp.float32)

    cswbd, m1bd, cwbd, bdn, bmid, bout = [], [], [], [], [], []
    for c_dn, c_mid, c_out in _BLOCKS:
        w_dn = params[c_dn + "_w"].astype(jnp.float32)    # (3,1,3,3)
        b_dn = params[c_dn + "_b"].astype(jnp.float32)    # (3,)
        w_mid = params[c_mid + "_w"].astype(jnp.float32)  # (2,3,1,1)
        b_mid = params[c_mid + "_b"].astype(jnp.float32)  # (2,)
        w_out = params[c_out + "_w"].astype(jnp.float32)  # (1,2,3,3)
        b_out = params[c_out + "_b"].astype(jnp.float32)  # (1,)

        # csw[dy][:, co*32:(co+1)*32] = sum_dx w_dn[co,0,dy,dx] * cs[dx]
        csw = jnp.einsum("cyx,xab->ycab", w_dn[:, 0], cs)       # (3,3,64,32)
        csw = csw.transpose(0, 2, 1, 3).reshape(3, _H, 3 * _HD)  # (3,64,96)
        for dy in range(3):
            cswbd.append(jnp.kron(eye_n, csw[dy]))               # (64N,96N)

        # 1x1 conv over lane-concatenated channels: (96,64) scaled-identity blocks
        m1 = jnp.kron(w_mid[:, :, 0, 0].T, eye32)                # (96,64)
        m1bd.append(jnp.kron(eye_n, m1))                         # (96N,64N)

        # cw[dy] rows [ci*32:(ci+1)*32] = sum_dx w_out[0,ci,dy,dx] * cb[dx]
        cw = jnp.einsum("cyx,xab->ycab", w_out[0], cb)           # (3,2,32,64)
        cw = cw.reshape(3, 2 * _HD, _H)                          # (3,64,64)
        for dy in range(3):
            cwbd.append(jnp.kron(eye_n, cw[dy]))                 # (64N,64N)

        bdn.append(jnp.tile(jnp.repeat(b_dn, _HD), n)[None, :])   # (1,96N)
        bmid.append(jnp.tile(jnp.repeat(b_mid, _HD), n)[None, :])  # (1,64N)
        bout.append(b_out[0])

    return (jnp.stack(cswbd), jnp.stack(m1bd), jnp.stack(cwbd),
            jnp.stack(bdn), jnp.stack(bmid), jnp.stack(bout))


# ----------------------------------------------------------------------------
# Pallas kernel: the whole forward pass, matmuls only
# ----------------------------------------------------------------------------
def _lrelu(v):
    return jnp.maximum(v, 0.2 * v)


def _rmin(v):
    return jnp.min(jnp.min(v, axis=1, keepdims=True), axis=0, keepdims=True)


def _rmax(v):
    return jnp.max(jnp.max(v, axis=1, keepdims=True), axis=0, keepdims=True)


def _mm(a, b):
    return jnp.dot(a, b, preferred_element_type=jnp.float32)


def _smltest_kernel(x_ref, rs_ref, rb_ref, cswbd_ref, m1bd_ref, cwbd_ref,
                    bdn_ref, bmid_ref, bout_ref, o_ref):
    # x_ref  : (64, 64N) f32 VMEM  -- batch planes lane-concatenated
    # rs_ref : (3, 32, 64)         -- stride-2 row gathers (weight-free)
    # rb_ref : (3, 64, 32)         -- repeat row gathers (weight-free)
    # cswbd_ref/m1bd_ref/cwbd_ref  -- weight-folded, batch-block-diagonal mats
    # bdn_ref/bmid_ref             -- bias rows; bout_ref: (4,) SMEM scalars
    x = x_ref[...]                                            # (64, 64N)

    # src dynamic range of the raw input (torch.min/max over the whole tensor)
    src_min = _rmin(x)
    src_max = _rmax(x)

    for blk in range(4):
        # ---- 3x3 / stride-2 / reflect conv (1->3 ch) + lrelu, at 32x32 ------
        acc = None
        for dy in range(3):
            xr = _mm(rs_ref[dy], x)                           # (32, 64N)
            t = _mm(xr, cswbd_ref[blk * 3 + dy])              # (32, 96N)
            acc = t if acc is None else acc + t
        a = _lrelu(acc + bdn_ref[blk])                        # (32, 96N)

        # ---- 1x1 conv (3->2 ch) + lrelu (commuted before the 2x repeat) -----
        z = _lrelu(_mm(a, m1bd_ref[blk]) + bmid_ref[blk])     # (32, 64N)

        # ---- renormalize to [src_min, src_max] (commutes with the repeat) ---
        zmin = _rmin(z)
        zmax = _rmax(z)
        # TODO(synk): no guard on zmax == zmin (matches the naive PyTorch
        # min/max renorm, which would also produce inf/NaN for a constant
        # intermediate tensor).
        scale = (src_max - src_min) / (zmax - zmin)
        offset = src_min - zmin * scale
        z = z * scale + offset                                # one FMA / elem

        # ---- 3x3 / stride-1 / reflect conv (2->1 ch) fused with the 2x
        #      nearest-exact repeat, then sigmoid ----------------------------
        acc2 = None
        for dy in range(3):
            s = _mm(z, cwbd_ref[blk * 3 + dy])                # (32, 64N)
            t = _mm(rb_ref[dy], s)                            # (64, 64N)
            acc2 = t if acc2 is None else acc2 + t
        y = acc2 + bout_ref[blk]
        x = 0.5 * (jnp.tanh(0.5 * y) + 1.0)                   # sigmoid via EUP

    o_ref[...] = x                                            # lane-dense store


# ----------------------------------------------------------------------------
# Wrapper
# ----------------------------------------------------------------------------
_VMEM = pl.BlockSpec(memory_space=pltpu.MemorySpace.VMEM)
_SMEM = pl.BlockSpec(memory_space=pltpu.MemorySpace.SMEM)


def forward(params, x):
    n, c, h, w = x.shape
    assert (c, h, w) == (1, _H, _H), "SmlTest forward expects (N, 1, 64, 64)"
    cswbd, m1bd, cwbd, bdn, bmid, bout = _fold_params(params, n)

    # Lane-concatenate the batch planes: X[r, p*64 + q] = x[p, 0, r, q]
    x_lanes = jnp.transpose(x[:, 0], (1, 0, 2)).reshape(_H, n * _H)
    x_lanes = x_lanes.astype(jnp.float32)

    out = pl.pallas_call(
        _smltest_kernel,
        out_shape=jax.ShapeDtypeStruct((_H, n * _H), jnp.float32),
        in_specs=[_VMEM, _VMEM, _VMEM, _VMEM, _VMEM, _VMEM, _VMEM, _VMEM, _SMEM],
        out_specs=_VMEM,
    )(x_lanes, jnp.asarray(_RS), jnp.asarray(_RB),
      cswbd, m1bd, cwbd, bdn, bmid, bout)

    # (64, 64N) lane slab back to (N, 1, 64, 64)
    return jnp.transpose(out.reshape(_H, n, _H), (1, 0, 2))[:, None]


# ----------------------------------------------------------------------------
# Parameters (deterministic synthetic init mirroring __init__)
# ----------------------------------------------------------------------------
def _kaiming_uniform(key, shape):
    fan_in = shape[1] * shape[2] * shape[3]
    bound = math.sqrt(6.0 / fan_in)
    return jax.random.uniform(key, shape, jnp.float32, -bound, bound)


def _xavier_uniform(key, shape):
    fan_in = shape[1] * shape[2] * shape[3]
    fan_out = shape[0] * shape[2] * shape[3]
    bound = math.sqrt(6.0 / (fan_in + fan_out))
    return jax.random.uniform(key, shape, jnp.float32, -bound, bound)


def _bias_init(key, wshape):
    fan_in = wshape[1] * wshape[2] * wshape[3]
    bound = 1.0 / math.sqrt(fan_in)
    return jax.random.uniform(key, (wshape[0],), jnp.float32, -bound, bound)


def init_params(key):
    params = {}
    keys = jax.random.split(key, 2 * len(_CONV_DEFS))
    for i, (name, shape, init) in enumerate(_CONV_DEFS):
        wk, bk = keys[2 * i], keys[2 * i + 1]
        w = _kaiming_uniform(wk, shape) if init == "kaiming" else _xavier_uniform(wk, shape)
        params[name + "_w"] = w
        params[name + "_b"] = _bias_init(bk, shape)
    return params


if __name__ == "__main__":
    key = jax.random.PRNGKey(0)
    pkey, xkey = jax.random.split(key)
    params = init_params(pkey)
    # Input: N=2, C=1 (conv1 takes 1 channel), 64x64 spatial (the forward's
    # interpolate target is 64x64, so the stride-2/repeat algebra is exact).
    x = jax.random.normal(xkey, (2, 1, 64, 64), dtype=jnp.float32)

    out = jax.jit(forward)(params, x)
    out = jax.block_until_ready(out)
    assert out.shape == (2, 1, 64, 64), out.shape
    assert bool(jnp.all(jnp.isfinite(out)))
    print("KERNEL_OK")
</pallas_src>

<mosaic_0001>
module attributes {stable_mosaic.version = 11 : i64} {
  func.func @_smltest_kernel(%arg0: memref<64x128xf32, #tpu.memory_space<vmem>>, %arg1: memref<3x32x64xf32, #tpu.memory_space<vmem>>, %arg2: memref<3x64x32xf32, #tpu.memory_space<vmem>>, %arg3: memref<12x128x192xf32, #tpu.memory_space<vmem>>, %arg4: memref<4x192x128xf32, #tpu.memory_space<vmem>>, %arg5: memref<12x128x128xf32, #tpu.memory_space<vmem>>, %arg6: memref<4x1x192xf32, #tpu.memory_space<vmem>>, %arg7: memref<4x1x128xf32, #tpu.memory_space<vmem>>, %arg8: memref<4xf32, #tpu.memory_space<smem>>, %arg9: memref<64x128xf32, #tpu.memory_space<vmem>>) attributes {dimension_semantics = [], scalar_prefetch = 0 : i64, scratch_operands = 0 : i64, tpu.core_type = #tpu.core_type<tc>} {
    %c0 = arith.constant 0 : index
    %c0_0 = arith.constant 0 : index
    %0 = vector.load %arg0[%c0, %c0_0] : memref<64x128xf32, #tpu.memory_space<vmem>>, vector<64x128xf32>
    %cst = arith.constant dense<0x7F800000> : vector<64xf32>
    %1 = vector.multi_reduction <minimumf>, %0, %cst [1] : vector<64x128xf32> to vector<64xf32>
    %2 = vector.shape_cast %1 : vector<64xf32> to vector<64x1xf32>
    %cst_1 = arith.constant dense<0x7F800000> : vector<1xf32>
    %3 = vector.multi_reduction <minimumf>, %2, %cst_1 [0] : vector<64x1xf32> to vector<1xf32>
    %4 = vector.shape_cast %3 : vector<1xf32> to vector<1x1xf32>
    %cst_2 = arith.constant dense<0xFF800000> : vector<64xf32>
    %5 = vector.multi_reduction <maximumf>, %0, %cst_2 [1] : vector<64x128xf32> to vector<64xf32>
    %6 = vector.shape_cast %5 : vector<64xf32> to vector<64x1xf32>
    %cst_3 = arith.constant dense<0xFF800000> : vector<1xf32>
    %7 = vector.multi_reduction <maximumf>, %6, %cst_3 [0] : vector<64x1xf32> to vector<1xf32>
    %8 = vector.shape_cast %7 : vector<1xf32> to vector<1x1xf32>
    %c0_4 = arith.constant 0 : index
    %c0_5 = arith.constant 0 : index
    %c0_6 = arith.constant 0 : index
    %9 = vector.load %arg1[%c0_4, %c0_5, %c0_6] : memref<3x32x64xf32, #tpu.memory_space<vmem>>, vector<1x32x64xf32>
    %10 = vector.shape_cast %9 : vector<1x32x64xf32> to vector<32x64xf32>
    %cst_7 = arith.constant dense<0.000000e+00> : vector<32x128xf32>
    %11 = tpu.matmul %10, %0, %cst_7 {dimension_numbers = #tpu.dot_dimension_numbers<[1], [0], [0], [1], [0, 0, 1, 1], [], []>} : vector<32x64xf32>, vector<64x128xf32>, vector<32x128xf32> -> vector<32x128xf32>
    %c0_8 = arith.constant 0 : index
    %c0_9 = arith.constant 0 : index
    %c0_10 = arith.constant 0 : index
    %12 = vector.load %arg3[%c0_8, %c0_9, %c0_10] : memref<12x128x192xf32, #tpu.memory_space<vmem>>, vector<1x128x192xf32>
    %13 = vector.shape_cast %12 : vector<1x128x192xf32> to vector<128x192xf32>
    %cst_11 = arith.constant dense<0.000000e+00> : vector<32x192xf32>
    %14 = tpu.matmul %11, %13, %cst_11 {dimension_numbers = #tpu.dot_dimension_numbers<[1], [0], [0], [1], [0, 0, 1, 1], [], []>} : vector<32x128xf32>, vector<128x192xf32>, vector<32x192xf32> -> vector<32x192xf32>
    %c1 = arith.constant 1 : index
    %c0_12 = arith.constant 0 : index
    %c0_13 = arith.constant 0 : index
    %15 = vector.load %arg1[%c1, %c0_12, %c0_13] : memref<3x32x64xf32, #tpu.memory_space<vmem>>, vector<1x32x64xf32>
    %16 = vector.shape_cast %15 : vector<1x32x64xf32> to vector<32x64xf32>
    %cst_14 = arith.constant dense<0.000000e+00> : vector<32x128xf32>
    %17 = tpu.matmul %16, %0, %cst_14 {dimension_numbers = #tpu.dot_dimension_numbers<[1], [0], [0], [1], [0, 0, 1, 1], [], []>} : vector<32x64xf32>, vector<64x128xf32>, vector<32x128xf32> -> vector<32x128xf32>
    %c1_15 = arith.constant 1 : index
    %c0_16 = arith.constant 0 : index
    %c0_17 = arith.constant 0 : index
    %18 = vector.load %arg3[%c1_15, %c0_16, %c0_17] : memref<12x128x192xf32, #tpu.memory_space<vmem>>, vector<1x128x192xf32>
    %19 = vector.shape_cast %18 : vector<1x128x192xf32> to vector<128x192xf32>
    %cst_18 = arith.constant dense<0.000000e+00> : vector<32x192xf32>
    %20 = tpu.matmul %17, %19, %cst_18 {dimension_numbers = #tpu.dot_dimension_numbers<[1], [0], [0], [1], [0, 0, 1, 1], [], []>} : vector<32x128xf32>, vector<128x192xf32>, vector<32x192xf32> -> vector<32x192xf32>
    %21 = arith.addf %14, %20 : vector<32x192xf32>
    %c2 = arith.constant 2 : index
    %c0_19 = arith.constant 0 : index
    %c0_20 = arith.constant 0 : index
    %22 = vector.load %arg1[%c2, %c0_19, %c0_20] : memref<3x32x64xf32, #tpu.memory_space<vmem>>, vector<1x32x64xf32>
    %23 = vector.shape_cast %22 : vector<1x32x64xf32> to vector<32x64xf32>
    %cst_21 = arith.constant dense<0.000000e+00> : vector<32x128xf32>
    %24 = tpu.matmul %23, %0, %cst_21 {dimension_numbers = #tpu.dot_dimension_numbers<[1], [0], [0], [1], [0, 0, 1, 1], [], []>} : vector<32x64xf32>, vector<64x128xf32>, vector<32x128xf32> -> vector<32x128xf32>
    %c2_22 = arith.constant 2 : index
    %c0_23 = arith.constant 0 : index
    %c0_24 = arith.constant 0 : index
    %25 = vector.load %arg3[%c2_22, %c0_23, %c0_24] : memref<12x128x192xf32, #tpu.memory_space<vmem>>, vector<1x128x192xf32>
    %26 = vector.shape_cast %25 : vector<1x128x192xf32> to vector<128x192xf32>
    %cst_25 = arith.constant dense<0.000000e+00> : vector<32x192xf32>
    %27 = tpu.matmul %24, %26, %cst_25 {dimension_numbers = #tpu.dot_dimension_numbers<[1], [0], [0], [1], [0, 0, 1, 1], [], []>} : vector<32x128xf32>, vector<128x192xf32>, vector<32x192xf32> -> vector<32x192xf32>
    %28 = arith.addf %21, %27 : vector<32x192xf32>
    %c0_26 = arith.constant 0 : index
    %c0_27 = arith.constant 0 : index
    %c0_28 = arith.constant 0 : index
    %29 = vector.load %arg6[%c0_26, %c0_27, %c0_28] : memref<4x1x192xf32, #tpu.memory_space<vmem>>, vector<1x1x192xf32>
    %30 = vector.shape_cast %29 : vector<1x1x192xf32> to vector<1x192xf32>
    %31 = vector.broadcast %30 : vector<1x192xf32> to vector<32x192xf32>
    %32 = arith.addf %28, %31 : vector<32x192xf32>
    %cst_29 = arith.constant 2.000000e-01 : f32
    %33 = vector.broadcast %cst_29 : f32 to vector<32x192xf32>
    %34 = arith.mulf %33, %32 : vector<32x192xf32>
    %35 = arith.maximumf %32, %34 : vector<32x192xf32>
    %c0_30 = arith.constant 0 : index
    %c0_31 = arith.constant 0 : index
    %c0_32 = arith.constant 0 : index
    %36 = vector.load %arg4[%c0_30, %c0_31, %c0_32] : memref<4x192x128xf32, #tpu.memory_space<vmem>>, vector<1x192x128xf32>
    %37 = vector.shape_cast %36 : vector<1x192x128xf32> to vector<192x128xf32>
    %cst_33 = arith.constant dense<0.000000e+00> : vector<32x128xf32>
    %38 = tpu.matmul %35, %37, %cst_33 {dimension_numbers = #tpu.dot_dimension_numbers<[1], [0], [0], [1], [0, 0, 1, 1], [], []>} : vector<32x192xf32>, vector<192x128xf32>, vector<32x128xf32> -> vector<32x128xf32>
    %c0_34 = arith.constant 0 : index
    %c0_35 = arith.constant 0 : index
    %c0_36 = arith.constant 0 : index
    %39 = vector.load %arg7[%c0_34, %c0_35, %c0_36] : memref<4x1x128xf32, #tpu.memory_space<vmem>>, vector<1x1x128xf32>
    %40 = vector.shape_cast %39 : vector<1x1x128xf32> to vector<1x128xf32>
    %41 = vector.broadcast %40 : vector<1x128xf32> to vector<32x128xf32>
    %42 = arith.addf %38, %41 : vector<32x128xf32>
    %cst_37 = arith.constant 2.000000e-01 : f32
    %43 = vector.broadcast %cst_37 : f32 to vector<32x128xf32>
    %44 = arith.mulf %43, %42 : vector<32x128xf32>
    %45 = arith.maximumf %42, %44 : vector<32x128xf32>
    %cst_38 = arith.constant dense<0x7F800000> : vector<32xf32>
    %46 = vector.multi_reduction <minimumf>, %45, %cst_38 [1] : vector<32x128xf32> to vector<32xf32>
    %47 = vector.shape_cast %46 : vector<32xf32> to vector<32x1xf32>
    %cst_39 = arith.constant dense<0x7F800000> : vector<1xf32>
    %48 = vector.multi_reduction <minimumf>, %47, %cst_39 [0] : vector<32x1xf32> to vector<1xf32>
    %49 = vector.shape_cast %48 : vector<1xf32> to vector<1x1xf32>
    %cst_40 = arith.constant dense<0xFF800000> : vector<32xf32>
    %50 = vector.multi_reduction <maximumf>, %45, %cst_40 [1] : vector<32x128xf32> to vector<32xf32>
    %51 = vector.shape_cast %50 : vector<32xf32> to vector<32x1xf32>
    %cst_41 = arith.constant dense<0xFF800000> : vector<1xf32>
    %52 = vector.multi_reduction <maximumf>, %51, %cst_41 [0] : vector<32x1xf32> to vector<1xf32>
    %53 = vector.shape_cast %52 : vector<1xf32> to vector<1x1xf32>
    %54 = arith.subf %8, %4 : vector<1x1xf32>
    %55 = arith.subf %53, %49 : vector<1x1xf32>
    %56 = arith.divf %54, %55 : vector<1x1xf32>
    %57 = arith.mulf %49, %56 : vector<1x1xf32>
    %58 = arith.subf %4, %57 : vector<1x1xf32>
    %59 = vector.broadcast %56 : vector<1x1xf32> to vector<32x128xf32>
    %60 = arith.mulf %45, %59 : vector<32x128xf32>
    %61 = vector.broadcast %58 : vector<1x1xf32> to vector<32x128xf32>
    %62 = arith.addf %60, %61 : vector<32x128xf32>
    %c0_42 = arith.constant 0 : index
    %c0_43 = arith.constant 0 : index
    %c0_44 = arith.constant 0 : index
    %63 = vector.load %arg5[%c0_42, %c0_43, %c0_44] : memref<12x128x128xf32, #tpu.memory_space<vmem>>, vector<1x128x128xf32>
    %64 = vector.shape_cast %63 : vector<1x128x128xf32> to vector<128x128xf32>
    %cst_45 = arith.constant dense<0.000000e+00> : vector<32x128xf32>
    %65 = tpu.matmul %62, %64, %cst_45 {dimension_numbers = #tpu.dot_dimension_numbers<[1], [0], [0], [1], [0, 0, 1, 1], [], []>} : vector<32x128xf32>, vector<128x128xf32>, vector<32x128xf32> -> vector<32x128xf32>
    %c0_46 = arith.constant 0 : index
    %c0_47 = arith.constant 0 : index
    %c0_48 = arith.constant 0 : index
    %66 = vector.load %arg2[%c0_46, %c0_47, %c0_48] : memref<3x64x32xf32, #tpu.memory_space<vmem>>, vector<1x64x32xf32>
    %67 = vector.shape_cast %66 : vector<1x64x32xf32> to vector<64x32xf32>
    %cst_49 = arith.constant dense<0.000000e+00> : vector<64x128xf32>
    %68 = tpu.matmul %67, %65, %cst_49 {dimension_numbers = #tpu.dot_dimension_numbers<[1], [0], [0], [1], [0, 0, 1, 1], [], []>} : vector<64x32xf32>, vector<32x128xf32>, vector<64x128xf32> -> vector<64x128xf32>
    %c1_50 = arith.constant 1 : index
    %c0_51 = arith.constant 0 : index
    %c0_52 = arith.constant 0 : index
    %69 = vector.load %arg5[%c1_50, %c0_51, %c0_52] : memref<12x128x128xf32, #tpu.memory_space<vmem>>, vector<1x128x128xf32>
    %70 = vector.shape_cast %69 : vector<1x128x128xf32> to vector<128x128xf32>
    %cst_53 = arith.constant dense<0.000000e+00> : vector<32x128xf32>
    %71 = tpu.matmul %62, %70, %cst_53 {dimension_numbers = #tpu.dot_dimension_numbers<[1], [0], [0], [1], [0, 0, 1, 1], [], []>} : vector<32x128xf32>, vector<128x128xf32>, vector<32x128xf32> -> vector<32x128xf32>
    %c1_54 = arith.constant 1 : index
    %c0_55 = arith.constant 0 : index
    %c0_56 = arith.constant 0 : index
    %72 = vector.load %arg2[%c1_54, %c0_55, %c0_56] : memref<3x64x32xf32, #tpu.memory_space<vmem>>, vector<1x64x32xf32>
    %73 = vector.shape_cast %72 : vector<1x64x32xf32> to vector<64x32xf32>
    %cst_57 = arith.constant dense<0.000000e+00> : vector<64x128xf32>
    %74 = tpu.matmul %73, %71, %cst_57 {dimension_numbers = #tpu.dot_dimension_numbers<[1], [0], [0], [1], [0, 0, 1, 1], [], []>} : vector<64x32xf32>, vector<32x128xf32>, vector<64x128xf32> -> vector<64x128xf32>
    %75 = arith.addf %68, %74 : vector<64x128xf32>
    %c2_58 = arith.constant 2 : index
    %c0_59 = arith.constant 0 : index
    %c0_60 = arith.constant 0 : index
    %76 = vector.load %arg5[%c2_58, %c0_59, %c0_60] : memref<12x128x128xf32, #tpu.memory_space<vmem>>, vector<1x128x128xf32>
    %77 = vector.shape_cast %76 : vector<1x128x128xf32> to vector<128x128xf32>
    %cst_61 = arith.constant dense<0.000000e+00> : vector<32x128xf32>
    %78 = tpu.matmul %62, %77, %cst_61 {dimension_numbers = #tpu.dot_dimension_numbers<[1], [0], [0], [1], [0, 0, 1, 1], [], []>} : vector<32x128xf32>, vector<128x128xf32>, vector<32x128xf32> -> vector<32x128xf32>
    %c2_62 = arith.constant 2 : index
    %c0_63 = arith.constant 0 : index
    %c0_64 = arith.constant 0 : index
    %79 = vector.load %arg2[%c2_62, %c0_63, %c0_64] : memref<3x64x32xf32, #tpu.memory_space<vmem>>, vector<1x64x32xf32>
    %80 = vector.shape_cast %79 : vector<1x64x32xf32> to vector<64x32xf32>
    %cst_65 = arith.constant dense<0.000000e+00> : vector<64x128xf32>
    %81 = tpu.matmul %80, %78, %cst_65 {dimension_numbers = #tpu.dot_dimension_numbers<[1], [0], [0], [1], [0, 0, 1, 1], [], []>} : vector<64x32xf32>, vector<32x128xf32>, vector<64x128xf32> -> vector<64x128xf32>
    %82 = arith.addf %75, %81 : vector<64x128xf32>
    %c0_66 = arith.constant 0 : index
    %83 = memref.load %arg8[%c0_66] : memref<4xf32, #tpu.memory_space<smem>>
    %84 = vector.broadcast %83 : f32 to vector<64x128xf32>
    %85 = arith.addf %82, %84 : vector<64x128xf32>
    %cst_67 = arith.constant 5.000000e-01 : f32
    %86 = vector.broadcast %cst_67 : f32 to vector<64x128xf32>
    %87 = arith.mulf %86, %85 : vector<64x128xf32>
    %88 = math.tanh %87 : vector<64x128xf32>
    %cst_68 = arith.constant 1.000000e+00 : f32
    %89 = vector.broadcast %cst_68 : f32 to vector<64x128xf32>
    %90 = arith.addf %88, %89 : vector<64x128xf32>
    %cst_69 = arith.constant 5.000000e-01 : f32
    %91 = vector.broadcast %cst_69 : f32 to vector<64x128xf32>
    %92 = arith.mulf %91, %90 : vector<64x128xf32>
    %c0_70 = arith.constant 0 : index
    %c0_71 = arith.constant 0 : index
    %c0_72 = arith.constant 0 : index
    %93 = vector.load %arg1[%c0_70, %c0_71, %c0_72] : memref<3x32x64xf32, #tpu.memory_space<vmem>>, vector<1x32x64xf32>
    %94 = vector.shape_cast %93 : vector<1x32x64xf32> to vector<32x64xf32>
    %cst_73 = arith.constant dense<0.000000e+00> : vector<32x128xf32>
    %95 = tpu.matmul %94, %92, %cst_73 {dimension_numbers = #tpu.dot_dimension_numbers<[1], [0], [0], [1], [0, 0, 1, 1], [], []>} : vector<32x64xf32>, vector<64x128xf32>, vector<32x128xf32> -> vector<32x128xf32>
    %c3 = arith.constant 3 : index
    %c0_74 = arith.constant 0 : index
    %c0_75 = arith.constant 0 : index
    %96 = vector.load %arg3[%c3, %c0_74, %c0_75] : memref<12x128x192xf32, #tpu.memory_space<vmem>>, vector<1x128x192xf32>
    %97 = vector.shape_cast %96 : vector<1x128x192xf32> to vector<128x192xf32>
    %cst_76 = arith.constant dense<0.000000e+00> : vector<32x192xf32>
    %98 = tpu.matmul %95, %97, %cst_76 {dimension_numbers = #tpu.dot_dimension_numbers<[1], [0], [0], [1], [0, 0, 1, 1], [], []>} : vector<32x128xf32>, vector<128x192xf32>, vector<32x192xf32> -> vector<32x192xf32>
    %c1_77 = arith.constant 1 : index
    %c0_78 = arith.constant 0 : index
    %c0_79 = arith.constant 0 : index
    %99 = vector.load %arg1[%c1_77, %c0_78, %c0_79] : memref<3x32x64xf32, #tpu.memory_space<vmem>>, vector<1x32x64xf32>
    %100 = vector.shape_cast %99 : vector<1x32x64xf32> to vector<32x64xf32>
    %cst_80 = arith.constant dense<0.000000e+00> : vector<32x128xf32>
    %101 = tpu.matmul %100, %92, %cst_80 {dimension_numbers = #tpu.dot_dimension_numbers<[1], [0], [0], [1], [0, 0, 1, 1], [], []>} : vector<32x64xf32>, vector<64x128xf32>, vector<32x128xf32> -> vector<32x128xf32>
    %c4 = arith.constant 4 : index
    %c0_81 = arith.constant 0 : index
    %c0_82 = arith.constant 0 : index
    %102 = vector.load %arg3[%c4, %c0_81, %c0_82] : memref<12x128x192xf32, #tpu.memory_space<vmem>>, vector<1x128x192xf32>
    %103 = vector.shape_cast %102 : vector<1x128x192xf32> to vector<128x192xf32>
    %cst_83 = arith.constant dense<0.000000e+00> : vector<32x192xf32>
    %104 = tpu.matmul %101, %103, %cst_83 {dimension_numbers = #tpu.dot_dimension_numbers<[1], [0], [0], [1], [0, 0, 1, 1], [], []>} : vector<32x128xf32>, vector<128x192xf32>, vector<32x192xf32> -> vector<32x192xf32>
    %105 = arith.addf %98, %104 : vector<32x192xf32>
    %c2_84 = arith.constant 2 : index
    %c0_85 = arith.constant 0 : index
    %c0_86 = arith.constant 0 : index
    %106 = vector.load %arg1[%c2_84, %c0_85, %c0_86] : memref<3x32x64xf32, #tpu.memory_space<vmem>>, vector<1x32x64xf32>
    %107 = vector.shape_cast %106 : vector<1x32x64xf32> to vector<32x64xf32>
    %cst_87 = arith.constant dense<0.000000e+00> : vector<32x128xf32>
    %108 = tpu.matmul %107, %92, %cst_87 {dimension_numbers = #tpu.dot_dimension_numbers<[1], [0], [0], [1], [0, 0, 1, 1], [], []>} : vector<32x64xf32>, vector<64x128xf32>, vector<32x128xf32> -> vector<32x128xf32>
    %c5 = arith.constant 5 : index
    %c0_88 = arith.constant 0 : index
    %c0_89 = arith.constant 0 : index
    %109 = vector.load %arg3[%c5, %c0_88, %c0_89] : memref<12x128x192xf32, #tpu.memory_space<vmem>>, vector<1x128x192xf32>
    %110 = vector.shape_cast %109 : vector<1x128x192xf32> to vector<128x192xf32>
    %cst_90 = arith.constant dense<0.000000e+00> : vector<32x192xf32>
    %111 = tpu.matmul %108, %110, %cst_90 {dimension_numbers = #tpu.dot_dimension_numbers<[1], [0], [0], [1], [0, 0, 1, 1], [], []>} : vector<32x128xf32>, vector<128x192xf32>, vector<32x192xf32> -> vector<32x192xf32>
    %112 = arith.addf %105, %111 : vector<32x192xf32>
    %c1_91 = arith.constant 1 : index
    %c0_92 = arith.constant 0 : index
    %c0_93 = arith.constant 0 : index
    %113 = vector.load %arg6[%c1_91, %c0_92, %c0_93] : memref<4x1x192xf32, #tpu.memory_space<vmem>>, vector<1x1x192xf32>
    %114 = vector.shape_cast %113 : vector<1x1x192xf32> to vector<1x192xf32>
    %115 = vector.broadcast %114 : vector<1x192xf32> to vector<32x192xf32>
    %116 = arith.addf %112, %115 : vector<32x192xf32>
    %cst_94 = arith.constant 2.000000e-01 : f32
    %117 = vector.broadcast %cst_94 : f32 to vector<32x192xf32>
    %118 = arith.mulf %117, %116 : vector<32x192xf32>
    %119 = arith.maximumf %116, %118 : vector<32x192xf32>
    %c1_95 = arith.constant 1 : index
    %c0_96 = arith.constant 0 : index
    %c0_97 = arith.constant 0 : index
    %120 = vector.load %arg4[%c1_95, %c0_96, %c0_97] : memref<4x192x128xf32, #tpu.memory_space<vmem>>, vector<1x192x128xf32>
    %121 = vector.shape_cast %120 : vector<1x192x128xf32> to vector<192x128xf32>
    %cst_98 = arith.constant dense<0.000000e+00> : vector<32x128xf32>
    %122 = tpu.matmul %119, %121, %cst_98 {dimension_numbers = #tpu.dot_dimension_numbers<[1], [0], [0], [1], [0, 0, 1, 1], [], []>} : vector<32x192xf32>, vector<192x128xf32>, vector<32x128xf32> -> vector<32x128xf32>
    %c1_99 = arith.constant 1 : index
    %c0_100 = arith.constant 0 : index
    %c0_101 = arith.constant 0 : index
    %123 = vector.load %arg7[%c1_99, %c0_100, %c0_101] : memref<4x1x128xf32, #tpu.memory_space<vmem>>, vector<1x1x128xf32>
    %124 = vector.shape_cast %123 : vector<1x1x128xf32> to vector<1x128xf32>
    %125 = vector.broadcast %124 : vector<1x128xf32> to vector<32x128xf32>
    %126 = arith.addf %122, %125 : vector<32x128xf32>
    %cst_102 = arith.constant 2.000000e-01 : f32
    %127 = vector.broadcast %cst_102 : f32 to vector<32x128xf32>
    %128 = arith.mulf %127, %126 : vector<32x128xf32>
    %129 = arith.maximumf %126, %128 : vector<32x128xf32>
    %cst_103 = arith.constant dense<0x7F800000> : vector<32xf32>
    %130 = vector.multi_reduction <minimumf>, %129, %cst_103 [1] : vector<32x128xf32> to vector<32xf32>
    %131 = vector.shape_cast %130 : vector<32xf32> to vector<32x1xf32>
    %cst_104 = arith.constant dense<0x7F800000> : vector<1xf32>
    %132 = vector.multi_reduction <minimumf>, %131, %cst_104 [0] : vector<32x1xf32> to vector<1xf32>
    %133 = vector.shape_cast %132 : vector<1xf32> to vector<1x1xf32>
    %cst_105 = arith.constant dense<0xFF800000> : vector<32xf32>
    %134 = vector.multi_reduction <maximumf>, %129, %cst_105 [1] : vector<32x128xf32> to vector<32xf32>
    %135 = vector.shape_cast %134 : vector<32xf32> to vector<32x1xf32>
    %cst_106 = arith.constant dense<0xFF800000> : vector<1xf32>
    %136 = vector.multi_reduction <maximumf>, %135, %cst_106 [0] : vector<32x1xf32> to vector<1xf32>
    %137 = vector.shape_cast %136 : vector<1xf32> to vector<1x1xf32>
    %138 = arith.subf %8, %4 : vector<1x1xf32>
    %139 = arith.subf %137, %133 : vector<1x1xf32>
    %140 = arith.divf %138, %139 : vector<1x1xf32>
    %141 = arith.mulf %133, %140 : vector<1x1xf32>
    %142 = arith.subf %4, %141 : vector<1x1xf32>
    %143 = vector.broadcast %140 : vector<1x1xf32> to vector<32x128xf32>
    %144 = arith.mulf %129, %143 : vector<32x128xf32>
    %145 = vector.broadcast %142 : vector<1x1xf32> to vector<32x128xf32>
    %146 = arith.addf %144, %145 : vector<32x128xf32>
    %c3_107 = arith.constant 3 : index
    %c0_108 = arith.constant 0 : index
    %c0_109 = arith.constant 0 : index
    %147 = vector.load %arg5[%c3_107, %c0_108, %c0_109] : memref<12x128x128xf32, #tpu.memory_space<vmem>>, vector<1x128x128xf32>
    %148 = vector.shape_cast %147 : vector<1x128x128xf32> to vector<128x128xf32>
    %cst_110 = arith.constant dense<0.000000e+00> : vector<32x128xf32>
    %149 = tpu.matmul %146, %148, %cst_110 {dimension_numbers = #tpu.dot_dimension_numbers<[1], [0], [0], [1], [0, 0, 1, 1], [], []>} : vector<32x128xf32>, vector<128x128xf32>, vector<32x128xf32> -> vector<32x128xf32>
    %c0_111 = arith.constant 0 : index
    %c0_112 = arith.constant 0 : index
    %c0_113 = arith.constant 0 : index
    %150 = vector.load %arg2[%c0_111, %c0_112, %c0_113] : memref<3x64x32xf32, #tpu.memory_space<vmem>>, vector<1x64x32xf32>
    %151 = vector.shape_cast %150 : vector<1x64x32xf32> to vector<64x32xf32>
    %cst_114 = arith.constant dense<0.000000e+00> : vector<64x128xf32>
    %152 = tpu.matmul %151, %149, %cst_114 {dimension_numbers = #tpu.dot_dimension_numbers<[1], [0], [0], [1], [0, 0, 1, 1], [], []>} : vector<64x32xf32>, vector<32x128xf32>, vector<64x128xf32> -> vector<64x128xf32>
    %c4_115 = arith.constant 4 : index
    %c0_116 = arith.constant 0 : index
    %c0_117 = arith.constant 0 : index
    %153 = vector.load %arg5[%c4_115, %c0_116, %c0_117] : memref<12x128x128xf32, #tpu.memory_space<vmem>>, vector<1x128x128xf32>
    %154 = vector.shape_cast %153 : vector<1x128x128xf32> to vector<128x128xf32>
    %cst_118 = arith.constant dense<0.000000e+00> : vector<32x128xf32>
    %155 = tpu.matmul %146, %154, %cst_118 {dimension_numbers = #tpu.dot_dimension_numbers<[1], [0], [0], [1], [0, 0, 1, 1], [], []>} : vector<32x128xf32>, vector<128x128xf32>, vector<32x128xf32> -> vector<32x128xf32>
    %c1_119 = arith.constant 1 : index
    %c0_120 = arith.constant 0 : index
    %c0_121 = arith.constant 0 : index
    %156 = vector.load %arg2[%c1_119, %c0_120, %c0_121] : memref<3x64x32xf32, #tpu.memory_space<vmem>>, vector<1x64x32xf32>
    %157 = vector.shape_cast %156 : vector<1x64x32xf32> to vector<64x32xf32>
    %cst_122 = arith.constant dense<0.000000e+00> : vector<64x128xf32>
    %158 = tpu.matmul %157, %155, %cst_122 {dimension_numbers = #tpu.dot_dimension_numbers<[1], [0], [0], [1], [0, 0, 1, 1], [], []>} : vector<64x32xf32>, vector<32x128xf32>, vector<64x128xf32> -> vector<64x128xf32>
    %159 = arith.addf %152, %158 : vector<64x128xf32>
    %c5_123 = arith.constant 5 : index
    %c0_124 = arith.constant 0 : index
    %c0_125 = arith.constant 0 : index
    %160 = vector.load %arg5[%c5_123, %c0_124, %c0_125] : memref<12x128x128xf32, #tpu.memory_space<vmem>>, vector<1x128x128xf32>
    %161 = vector.shape_cast %160 : vector<1x128x128xf32> to vector<128x128xf32>
    %cst_126 = arith.constant dense<0.000000e+00> : vector<32x128xf32>
    %162 = tpu.matmul %146, %161, %cst_126 {dimension_numbers = #tpu.dot_dimension_numbers<[1], [0], [0], [1], [0, 0, 1, 1], [], []>} : vector<32x128xf32>, vector<128x128xf32>, vector<32x128xf32> -> vector<32x128xf32>
    %c2_127 = arith.constant 2 : index
    %c0_128 = arith.constant 0 : index
    %c0_129 = arith.constant 0 : index
    %163 = vector.load %arg2[%c2_127, %c0_128, %c0_129] : memref<3x64x32xf32, #tpu.memory_space<vmem>>, vector<1x64x32xf32>
    %164 = vector.shape_cast %163 : vector<1x64x32xf32> to vector<64x32xf32>
    %cst_130 = arith.constant dense<0.000000e+00> : vector<64x128xf32>
    %165 = tpu.matmul %164, %162, %cst_130 {dimension_numbers = #tpu.dot_dimension_numbers<[1], [0], [0], [1], [0, 0, 1, 1], [], []>} : vector<64x32xf32>, vector<32x128xf32>, vector<64x128xf32> -> vector<64x128xf32>
    %166 = arith.addf %159, %165 : vector<64x128xf32>
    %c1_131 = arith.constant 1 : index
    %167 = memref.load %arg8[%c1_131] : memref<4xf32, #tpu.memory_space<smem>>
    %168 = vector.broadcast %167 : f32 to vector<64x128xf32>
    %169 = arith.addf %166, %168 : vector<64x128xf32>
    %cst_132 = arith.constant 5.000000e-01 : f32
    %170 = vector.broadcast %cst_132 : f32 to vector<64x128xf32>
    %171 = arith.mulf %170, %169 : vector<64x128xf32>
    %172 = math.tanh %171 : vector<64x128xf32>
    %cst_133 = arith.constant 1.000000e+00 : f32
    %173 = vector.broadcast %cst_133 : f32 to vector<64x128xf32>
    %174 = arith.addf %172, %173 : vector<64x128xf32>
    %cst_134 = arith.constant 5.000000e-01 : f32
    %175 = vector.broadcast %cst_134 : f32 to vector<64x128xf32>
    %176 = arith.mulf %175, %174 : vector<64x128xf32>
    %c0_135 = arith.constant 0 : index
    %c0_136 = arith.constant 0 : index
    %c0_137 = arith.constant 0 : index
    %177 = vector.load %arg1[%c0_135, %c0_136, %c0_137] : memref<3x32x64xf32, #tpu.memory_space<vmem>>, vector<1x32x64xf32>
    %178 = vector.shape_cast %177 : vector<1x32x64xf32> to vector<32x64xf32>
    %cst_138 = arith.constant dense<0.000000e+00> : vector<32x128xf32>
    %179 = tpu.matmul %178, %176, %cst_138 {dimension_numbers = #tpu.dot_dimension_numbers<[1], [0], [0], [1], [0, 0, 1, 1], [], []>} : vector<32x64xf32>, vector<64x128xf32>, vector<32x128xf32> -> vector<32x128xf32>
    %c6 = arith.constant 6 : index
    %c0_139 = arith.constant 0 : index
    %c0_140 = arith.constant 0 : index
    %180 = vector.load %arg3[%c6, %c0_139, %c0_140] : memref<12x128x192xf32, #tpu.memory_space<vmem>>, vector<1x128x192xf32>
    %181 = vector.shape_cast %180 : vector<1x128x192xf32> to vector<128x192xf32>
    %cst_141 = arith.constant dense<0.000000e+00> : vector<32x192xf32>
    %182 = tpu.matmul %179, %181, %cst_141 {dimension_numbers = #tpu.dot_dimension_numbers<[1], [0], [0], [1], [0, 0, 1, 1], [], []>} : vector<32x128xf32>, vector<128x192xf32>, vector<32x192xf32> -> vector<32x192xf32>
    %c1_142 = arith.constant 1 : index
    %c0_143 = arith.constant 0 : index
    %c0_144 = arith.constant 0 : index
    %183 = vector.load %arg1[%c1_142, %c0_143, %c0_144] : memref<3x32x64xf32, #tpu.memory_space<vmem>>, vector<1x32x64xf32>
    %184 = vector.shape_cast %183 : vector<1x32x64xf32> to vector<32x64xf32>
    %cst_145 = arith.constant dense<0.000000e+00> : vector<32x128xf32>
    %185 = tpu.matmul %184, %176, %cst_145 {dimension_numbers = #tpu.dot_dimension_numbers<[1], [0], [0], [1], [0, 0, 1, 1], [], []>} : vector<32x64xf32>, vector<64x128xf32>, vector<32x128xf32> -> vector<32x128xf32>
    %c7 = arith.constant 7 : index
    %c0_146 = arith.constant 0 : index
    %c0_147 = arith.constant 0 : index
    %186 = vector.load %arg3[%c7, %c0_146, %c0_147] : memref<12x128x192xf32, #tpu.memory_space<vmem>>, vector<1x128x192xf32>
    %187 = vector.shape_cast %186 : vector<1x128x192xf32> to vector<128x192xf32>
    %cst_148 = arith.constant dense<0.000000e+00> : vector<32x192xf32>
    %188 = tpu.matmul %185, %187, %cst_148 {dimension_numbers = #tpu.dot_dimension_numbers<[1], [0], [0], [1], [0, 0, 1, 1], [], []>} : vector<32x128xf32>, vector<128x192xf32>, vector<32x192xf32> -> vector<32x192xf32>
    %189 = arith.addf %182, %188 : vector<32x192xf32>
    %c2_149 = arith.constant 2 : index
    %c0_150 = arith.constant 0 : index
    %c0_151 = arith.constant 0 : index
    %190 = vector.load %arg1[%c2_149, %c0_150, %c0_151] : memref<3x32x64xf32, #tpu.memory_space<vmem>>, vector<1x32x64xf32>
    %191 = vector.shape_cast %190 : vector<1x32x64xf32> to vector<32x64xf32>
    %cst_152 = arith.constant dense<0.000000e+00> : vector<32x128xf32>
    %192 = tpu.matmul %191, %176, %cst_152 {dimension_numbers = #tpu.dot_dimension_numbers<[1], [0], [0], [1], [0, 0, 1, 1], [], []>} : vector<32x64xf32>, vector<64x128xf32>, vector<32x128xf32> -> vector<32x128xf32>
    %c8 = arith.constant 8 : index
    %c0_153 = arith.constant 0 : index
    %c0_154 = arith.constant 0 : index
    %193 = vector.load %arg3[%c8, %c0_153, %c0_154] : memref<12x128x192xf32, #tpu.memory_space<vmem>>, vector<1x128x192xf32>
    %194 = vector.shape_cast %193 : vector<1x128x192xf32> to vector<128x192xf32>
    %cst_155 = arith.constant dense<0.000000e+00> : vector<32x192xf32>
    %195 = tpu.matmul %192, %194, %cst_155 {dimension_numbers = #tpu.dot_dimension_numbers<[1], [0], [0], [1], [0, 0, 1, 1], [], []>} : vector<32x128xf32>, vector<128x192xf32>, vector<32x192xf32> -> vector<32x192xf32>
    %196 = arith.addf %189, %195 : vector<32x192xf32>
    %c2_156 = arith.constant 2 : index
    %c0_157 = arith.constant 0 : index
    %c0_158 = arith.constant 0 : index
    %197 = vector.load %arg6[%c2_156, %c0_157, %c0_158] : memref<4x1x192xf32, #tpu.memory_space<vmem>>, vector<1x1x192xf32>
    %198 = vector.shape_cast %197 : vector<1x1x192xf32> to vector<1x192xf32>
    %199 = vector.broadcast %198 : vector<1x192xf32> to vector<32x192xf32>
    %200 = arith.addf %196, %199 : vector<32x192xf32>
    %cst_159 = arith.constant 2.000000e-01 : f32
    %201 = vector.broadcast %cst_159 : f32 to vector<32x192xf32>
    %202 = arith.mulf %201, %200 : vector<32x192xf32>
    %203 = arith.maximumf %200, %202 : vector<32x192xf32>
    %c2_160 = arith.constant 2 : index
    %c0_161 = arith.constant 0 : index
    %c0_162 = arith.constant 0 : index
    %204 = vector.load %arg4[%c2_160, %c0_161, %c0_162] : memref<4x192x128xf32, #tpu.memory_space<vmem>>, vector<1x192x128xf32>
    %205 = vector.shape_cast %204 : vector<1x192x128xf32> to vector<192x128xf32>
    %cst_163 = arith.constant dense<0.000000e+00> : vector<32x128xf32>
    %206 = tpu.matmul %203, %205, %cst_163 {dimension_numbers = #tpu.dot_dimension_numbers<[1], [0], [0], [1], [0, 0, 1, 1], [], []>} : vector<32x192xf32>, vector<192x128xf32>, vector<32x128xf32> -> vector<32x128xf32>
    %c2_164 = arith.constant 2 : index
    %c0_165 = arith.constant 0 : index
    %c0_166 = arith.constant 0 : index
    %207 = vector.load %arg7[%c2_164, %c0_165, %c0_166] : memref<4x1x128xf32, #tpu.memory_space<vmem>>, vector<1x1x128xf32>
    %208 = vector.shape_cast %207 : vector<1x1x128xf32> to vector<1x128xf32>
    %209 = vector.broadcast %208 : vector<1x128xf32> to vector<32x128xf32>
    %210 = arith.addf %206, %209 : vector<32x128xf32>
    %cst_167 = arith.constant 2.000000e-01 : f32
    %211 = vector.broadcast %cst_167 : f32 to vector<32x128xf32>
    %212 = arith.mulf %211, %210 : vector<32x128xf32>
    %213 = arith.maximumf %210, %212 : vector<32x128xf32>
    %cst_168 = arith.constant dense<0x7F800000> : vector<32xf32>
    %214 = vector.multi_reduction <minimumf>, %213, %cst_168 [1] : vector<32x128xf32> to vector<32xf32>
    %215 = vector.shape_cast %214 : vector<32xf32> to vector<32x1xf32>
    %cst_169 = arith.constant dense<0x7F800000> : vector<1xf32>
    %216 = vector.multi_reduction <minimumf>, %215, %cst_169 [0] : vector<32x1xf32> to vector<1xf32>
    %217 = vector.shape_cast %216 : vector<1xf32> to vector<1x1xf32>
    %cst_170 = arith.constant dense<0xFF800000> : vector<32xf32>
    %218 = vector.multi_reduction <maximumf>, %213, %cst_170 [1] : vector<32x128xf32> to vector<32xf32>
    %219 = vector.shape_cast %218 : vector<32xf32> to vector<32x1xf32>
    %cst_171 = arith.constant dense<0xFF800000> : vector<1xf32>
    %220 = vector.multi_reduction <maximumf>, %219, %cst_171 [0] : vector<32x1xf32> to vector<1xf32>
    %221 = vector.shape_cast %220 : vector<1xf32> to vector<1x1xf32>
    %222 = arith.subf %8, %4 : vector<1x1xf32>
    %223 = arith.subf %221, %217 : vector<1x1xf32>
    %224 = arith.divf %222, %223 : vector<1x1xf32>
    %225 = arith.mulf %217, %224 : vector<1x1xf32>
    %226 = arith.subf %4, %225 : vector<1x1xf32>
    %227 = vector.broadcast %224 : vector<1x1xf32> to vector<32x128xf32>
    %228 = arith.mulf %213, %227 : vector<32x128xf32>
    %229 = vector.broadcast %226 : vector<1x1xf32> to vector<32x128xf32>
    %230 = arith.addf %228, %229 : vector<32x128xf32>
    %c6_172 = arith.constant 6 : index
    %c0_173 = arith.constant 0 : index
    %c0_174 = arith.constant 0 : index
    %231 = vector.load %arg5[%c6_172, %c0_173, %c0_174] : memref<12x128x128xf32, #tpu.memory_space<vmem>>, vector<1x128x128xf32>
    %232 = vector.shape_cast %231 : vector<1x128x128xf32> to vector<128x128xf32>
    %cst_175 = arith.constant dense<0.000000e+00> : vector<32x128xf32>
    %233 = tpu.matmul %230, %232, %cst_175 {dimension_numbers = #tpu.dot_dimension_numbers<[1], [0], [0], [1], [0, 0, 1, 1], [], []>} : vector<32x128xf32>, vector<128x128xf32>, vector<32x128xf32> -> vector<32x128xf32>
    %c0_176 = arith.constant 0 : index
    %c0_177 = arith.constant 0 : index
    %c0_178 = arith.constant 0 : index
    %234 = vector.load %arg2[%c0_176, %c0_177, %c0_178] : memref<3x64x32xf32, #tpu.memory_space<vmem>>, vector<1x64x32xf32>
    %235 = vector.shape_cast %234 : vector<1x64x32xf32> to vector<64x32xf32>
    %cst_179 = arith.constant dense<0.000000e+00> : vector<64x128xf32>
    %236 = tpu.matmul %235, %233, %cst_179 {dimension_numbers = #tpu.dot_dimension_numbers<[1], [0], [0], [1], [0, 0, 1, 1], [], []>} : vector<64x32xf32>, vector<32x128xf32>, vector<64x128xf32> -> vector<64x128xf32>
    %c7_180 = arith.constant 7 : index
    %c0_181 = arith.constant 0 : index
    %c0_182 = arith.constant 0 : index
    %237 = vector.load %arg5[%c7_180, %c0_181, %c0_182] : memref<12x128x128xf32, #tpu.memory_space<vmem>>, vector<1x128x128xf32>
    %238 = vector.shape_cast %237 : vector<1x128x128xf32> to vector<128x128xf32>
    %cst_183 = arith.constant dense<0.000000e+00> : vector<32x128xf32>
    %239 = tpu.matmul %230, %238, %cst_183 {dimension_numbers = #tpu.dot_dimension_numbers<[1], [0], [0], [1], [0, 0, 1, 1], [], []>} : vector<32x128xf32>, vector<128x128xf32>, vector<32x128xf32> -> vector<32x128xf32>
    %c1_184 = arith.constant 1 : index
    %c0_185 = arith.constant 0 : index
    %c0_186 = arith.constant 0 : index
    %240 = vector.load %arg2[%c1_184, %c0_185, %c0_186] : memref<3x64x32xf32, #tpu.memory_space<vmem>>, vector<1x64x32xf32>
    %241 = vector.shape_cast %240 : vector<1x64x32xf32> to vector<64x32xf32>
    %cst_187 = arith.constant dense<0.000000e+00> : vector<64x128xf32>
    %242 = tpu.matmul %241, %239, %cst_187 {dimension_numbers = #tpu.dot_dimension_numbers<[1], [0], [0], [1], [0, 0, 1, 1], [], []>} : vector<64x32xf32>, vector<32x128xf32>, vector<64x128xf32> -> vector<64x128xf32>
    %243 = arith.addf %236, %242 : vector<64x128xf32>
    %c8_188 = arith.constant 8 : index
    %c0_189 = arith.constant 0 : index
    %c0_190 = arith.constant 0 : index
    %244 = vector.load %arg5[%c8_188, %c0_189, %c0_190] : memref<12x128x128xf32, #tpu.memory_space<vmem>>, vector<1x128x128xf32>
    %245 = vector.shape_cast %244 : vector<1x128x128xf32> to vector<128x128xf32>
    %cst_191 = arith.constant dense<0.000000e+00> : vector<32x128xf32>
    %246 = tpu.matmul %230, %245, %cst_191 {dimension_numbers = #tpu.dot_dimension_numbers<[1], [0], [0], [1], [0, 0, 1, 1], [], []>} : vector<32x128xf32>, vector<128x128xf32>, vector<32x128xf32> -> vector<32x128xf32>
    %c2_192 = arith.constant 2 : index
    %c0_193 = arith.constant 0 : index
    %c0_194 = arith.constant 0 : index
    %247 = vector.load %arg2[%c2_192, %c0_193, %c0_194] : memref<3x64x32xf32, #tpu.memory_space<vmem>>, vector<1x64x32xf32>
    %248 = vector.shape_cast %247 : vector<1x64x32xf32> to vector<64x32xf32>
    %cst_195 = arith.constant dense<0.000000e+00> : vector<64x128xf32>
    %249 = tpu.matmul %248, %246, %cst_195 {dimension_numbers = #tpu.dot_dimension_numbers<[1], [0], [0], [1], [0, 0, 1, 1], [], []>} : vector<64x32xf32>, vector<32x128xf32>, vector<64x128xf32> -> vector<64x128xf32>
    %250 = arith.addf %243, %249 : vector<64x128xf32>
    %c2_196 = arith.constant 2 : index
    %251 = memref.load %arg8[%c2_196] : memref<4xf32, #tpu.memory_space<smem>>
    %252 = vector.broadcast %251 : f32 to vector<64x128xf32>
    %253 = arith.addf %250, %252 : vector<64x128xf32>
    %cst_197 = arith.constant 5.000000e-01 : f32
    %254 = vector.broadcast %cst_197 : f32 to vector<64x128xf32>
    %255 = arith.mulf %254, %253 : vector<64x128xf32>
    %256 = math.tanh %255 : vector<64x128xf32>
    %cst_198 = arith.constant 1.000000e+00 : f32
    %257 = vector.broadcast %cst_198 : f32 to vector<64x128xf32>
    %258 = arith.addf %256, %257 : vector<64x128xf32>
    %cst_199 = arith.constant 5.000000e-01 : f32
    %259 = vector.broadcast %cst_199 : f32 to vector<64x128xf32>
    %260 = arith.mulf %259, %258 : vector<64x128xf32>
    %c0_200 = arith.constant 0 : index
    %c0_201 = arith.constant 0 : index
    %c0_202 = arith.constant 0 : index
    %261 = vector.load %arg1[%c0_200, %c0_201, %c0_202] : memref<3x32x64xf32, #tpu.memory_space<vmem>>, vector<1x32x64xf32>
    %262 = vector.shape_cast %261 : vector<1x32x64xf32> to vector<32x64xf32>
    %cst_203 = arith.constant dense<0.000000e+00> : vector<32x128xf32>
    %263 = tpu.matmul %262, %260, %cst_203 {dimension_numbers = #tpu.dot_dimension_numbers<[1], [0], [0], [1], [0, 0, 1, 1], [], []>} : vector<32x64xf32>, vector<64x128xf32>, vector<32x128xf32> -> vector<32x128xf32>
    %c9 = arith.constant 9 : index
    %c0_204 = arith.constant 0 : index
    %c0_205 = arith.constant 0 : index
    %264 = vector.load %arg3[%c9, %c0_204, %c0_205] : memref<12x128x192xf32, #tpu.memory_space<vmem>>, vector<1x128x192xf32>
    %265 = vector.shape_cast %264 : vector<1x128x192xf32> to vector<128x192xf32>
    %cst_206 = arith.constant dense<0.000000e+00> : vector<32x192xf32>
    %266 = tpu.matmul %263, %265, %cst_206 {dimension_numbers = #tpu.dot_dimension_numbers<[1], [0], [0], [1], [0, 0, 1, 1], [], []>} : vector<32x128xf32>, vector<128x192xf32>, vector<32x192xf32> -> vector<32x192xf32>
    %c1_207 = arith.constant 1 : index
    %c0_208 = arith.constant 0 : index
    %c0_209 = arith.constant 0 : index
    %267 = vector.load %arg1[%c1_207, %c0_208, %c0_209] : memref<3x32x64xf32, #tpu.memory_space<vmem>>, vector<1x32x64xf32>
    %268 = vector.shape_cast %267 : vector<1x32x64xf32> to vector<32x64xf32>
    %cst_210 = arith.constant dense<0.000000e+00> : vector<32x128xf32>
    %269 = tpu.matmul %268, %260, %cst_210 {dimension_numbers = #tpu.dot_dimension_numbers<[1], [0], [0], [1], [0, 0, 1, 1], [], []>} : vector<32x64xf32>, vector<64x128xf32>, vector<32x128xf32> -> vector<32x128xf32>
    %c10 = arith.constant 10 : index
    %c0_211 = arith.constant 0 : index
    %c0_212 = arith.constant 0 : index
    %270 = vector.load %arg3[%c10, %c0_211, %c0_212] : memref<12x128x192xf32, #tpu.memory_space<vmem>>, vector<1x128x192xf32>
    %271 = vector.shape_cast %270 : vector<1x128x192xf32> to vector<128x192xf32>
    %cst_213 = arith.constant dense<0.000000e+00> : vector<32x192xf32>
    %272 = tpu.matmul %269, %271, %cst_213 {dimension_numbers = #tpu.dot_dimension_numbers<[1], [0], [0], [1], [0, 0, 1, 1], [], []>} : vector<32x128xf32>, vector<128x192xf32>, vector<32x192xf32> -> vector<32x192xf32>
    %273 = arith.addf %266, %272 : vector<32x192xf32>
    %c2_214 = arith.constant 2 : index
    %c0_215 = arith.constant 0 : index
    %c0_216 = arith.constant 0 : index
    %274 = vector.load %arg1[%c2_214, %c0_215, %c0_216] : memref<3x32x64xf32, #tpu.memory_space<vmem>>, vector<1x32x64xf32>
    %275 = vector.shape_cast %274 : vector<1x32x64xf32> to vector<32x64xf32>
    %cst_217 = arith.constant dense<0.000000e+00> : vector<32x128xf32>
    %276 = tpu.matmul %275, %260, %cst_217 {dimension_numbers = #tpu.dot_dimension_numbers<[1], [0], [0], [1], [0, 0, 1, 1], [], []>} : vector<32x64xf32>, vector<64x128xf32>, vector<32x128xf32> -> vector<32x128xf32>
    %c11 = arith.constant 11 : index
    %c0_218 = arith.constant 0 : index
    %c0_219 = arith.constant 0 : index
    %277 = vector.load %arg3[%c11, %c0_218, %c0_219] : memref<12x128x192xf32, #tpu.memory_space<vmem>>, vector<1x128x192xf32>
    %278 = vector.shape_cast %277 : vector<1x128x192xf32> to vector<128x192xf32>
    %cst_220 = arith.constant dense<0.000000e+00> : vector<32x192xf32>
    %279 = tpu.matmul %276, %278, %cst_220 {dimension_numbers = #tpu.dot_dimension_numbers<[1], [0], [0], [1], [0, 0, 1, 1], [], []>} : vector<32x128xf32>, vector<128x192xf32>, vector<32x192xf32> -> vector<32x192xf32>
    %280 = arith.addf %273, %279 : vector<32x192xf32>
    %c3_221 = arith.constant 3 : index
    %c0_222 = arith.constant 0 : index
    %c0_223 = arith.constant 0 : index
    %281 = vector.load %arg6[%c3_221, %c0_222, %c0_223] : memref<4x1x192xf32, #tpu.memory_space<vmem>>, vector<1x1x192xf32>
    %282 = vector.shape_cast %281 : vector<1x1x192xf32> to vector<1x192xf32>
    %283 = vector.broadcast %282 : vector<1x192xf32> to vector<32x192xf32>
    %284 = arith.addf %280, %283 : vector<32x192xf32>
    %cst_224 = arith.constant 2.000000e-01 : f32
    %285 = vector.broadcast %cst_224 : f32 to vector<32x192xf32>
    %286 = arith.mulf %285, %284 : vector<32x192xf32>
    %287 = arith.maximumf %284, %286 : vector<32x192xf32>
    %c3_225 = arith.constant 3 : index
    %c0_226 = arith.constant 0 : index
    %c0_227 = arith.constant 0 : index
    %288 = vector.load %arg4[%c3_225, %c0_226, %c0_227] : memref<4x192x128xf32, #tpu.memory_space<vmem>>, vector<1x192x128xf32>
    %289 = vector.shape_cast %288 : vector<1x192x128xf32> to vector<192x128xf32>
    %cst_228 = arith.constant dense<0.000000e+00> : vector<32x128xf32>
    %290 = tpu.matmul %287, %289, %cst_228 {dimension_numbers = #tpu.dot_dimension_numbers<[1], [0], [0], [1], [0, 0, 1, 1], [], []>} : vector<32x192xf32>, vector<192x128xf32>, vector<32x128xf32> -> vector<32x128xf32>
    %c3_229 = arith.constant 3 : index
    %c0_230 = arith.constant 0 : index
    %c0_231 = arith.constant 0 : index
    %291 = vector.load %arg7[%c3_229, %c0_230, %c0_231] : memref<4x1x128xf32, #tpu.memory_space<vmem>>, vector<1x1x128xf32>
    %292 = vector.shape_cast %291 : vector<1x1x128xf32> to vector<1x128xf32>
    %293 = vector.broadcast %292 : vector<1x128xf32> to vector<32x128xf32>
    %294 = arith.addf %290, %293 : vector<32x128xf32>
    %cst_232 = arith.constant 2.000000e-01 : f32
    %295 = vector.broadcast %cst_232 : f32 to vector<32x128xf32>
    %296 = arith.mulf %295, %294 : vector<32x128xf32>
    %297 = arith.maximumf %294, %296 : vector<32x128xf32>
    %cst_233 = arith.constant dense<0x7F800000> : vector<32xf32>
    %298 = vector.multi_reduction <minimumf>, %297, %cst_233 [1] : vector<32x128xf32> to vector<32xf32>
    %299 = vector.shape_cast %298 : vector<32xf32> to vector<32x1xf32>
    %cst_234 = arith.constant dense<0x7F800000> : vector<1xf32>
    %300 = vector.multi_reduction <minimumf>, %299, %cst_234 [0] : vector<32x1xf32> to vector<1xf32>
    %301 = vector.shape_cast %300 : vector<1xf32> to vector<1x1xf32>
    %cst_235 = arith.constant dense<0xFF800000> : vector<32xf32>
    %302 = vector.multi_reduction <maximumf>, %297, %cst_235 [1] : vector<32x128xf32> to vector<32xf32>
    %303 = vector.shape_cast %302 : vector<32xf32> to vector<32x1xf32>
    %cst_236 = arith.constant dense<0xFF800000> : vector<1xf32>
    %304 = vector.multi_reduction <maximumf>, %303, %cst_236 [0] : vector<32x1xf32> to vector<1xf32>
    %305 = vector.shape_cast %304 : vector<1xf32> to vector<1x1xf32>
    %306 = arith.subf %8, %4 : vector<1x1xf32>
    %307 = arith.subf %305, %301 : vector<1x1xf32>
    %308 = arith.divf %306, %307 : vector<1x1xf32>
    %309 = arith.mulf %301, %308 : vector<1x1xf32>
    %310 = arith.subf %4, %309 : vector<1x1xf32>
    %311 = vector.broadcast %308 : vector<1x1xf32> to vector<32x128xf32>
    %312 = arith.mulf %297, %311 : vector<32x128xf32>
    %313 = vector.broadcast %310 : vector<1x1xf32> to vector<32x128xf32>
    %314 = arith.addf %312, %313 : vector<32x128xf32>
    %c9_237 = arith.constant 9 : index
    %c0_238 = arith.constant 0 : index
    %c0_239 = arith.constant 0 : index
    %315 = vector.load %arg5[%c9_237, %c0_238, %c0_239] : memref<12x128x128xf32, #tpu.memory_space<vmem>>, vector<1x128x128xf32>
    %316 = vector.shape_cast %315 : vector<1x128x128xf32> to vector<128x128xf32>
    %cst_240 = arith.constant dense<0.000000e+00> : vector<32x128xf32>
    %317 = tpu.matmul %314, %316, %cst_240 {dimension_numbers = #tpu.dot_dimension_numbers<[1], [0], [0], [1], [0, 0, 1, 1], [], []>} : vector<32x128xf32>, vector<128x128xf32>, vector<32x128xf32> -> vector<32x128xf32>
    %c0_241 = arith.constant 0 : index
    %c0_242 = arith.constant 0 : index
    %c0_243 = arith.constant 0 : index
    %318 = vector.load %arg2[%c0_241, %c0_242, %c0_243] : memref<3x64x32xf32, #tpu.memory_space<vmem>>, vector<1x64x32xf32>
    %319 = vector.shape_cast %318 : vector<1x64x32xf32> to vector<64x32xf32>
    %cst_244 = arith.constant dense<0.000000e+00> : vector<64x128xf32>
    %320 = tpu.matmul %319, %317, %cst_244 {dimension_numbers = #tpu.dot_dimension_numbers<[1], [0], [0], [1], [0, 0, 1, 1], [], []>} : vector<64x32xf32>, vector<32x128xf32>, vector<64x128xf32> -> vector<64x128xf32>
    %c10_245 = arith.constant 10 : index
    %c0_246 = arith.constant 0 : index
    %c0_247 = arith.constant 0 : index
    %321 = vector.load %arg5[%c10_245, %c0_246, %c0_247] : memref<12x128x128xf32, #tpu.memory_space<vmem>>, vector<1x128x128xf32>
    %322 = vector.shape_cast %321 : vector<1x128x128xf32> to vector<128x128xf32>
    %cst_248 = arith.constant dense<0.000000e+00> : vector<32x128xf32>
    %323 = tpu.matmul %314, %322, %cst_248 {dimension_numbers = #tpu.dot_dimension_numbers<[1], [0], [0], [1], [0, 0, 1, 1], [], []>} : vector<32x128xf32>, vector<128x128xf32>, vector<32x128xf32> -> vector<32x128xf32>
    %c1_249 = arith.constant 1 : index
    %c0_250 = arith.constant 0 : index
    %c0_251 = arith.constant 0 : index
    %324 = vector.load %arg2[%c1_249, %c0_250, %c0_251] : memref<3x64x32xf32, #tpu.memory_space<vmem>>, vector<1x64x32xf32>
    %325 = vector.shape_cast %324 : vector<1x64x32xf32> to vector<64x32xf32>
    %cst_252 = arith.constant dense<0.000000e+00> : vector<64x128xf32>
    %326 = tpu.matmul %325, %323, %cst_252 {dimension_numbers = #tpu.dot_dimension_numbers<[1], [0], [0], [1], [0, 0, 1, 1], [], []>} : vector<64x32xf32>, vector<32x128xf32>, vector<64x128xf32> -> vector<64x128xf32>
    %327 = arith.addf %320, %326 : vector<64x128xf32>
    %c11_253 = arith.constant 11 : index
    %c0_254 = arith.constant 0 : index
    %c0_255 = arith.constant 0 : index
    %328 = vector.load %arg5[%c11_253, %c0_254, %c0_255] : memref<12x128x128xf32, #tpu.memory_space<vmem>>, vector<1x128x128xf32>
    %329 = vector.shape_cast %328 : vector<1x128x128xf32> to vector<128x128xf32>
    %cst_256 = arith.constant dense<0.000000e+00> : vector<32x128xf32>
    %330 = tpu.matmul %314, %329, %cst_256 {dimension_numbers = #tpu.dot_dimension_numbers<[1], [0], [0], [1], [0, 0, 1, 1], [], []>} : vector<32x128xf32>, vector<128x128xf32>, vector<32x128xf32> -> vector<32x128xf32>
    %c2_257 = arith.constant 2 : index
    %c0_258 = arith.constant 0 : index
    %c0_259 = arith.constant 0 : index
    %331 = vector.load %arg2[%c2_257, %c0_258, %c0_259] : memref<3x64x32xf32, #tpu.memory_space<vmem>>, vector<1x64x32xf32>
    %332 = vector.shape_cast %331 : vector<1x64x32xf32> to vector<64x32xf32>
    %cst_260 = arith.constant dense<0.000000e+00> : vector<64x128xf32>
    %333 = tpu.matmul %332, %330, %cst_260 {dimension_numbers = #tpu.dot_dimension_numbers<[1], [0], [0], [1], [0, 0, 1, 1], [], []>} : vector<64x32xf32>, vector<32x128xf32>, vector<64x128xf32> -> vector<64x128xf32>
    %334 = arith.addf %327, %333 : vector<64x128xf32>
    %c3_261 = arith.constant 3 : index
    %335 = memref.load %arg8[%c3_261] : memref<4xf32, #tpu.memory_space<smem>>
    %336 = vector.broadcast %335 : f32 to vector<64x128xf32>
    %337 = arith.addf %334, %336 : vector<64x128xf32>
    %cst_262 = arith.constant 5.000000e-01 : f32
    %338 = vector.broadcast %cst_262 : f32 to vector<64x128xf32>
    %339 = arith.mulf %338, %337 : vector<64x128xf32>
    %340 = math.tanh %339 : vector<64x128xf32>
    %cst_263 = arith.constant 1.000000e+00 : f32
    %341 = vector.broadcast %cst_263 : f32 to vector<64x128xf32>
    %342 = arith.addf %340, %341 : vector<64x128xf32>
    %cst_264 = arith.constant 5.000000e-01 : f32
    %343 = vector.broadcast %cst_264 : f32 to vector<64x128xf32>
    %344 = arith.mulf %343, %342 : vector<64x128xf32>
    %c0_265 = arith.constant 0 : index
    %c0_266 = arith.constant 0 : index
    %345 = vector.load %arg9[%c0_265, %c0_266] : memref<64x128xf32, #tpu.memory_space<vmem>>, vector<64x128xf32>
    tpu.vector_store %arg9[%c0_265, %c0_266], %344 {strides = array<i32>} : memref<64x128xf32, #tpu.memory_space<vmem>>, vector<64x128xf32>,
    return
  }
}

</mosaic_0001>

<bundles_post_ra>
// kernel: tile.51
= control target key start
LH: loop header
LB: loop body
LE: loop exit
PB: predicated region body
PF: predicated region fallthrough
CT: control target
= control target key end

     0   :  { %vm7_vm0 = vcmask 261120   ;;  %s30_s8 = smov 32   ;;  %vm13_vm1 = vcmask 785920   ;;  %vm19_vm2 = vcmask 523520   ;;  %s47_s0 = inlined_call_operand.vmem [shape: f32[3,32], index: 0, kind: input, shape index: {}]   ;;  %s48_s1 = inlined_call_operand.vmem [shape: f32[96], index: 1, kind: output, shape index: {}]  }
   0x1   :  { %v4_v0 = vld [vmem:[%s47_s0] sm:$0xf]  ;;  %s29_s0 = smov 64  }
   0x2   :  { %5 = vst [vmem:[#allocation1] sm:$0xf] %v4_v0 }
   0x9   :  { %v10_v1 = vld [vmem:[#allocation1 + $0x2] sm:$0x1]   ;;  %v6_v2 = vld [vmem:[#allocation1] sm:$0x1]   ;;  %v16_v3 = vld [vmem:[#allocation1 + $0x1] sm:$0x1]  }
   0xa   :  { %11 = vrot.lane.b32.xlu0 %v10_v1, %s29_s0  ;;  %8 = vst.msk [vmem:[#allocation0] sm:$0x1] %vm7_vm0, %v6_v2  }
   0xe   :  { %17 = vrot.lane.b32.xlu0 %v16_v3, %s30_s8 }
  0x7c   :  { %v12_v4 = vpop.permute.xlu0 %11  }
  0x7d   :  { %14 = vst.msk [vmem:[#allocation0] sm:$0x1] %vm13_vm1, %v12_v4  }
  0x80   :  { %v18_v5 = vpop.permute.xlu0 %17  }
  0x81   :  { %20 = vst.msk [vmem:[#allocation0] sm:$0x1] %vm19_vm2, %v18_v5  }
  0x88   :  { %v24_v6 = vld [vmem:[#allocation0] sm:$0x1] }
  0x89   :  { %26 = vst [vmem:[%s48_s1] sm:$0x1] %v24_v6 }

// kernel: tile.52
= control target key start
LH: loop header
LB: loop body
LE: loop exit
PB: predicated region body
PF: predicated region fallthrough
CT: control target
= control target key end

     0   :  { %s22_s0 = inlined_call_operand.vmem [shape: f32[96], index: 0, kind: input, shape index: {}]   ;;  %s23_s1 = inlined_call_operand.vmem [shape: f32[2,96], index: 1, kind: output, shape index: {}]  }
   0x1   :  { %v4_v0 = vld [vmem:[%s22_s0] ss:$0 sm:$0xff] }
   0x2   :  { %5 = vst [vmem:[%s23_s1] sm:$0x3] %v4_v0 }

// kernel: tile.59
= control target key start
LH: loop header
LB: loop body
LE: loop exit
PB: predicated region body
PF: predicated region fallthrough
CT: control target
= control target key end

     0   :  { %vm13_vm0 = vcmask 261120   ;;  %vm7_vm1 = vcmask 785408   ;;  %vm17_vm2 = vcmask 523264   ;;  %vm20_vm3 = vcmask 1048320   ;;  %s55_s0 = inlined_call_operand.vmem [shape: f32[2,96], index: 0, kind: input, shape index: {}]   ;;  %s56_s1 = inlined_call_operand.vmem [shape: f32[1,1,192], index: 1, kind: output, shape index: {}]  }
   0x1   :  { %v4_v0 = vld [vmem:[%s55_s0] sm:$0x3]  ;;  %s35_s0 = smov 96  }
   0x2   :  { %5 = vst [vmem:[#allocation1] sm:$0x3] %v4_v0 }
   0x9   :  { %v10_v1 = vld [vmem:[#allocation1 + $0x1] sm:$0x1]   ;;  %v6_v3 = vld [vmem:[#allocation1] sm:$0x1]  }
   0xa   :  { %v12_v2 = vld [vmem:[#allocation1 + $0x1] sm:$0x1]   ;;  %8 = vst.msk [vmem:[#allocation0] sm:$0x1] %vm7_vm1, %v6_v3  }
   0xb   :  { %v14_v4 = vsel %vm13_vm0, %v12_v2, %v10_v1 }
   0xc   :  { %15 = vrot.lane.b32.xlu0 %v14_v4, %s35_s0 }
  0x7e   :  { %v16_v5 = vpop.permute.xlu0 %15  }
  0x7f   :  { %19 = vst.msk [vmem:[#allocation0 + $0x8] sm:$0x1] %vm17_vm2, %v16_v5  }
  0x80   :  { %21 = vst.msk [vmem:[#allocation0] sm:$0x1] %vm20_vm3, %v16_v5  }
  0x86   :  { %v29_v7 = vld [vmem:[#allocation0 + $0x8] sm:$0x1] }
  0x87   :  { %v25_v6 = vld [vmem:[#allocation0] sm:$0x1]  ;;  %33 = vst [vmem:[%s56_s1 + $0x1] sm:$0x1] %v29_v7 }
  0x88   :  { %27 = vst [vmem:[%s56_s1] sm:$0x1] %v25_v6 }

// kernel: tile.54
= control target key start
LH: loop header
LB: loop body
LE: loop exit
PB: predicated region body
PF: predicated region fallthrough
CT: control target
= control target key end

     0   :  { %vm7_vm0 = vcmask 261120   ;;  %vm13_vm1 = vcmask 523520   ;;  %s39_s0 = inlined_call_operand.vmem [shape: f32[2,32], index: 0, kind: input, shape index: {}]   ;;  %s40_s1 = inlined_call_operand.vmem [shape: f32[64], index: 1, kind: output, shape index: {}]  }
   0x1   :  { %v4_v0 = vld [vmem:[%s39_s0] sm:$0x3]  ;;  %s22_s0 = smov 32  }
   0x2   :  { %5 = vst [vmem:[#allocation1] sm:$0x3] %v4_v0 }
   0x9   :  { %v10_v1 = vld [vmem:[#allocation1 + $0x1] sm:$0x1]   ;;  %v6_v2 = vld [vmem:[#allocation1] sm:$0x1]  }
   0xa   :  { %11 = vrot.lane.b32.xlu0 %v10_v1, %s22_s0  ;;  %8 = vst.msk [vmem:[#allocation0] sm:$0x1] %vm7_vm0, %v6_v2  }
  0x7c   :  { %v12_v3 = vpop.permute.xlu0 %11  }
  0x7d   :  { %14 = vst.msk [vmem:[#allocation0] sm:$0x1] %vm13_vm1, %v12_v3  }
  0x84   :  { %v18_v4 = vld [vmem:[#allocation0] sm:$0x1] }
  0x85   :  { %20 = vst [vmem:[%s40_s1] sm:$0x1] %v18_v4 }

// kernel: tile.55
= control target key start
LH: loop header
LB: loop body
LE: loop exit
PB: predicated region body
PF: predicated region fallthrough
CT: control target
= control target key end

     0   :  { %s22_s0 = inlined_call_operand.vmem [shape: f32[64], index: 0, kind: input, shape index: {}]   ;;  %s23_s1 = inlined_call_operand.vmem [shape: f32[2,64], index: 1, kind: output, shape index: {}]  }
   0x1   :  { %v4_v0 = vld [vmem:[%s22_s0] ss:$0 sm:$0xff] }
   0x2   :  { %5 = vst [vmem:[%s23_s1] sm:$0x3] %v4_v0 }

// kernel: tile.63
= control target key start
LH: loop header
LB: loop body
LE: loop exit
PB: predicated region body
PF: predicated region fallthrough
CT: control target
= control target key end

     0   :  { %vm7_vm0 = vcmask 523264   ;;  %vm13_vm1 = vcmask 1048064   ;;  %s39_s0 = inlined_call_operand.vmem [shape: f32[2,64], index: 0, kind: input, shape index: {}]   ;;  %s40_s1 = inlined_call_operand.vmem [shape: f32[1,1,128], index: 1, kind: output, shape index: {}]  }
   0x1   :  { %v4_v0 = vld [vmem:[%s39_s0] sm:$0x3]  ;;  %s22_s0 = smov 64  }
   0x2   :  { %5 = vst [vmem:[#allocation1] sm:$0x3] %v4_v0 }
   0x9   :  { %v10_v1 = vld [vmem:[#allocation1 + $0x1] sm:$0x1]   ;;  %v6_v2 = vld [vmem:[#allocation1] sm:$0x1]  }
   0xa   :  { %11 = vrot.lane.b32.xlu0 %v10_v1, %s22_s0  ;;  %8 = vst.msk [vmem:[#allocation0] sm:$0x1] %vm7_vm0, %v6_v2  }
  0x7c   :  { %v12_v3 = vpop.permute.xlu0 %11  }
  0x7d   :  { %14 = vst.msk [vmem:[#allocation0] sm:$0x1] %vm13_vm1, %v12_v3  }
  0x84   :  { %v18_v4 = vld [vmem:[#allocation0] sm:$0x1] }
  0x85   :  { %20 = vst [vmem:[%s40_s1] sm:$0x1] %v18_v4 }

// kernel: forward.1
= control target key start
LH: loop header
LB: loop body
LE: loop exit
PB: predicated region body
PF: predicated region fallthrough
CT: control target
= control target key end

     0   :  { %14 = vsyncpa [#allocation3], 0  ;;  %s13315_s0 = inlined_call_operand.vmem [shape: f32[64,128], index: 0, kind: input, shape index: {}]   ;;  %s13316_s1 = inlined_call_operand.vmem [shape: f32[3,32,64], index: 1, kind: input, shape index: {}]   ;;  %s13317_s2 = inlined_call_operand.vmem [shape: f32[3,64,32], index: 2, kind: input, shape index: {}]   ;;  %s13318_s3 = inlined_call_operand.vmem [shape: f32[12,128,192], index: 3, kind: input, shape index: {}]   ;;  %s13319_s4 = inlined_call_operand.vmem [shape: f32[4,192,128], index: 4, kind: input, shape index: {}]   ;;  %s13320_s5 = inlined_call_operand.vmem [shape: f32[12,128,128], index: 5, kind: input, shape index: {}]   ;;  %s13321_s6 = inlined_call_operand.vmem [shape: f32[4,1,192], index: 6, kind: input, shape index: {}]   ;;  %s13322_s7 = inlined_call_operand.vmem [shape: f32[4,1,128], index: 7, kind: input, shape index: {}]   ;;  %s13323_s8 = inlined_call_operand.vmem [shape: f32[4], index: 8, kind: input, shape index: {}]   ;;  %s13324_s9 = inlined_call_operand.vmem [shape: f32[64,128], index: 9, kind: output, shape index: {}]  }
   0x1   :  { %s37_s11 = sshll.u32 %s13323_s8, 4  ;;  %s38_s11 = int_to_ptr.vmem [resolvable:$true] %s37_s11 }
   0x2   :  { %s10158_s12 = scalar_lea.vmem %s38_s11, 16  ;;  %p10163_p1 = scmp.lt.s32.totalorder %s38_s11, %s38_s11 }
   0x3   :  { %p10159_p0 = scmp.ne.s32.totalorder %s38_s11, %s10158_s12  ;;  %p10164_p2 = scmp.lt.s32.totalorder %s10158_s12, %s10158_s12 }
   0x5   :  { %p10165_p3 = por %p10164_p2, %p10163_p1 }
   0x7   :  { %p10166_p4 = pnand %p10165_p3, %p10159_p0 }
   0x9   :  { %10169 = shalt.err (!%p10166_p4)
}
   0xa   :  { %s10172_s13 = smov [#allocation2]  }
   0xb   :  { %40 = dma.vmem_to_smem %s38_s11, 16, %s10172_s13, [#allocation3]  }
   0xc   :  { %10170 = dma.done.wait [#allocation3], 16  }
   0xd   :  { %10171 = vsyncadd [#allocation3], 4294967280 }
   0xe   :  { %44 = sfence }
   0xf   :  { %v45_v0 = vld [vmem:[%s13315_s0] sm:$0xff]  ;;  %v46_v1 = vld [vmem:[%s13315_s0 + $0x8] sm:$0xff]  ;;  %v10237_v2 = vld [vmem:[%s13315_s0 + $0x10] sm:$0xff]  ;;  %vm115_vm0 = vcmask 523264   ;;  %vm1230_vm1 = vcmask 261120   ;;  %s1737_s10 = sld [smem:[#allocation2]] }
  0x10   :  { %v8643_v3 = vpack.c.bf16 %v46_v1, %v45_v0  ;;  %v10242_v4 = vld [vmem:[%s13315_s0 + $0x18] sm:$0xff]  ;;  %55 = vmin.xlane.f32.xlu1 %v46_v1  ;;  %53 = vmin.xlane.f32.xlu0 %v45_v0  ;;  %v10249_v6 = vld [vmem:[%s13315_s0 + $0x20] sm:$0xff]  ;;  %v10254_v7 = vld [vmem:[%s13315_s0 + $0x28] sm:$0xff]  ;;  %s6730_s30 = sld [smem:[#allocation2 + $0x1]]  ;;  %s6942_s29 = sld [smem:[#allocation2 + $0x2]] }
  0x11   :  { %v8647_v5 = vpack.c.bf16 %v10242_v4, %v10237_v2  ;;  %v111_v8 = vld [vmem:[%s13316_s1] sm:$0xff]  ;;  %v8651_v9 = vpack.c.bf16 %v10254_v7, %v10249_v6  ;;  %v10268_v11 = vld [vmem:[%s13315_s0 + $0x30] sm:$0xff]  ;;  %v10273_v12 = vld [vmem:[%s13315_s0 + $0x38] sm:$0xff] }
  0x12   :  { %8644 = vmatprep.subr.bf16.mxu0 %v8643_v3  ;;  %7699 = vmatprep.mubr.msk.f32.mxu0 %vm115_vm0, %v111_v8  ;;  %v6402_v10 = vld [vmem:[%s13316_s1 + $0x40] sm:$0xff]  ;;  %v8655_v13 = vpack.c.bf16 %v10273_v12, %v10268_v11  ;;  %v112_v14 = vld [vmem:[%s13316_s1 + $0x8] sm:$0xff]  ;;  %v113_v15 = vld [vmem:[%s13316_s1 + $0x10] sm:$0xff] }
  0x13   :  { %8646 = vmatpush3.bf16.msra.mxu0 %v8643_v3  ;;  %8740 = vmatprep.subr.bf16.mxu1 %v8643_v3  ;;  %v6403_v16 = vld [vmem:[%s13316_s1 + $0x48] sm:$0xff]  ;;  %v6404_v17 = vld [vmem:[%s13316_s1 + $0x50] sm:$0xff]  ;;  %v114_v18 = vld [vmem:[%s13316_s1 + $0x18] sm:$0xff] }
  0x14   :  { %8648 = vmatprep.subr.bf16.mxu0 %v8647_v5  ;;  %8742 = vmatpush3.bf16.msra.mxu1 %v8643_v3  ;;  %v6362_v19 = vld [vmem:[%s13316_s1 + $0x20] sm:$0xff]  ;;  %v6405_v20 = vld [vmem:[%s13316_s1 + $0x58] sm:$0xff]  ;;  %v6371_v21 = vld [vmem:[%s13318_s3 + $0x108] sm:$0xff] }
  0x15   :  { %8744 = vmatprep.subr.bf16.mxu1 %v8647_v5  ;;  %7743 = vmatprep.mubr.msk.f32.mxu1 %vm115_vm0, %v6402_v10  ;;  %v6373_v22 = vld [vmem:[%s13318_s3 + $0x118] sm:$0xff]  ;;  %v6370_v24 = vld [vmem:[%s13318_s3 + $0x100] sm:$0xff]  ;;  %v6372_v25 = vld [vmem:[%s13318_s3 + $0x110] sm:$0xff] }
  0x16   :  { %59 = vmin.xlane.f32.xlu1 %v10242_v4  ;;  %57 = vmin.xlane.f32.xlu0 %v10237_v2  ;;  %v8675_v23 = vpack.c.bf16 %v6373_v22, %v6371_v21  ;;  %v6375_v26 = vld [vmem:[%s13318_s3 + $0x128] sm:$0xff]  ;;  %v6377_v27 = vld [vmem:[%s13318_s3 + $0x138] sm:$0xff]  ;;  %v8677_v29 = vpack.c.bf16 %v6372_v25, %v6370_v24  ;;  %v6364_v30 = vld [vmem:[%s13316_s1 + $0x30] sm:$0xff]  ;;  %v10174_v21 = vmov 0.0|0.0  }
  0x17   :  { %8650 = vmatpush3.bf16.msra.mxu0 %v8647_v5  ;;  %v6363_v28 = vld [vmem:[%s13316_s1 + $0x28] sm:$0xff]  ;;  %v8679_v31 = vpack.c.bf16 %v6377_v27, %v6375_v26  ;;  %v6374_v32 = vld [vmem:[%s13318_s3 + $0x120] sm:$0xff]  ;;  %v6376_v33 = vld [vmem:[%s13318_s3 + $0x130] sm:$0xff] }
  0x18   :  { %8652 = vmatprep.subr.bf16.mxu0 %v8651_v9  ;;  %8746 = vmatpush3.bf16.msra.mxu1 %v8647_v5  ;;  %v6379_v34 = vld [vmem:[%s13318_s3 + $0x148] sm:$0xff]  ;;  %v6381_v35 = vld [vmem:[%s13318_s3 + $0x158] sm:$0xff]  ;;  %v8681_v37 = vpack.c.bf16 %v6376_v33, %v6374_v32  ;;  %v6378_v39 = vld [vmem:[%s13318_s3 + $0x140] sm:$0xff] }
  0x19   :  { %8748 = vmatprep.subr.bf16.mxu1 %v8651_v9  ;;  %v6365_v36 = vld [vmem:[%s13316_s1 + $0x38] sm:$0xff]  ;;  %v8683_v38 = vpack.c.bf16 %v6381_v35, %v6379_v34  ;;  %v6380_v40 = vld [vmem:[%s13318_s3 + $0x150] sm:$0xff]  ;;  %v6383_v41 = vld [vmem:[%s13318_s3 + $0x168] sm:$0xff] }
  0x1a   :  { %63 = vmin.xlane.f32.xlu1 %v10254_v7  ;;  %61 = vmin.xlane.f32.xlu0 %v10249_v6  ;;  %v6385_v42 = vld [vmem:[%s13318_s3 + $0x178] sm:$0xff]  ;;  %v8685_v43 = vpack.c.bf16 %v6380_v40, %v6378_v39  ;;  %v6382_v45 = vld [vmem:[%s13318_s3 + $0x160] sm:$0xff]  ;;  %v6384_v46 = vld [vmem:[%s13318_s3 + $0x170] sm:$0xff] }
  0x1b   :  { %8654 = vmatpush3.bf16.msra.mxu0 %v8651_v9  ;;  %v8687_v44 = vpack.c.bf16 %v6385_v42, %v6383_v41  ;;  %v8689_v47 = vpack.c.bf16 %v6384_v46, %v6382_v45  ;;  %v6387_v48 = vld [vmem:[%s13318_s3 + $0x188] sm:$0xff]  ;;  %v6389_v49 = vld [vmem:[%s13318_s3 + $0x198] sm:$0xff]  ;;  %v6386_v51 = vld [vmem:[%s13318_s3 + $0x180] sm:$0xff] }
  0x1c   :  { %8656 = vmatprep.subr.bf16.mxu0 %v8655_v13  ;;  %8750 = vmatpush3.bf16.msra.mxu1 %v8651_v9  ;;  %v8691_v50 = vpack.c.bf16 %v6389_v49, %v6387_v48  ;;  %v6388_v52 = vld [vmem:[%s13318_s3 + $0x190] sm:$0xff]  ;;  %v6391_v54 = vld [vmem:[%s13318_s3 + $0x1a8] sm:$0xff]  ;;  %v6393_v55 = vld [vmem:[%s13318_s3 + $0x1b8] sm:$0xff] }
  0x1d   :  { %8752 = vmatprep.subr.bf16.mxu1 %v8655_v13  ;;  %v8693_v53 = vpack.c.bf16 %v6388_v52, %v6386_v51  ;;  %v6390_v56 = vld [vmem:[%s13318_s3 + $0x1a0] sm:$0xff]  ;;  %v8695_v57 = vpack.c.bf16 %v6393_v55, %v6391_v54  ;;  %v6392_v58 = vld [vmem:[%s13318_s3 + $0x1b0] sm:$0xff]  ;;  %v6395_v59 = vld [vmem:[%s13318_s3 + $0x1c8] sm:$0xff] }
  0x1e   :  { %67 = vmin.xlane.f32.xlu1 %v10273_v12  ;;  %65 = vmin.xlane.f32.xlu0 %v10268_v11  ;;  %v6397_v60 = vld [vmem:[%s13318_s3 + $0x1d8] sm:$0xff]  ;;  %v8697_v61 = vpack.c.bf16 %v6392_v58, %v6390_v56  ;;  %v6394_v63 = vld [vmem:[%s13318_s3 + $0x1c0] sm:$0xff]  ;;  %v6400_v10 = vld [vmem:[%s13318_s3 + $0x1f0] sm:$0xff] }
  0x1f   :  { %8658 = vmatpush3.bf16.msra.mxu0 %v8655_v13  ;;  %v8699_v62 = vpack.c.bf16 %v6397_v60, %v6395_v59  ;;  %v830_v25 = vld [vmem:[%s13319_s4 + $0x20] sm:$0xff]  ;;  %v831_v26 = vld [vmem:[%s13319_s4 + $0x28] sm:$0xff]  ;;  %v836_v34 = vld [vmem:[%s13319_s4 + $0x50] sm:$0xff] }
  0x20   :  { %8660 = vmatprep.subr.bf16.mxu0 %v8643_v3  ;;  %8754 = vmatpush3.bf16.msra.mxu1 %v8655_v13  ;;  %v8794_v27 = vpack.c.bf16 %v831_v26, %v830_v25  ;;  %v835_v32 = vld [vmem:[%s13319_s4 + $0x48] sm:$0xff]  ;;  %v837_v35 = vld [vmem:[%s13319_s4 + $0x58] sm:$0xff]  ;;  %v840_v40 = vld [vmem:[%s13319_s4 + $0x70] sm:$0xff] }
  0x21   :  { %8787 = vmatprep.subr.bf16.mxu1 %v10174_v21  ;;  %v841_v41 = vld [vmem:[%s13319_s4 + $0x78] sm:$0xff]  ;;  %v844_v46 = vld [vmem:[%s13319_s4 + $0x90] sm:$0xff]  ;;  %v218_v59 = vld [vmem:[%s13318_s3 + $0x28] sm:$0xff] }
  0x22   :  { %7700 = vmatmul.mubr.msk.f32.vlgmr.msra.gmra.mrb[0].mxu0 %vm115_vm0, %v112_v14  ;;  %82 = vmax.xlane.f32.xlu0 %v45_v0  ;;  %v6396_v0 = vld [vmem:[%s13318_s3 + $0x1d0] sm:$0xff]  ;;  %v214_v14 = vld [vmem:[%s13318_s3 + $0x8] sm:$0xff]  ;;  %v8809_v42 = vpack.c.bf16 %v841_v41, %v840_v40  ;;  %v220_v60 = vld [vmem:[%s13318_s3 + $0x38] sm:$0xff] }
  0x23   :  { %8662 = vmatpush3.bf16.msra.mxu0 %v8643_v3  ;;  %7702 = vmatprep.mubr.msk.f32.mxu0 %vm115_vm0, %v113_v15  ;;  %v6401_v3 = vld [vmem:[%s13318_s3 + $0x1f8] sm:$0xff]  ;;  %v215_v58 = vld [vmem:[%s13318_s3 + $0x10] sm:$0xff]  ;;  %v230_v25 = vld [vmem:[%s13318_s3 + $0x88] sm:$0xff] }
  0x24   :  { %8664 = vmatprep.subr.bf16.mxu0 %v8647_v5  ;;  %7744 = vmatmul.mubr.msk.f32.vlgmr.msra.gmra.mrb[0].mxu1 %vm115_vm0, %v6403_v16  ;;  %v216_v15 = vld [vmem:[%s13318_s3 + $0x18] sm:$0xff]  ;;  %v237_v41 = vld [vmem:[%s13318_s3 + $0xc0] sm:$0xff] }
  0x25   :  { %7746 = vmatprep.mubr.msk.f32.mxu1 %vm115_vm0, %v6404_v17  ;;  %84 = vmax.xlane.f32.xlu1 %v46_v1  ;;  %v6399_v1 = vld [vmem:[%s13318_s3 + $0x1e8] sm:$0xff]  ;;  %v8707_v16 = vpack.c.bf16 %v216_v15, %v214_v14  ;;  %v10173_v17 = vmov 0.0   ;;  %v223_v14 = vld [vmem:[%s13318_s3 + $0x50] sm:$0xff]  ;;  %v232_v26 = vld [vmem:[%s13318_s3 + $0x98] sm:$0xff] }
  0x26   :  { %7703 = vmatmul.mubr.msk.f32.gmra.mrb[2].mxu0 %vm115_vm0, %v114_v18  ;;  %v8703_v8 = vpack.c.bf16 %v6401_v3, %v6399_v1  ;;  %v826_v18 = vld [vmem:[%s13319_s4] sm:$0xff]  ;;  %v219_v1 = vld [vmem:[%s13318_s3 + $0x30] sm:$0xff] }
  0x27   :  { %8666 = vmatpush3.bf16.msra.mxu0 %v8647_v5  ;;  %7721 = vmatprep.mubr.msk.f32.mxu0 %vm115_vm0, %v6362_v19  ;;  %v8701_v5 = vpack.c.bf16 %v6396_v0, %v6394_v63  ;;  %v827_v19 = vld [vmem:[%s13319_s4 + $0x8] sm:$0xff]  ;;  %v8711_v63 = vpack.c.bf16 %v220_v60, %v218_v59  ;;  %v217_v0 = vld [vmem:[%s13318_s3 + $0x20] sm:$0xff] }
  0x28   :  { %8668 = vmatprep.subr.bf16.mxu0 %v8651_v9  ;;  %7747 = vmatmul.mubr.msk.f32.gmra.mrb[2].mxu1 %vm115_vm0, %v6405_v20  ;;  %v828_v20 = vld [vmem:[%s13319_s4 + $0x10] sm:$0xff]  ;;  %v8788_v22 = vpack.c.bf16 %v827_v19, %v826_v18  ;;  %v228_v18 = vld [vmem:[%s13318_s3 + $0x78] sm:$0xff] }
  0x2a   :  { %8789 = vmatpush1.bf16.msra.mxu1 %v8788_v22 }
  0x2b   :  { %8670 = vmatpush3.bf16.msra.mxu0 %v8651_v9  ;;  %v6398_v9 = vld [vmem:[%s13318_s3 + $0x1e0] sm:$0xff]  ;;  %8790 = vmatprep.subr.bf16.mxu1 %v10174_v21 }
  0x2c   :  { %8672 = vmatprep.subr.bf16.mxu0 %v8655_v13 }
  0x2f   :  { %8674 = vmatpush3.bf16.msra.mxu0 %v8655_v13  ;;  %v8705_v13 = vpack.c.bf16 %v6400_v10, %v6398_v9  ;;  %v8713_v9 = vpack.c.bf16 %v219_v1, %v217_v0  ;;  %v6417_v0 = vld [vmem:[%s13318_s3 + $0x238] sm:$0xff] }
  0x30   :  { %8676 = vmatprep.subr.bf16.mxu0 %v8675_v23  ;;  %v829_v23 = vld [vmem:[%s13319_s4 + $0x18] sm:$0xff] }
  0x31   :  { %v8791_v24 = vpack.c.bf16 %v829_v23, %v828_v20  ;;  %v225_v23 = vld [vmem:[%s13318_s3 + $0x60] sm:$0xff] }
  0x32   :  { %7722 = vmatmul.mubr.msk.f32.vlgmr.msra.gmra.mrb[4].mxu0 %vm115_vm0, %v6363_v28  ;;  %v832_v28 = vld [vmem:[%s13319_s4 + $0x30] sm:$0xff] }
  0x33   :  { %7724 = vmatprep.mubr.msk.f32.mxu0 %vm115_vm0, %v6364_v30  ;;  %8678 = vmatpush1.bf16.msra.mxu0 %v8677_v29  ;;  %v833_v29 = vld [vmem:[%s13319_s4 + $0x38] sm:$0xff] }
  0x34   :  { %8680 = vmatprep.subr.bf16.mxu0 %v8679_v31  ;;  %8792 = vmatpush1.bf16.msra.mxu1 %v8791_v24  ;;  %v8797_v30 = vpack.c.bf16 %v833_v29, %v832_v28  ;;  %v834_v31 = vld [vmem:[%s13319_s4 + $0x40] sm:$0xff]  ;;  %v227_v24 = vld [vmem:[%s13318_s3 + $0x70] sm:$0xff]  ;;  %v8723_v28 = vpack.c.bf16 %v232_v26, %v230_v25 }
  0x35   :  { %8793 = vmatprep.subr.bf16.mxu1 %v10174_v21  ;;  %v8800_v33 = vpack.c.bf16 %v835_v32, %v834_v31  ;;  %v229_v29 = vld [vmem:[%s13318_s3 + $0x80] sm:$0xff]  ;;  %v234_v31 = vld [vmem:[%s13318_s3 + $0xa8] sm:$0xff]  ;;  %v236_v32 = vld [vmem:[%s13318_s3 + $0xb8] sm:$0xff] }
  0x36   :  { %7725 = vmatmul.mubr.msk.f32.gmra.mrb[6].mxu0 %vm115_vm0, %v6365_v36  ;;  %v8803_v36 = vpack.c.bf16 %v837_v35, %v836_v34  ;;  %v8727_v34 = vpack.c.bf16 %v236_v32, %v234_v31  ;;  %v233_v35 = vld [vmem:[%s13318_s3 + $0xa0] sm:$0xff] }
  0x37   :  { %8682 = vmatpush1.bf16.msra.mxu0 %v8681_v37  ;;  %444 = vmatprep.mubr.f32.mxu0 %v10173_v17  ;;  %v838_v37 = vld [vmem:[%s13319_s4 + $0x60] sm:$0xff] }
  0x38   :  { %8684 = vmatprep.subr.bf16.mxu0 %v8683_v38  ;;  %8795 = vmatpush1.bf16.msra.mxu1 %v8794_v27  ;;  %v839_v38 = vld [vmem:[%s13319_s4 + $0x68] sm:$0xff]  ;;  %v8721_v27 = vpack.c.bf16 %v227_v24, %v225_v23  ;;  %v6424_v23 = vld [vmem:[%s13318_s3 + $0x270] sm:$0xff]  ;;  %v6430_v32 = vld [vmem:[%s13318_s3 + $0x2a0] sm:$0xff] }
  0x39   :  { %8796 = vmatprep.subr.bf16.mxu1 %v10174_v21  ;;  %v8806_v39 = vpack.c.bf16 %v839_v38, %v838_v37  ;;  %v238_v37 = vld [vmem:[%s13318_s3 + $0xc8] sm:$0xff]  ;;  %v240_v38 = vld [vmem:[%s13318_s3 + $0xd8] sm:$0xff] }
  0x3a   :  { %v8731_v40 = vpack.c.bf16 %v240_v38, %v238_v37  ;;  %v6427_v24 = vld [vmem:[%s13318_s3 + $0x288] sm:$0xff]  ;;  %v6434_v37 = vld [vmem:[%s13318_s3 + $0x2c0] sm:$0xff]  ;;  %v6436_v38 = vld [vmem:[%s13318_s3 + $0x2d0] sm:$0xff] }
  0x3b   :  { %8686 = vmatpush1.bf16.msra.mxu0 %v8685_v43  ;;  %v842_v43 = vld [vmem:[%s13319_s4 + $0x80] sm:$0xff] }
  0x3c   :  { %8688 = vmatprep.subr.bf16.mxu0 %v8687_v44  ;;  %8798 = vmatpush1.bf16.msra.mxu1 %v8797_v30  ;;  %v843_v44 = vld [vmem:[%s13319_s4 + $0x88] sm:$0xff]  ;;  %v231_v30 = vld [vmem:[%s13318_s3 + $0x90] sm:$0xff] }
  0x3d   :  { %8799 = vmatprep.subr.bf16.mxu1 %v10174_v21  ;;  %v8812_v45 = vpack.c.bf16 %v843_v44, %v842_v43  ;;  %v242_v43 = vld [vmem:[%s13318_s3 + $0xe8] sm:$0xff]  ;;  %v244_v44 = vld [vmem:[%s13318_s3 + $0xf8] sm:$0xff] }
  0x3f   :  { %8690 = vmatpush1.bf16.msra.mxu0 %v8689_v47  ;;  %v845_v47 = vld [vmem:[%s13319_s4 + $0x98] sm:$0xff] }
  0x40   :  { %8692 = vmatprep.subr.bf16.mxu0 %v8691_v50  ;;  %8801 = vmatpush1.bf16.msra.mxu1 %v8800_v33  ;;  %v8815_v50 = vpack.c.bf16 %v845_v47, %v844_v46  ;;  %v8725_v33 = vpack.c.bf16 %v231_v30, %v229_v29  ;;  %v8735_v46 = vpack.c.bf16 %v244_v44, %v242_v43  ;;  %v241_v47 = vld [vmem:[%s13318_s3 + $0xe0] sm:$0xff]  ;;  %v6431_v29 = vld [vmem:[%s13318_s3 + $0x2a8] sm:$0xff]  ;;  %v6440_v44 = vld [vmem:[%s13318_s3 + $0x2f0] sm:$0xff] }
  0x41   :  { %8802 = vmatprep.subr.bf16.mxu1 %v10174_v21  ;;  %v6438_v43 = vld [vmem:[%s13318_s3 + $0x2e0] sm:$0xff] }
  0x43   :  { %8694 = vmatpush1.bf16.msra.mxu0 %v8693_v53 }
  0x44   :  { %8696 = vmatprep.subr.bf16.mxu0 %v8695_v57  ;;  %8804 = vmatpush1.bf16.msra.mxu1 %v8803_v36  ;;  %v213_v57 = vld [vmem:[%s13318_s3] sm:$0xff]  ;;  %v235_v36 = vld [vmem:[%s13318_s3 + $0xb0] sm:$0xff] }
  0x45   :  { %8805 = vmatprep.subr.bf16.mxu1 %v10174_v21 }
  0x47   :  { %8698 = vmatpush1.bf16.msra.mxu0 %v8697_v61  ;;  %v8709_v61 = vpack.c.bf16 %v215_v58, %v213_v57  ;;  %v6411_v57 = vld [vmem:[%s13318_s3 + $0x208] sm:$0xff]  ;;  %v6413_v58 = vld [vmem:[%s13318_s3 + $0x218] sm:$0xff] }
  0x48   :  { %8700 = vmatprep.subr.bf16.mxu0 %v8699_v62  ;;  %8807 = vmatpush1.bf16.msra.mxu1 %v8806_v39  ;;  %v8729_v39 = vpack.c.bf16 %v235_v36, %v233_v35  ;;  %v8755_v60 = vpack.c.bf16 %v6413_v58, %v6411_v57 }
  0x49   :  { %8808 = vmatprep.subr.bf16.mxu1 %v10174_v21 }
  0x4b   :  { %8702 = vmatpush1.bf16.msra.mxu0 %v8701_v5  ;;  %v222_v5 = vld [vmem:[%s13318_s3 + $0x48] sm:$0xff] }
  0x4c   :  { %8704 = vmatprep.subr.bf16.mxu0 %v8703_v8  ;;  %8810 = vmatpush1.bf16.msra.mxu1 %v8809_v42  ;;  %v224_v8 = vld [vmem:[%s13318_s3 + $0x58] sm:$0xff]  ;;  %v239_v42 = vld [vmem:[%s13318_s3 + $0xd0] sm:$0xff] }
  0x4d   :  { %8811 = vmatprep.subr.bf16.mxu1 %v10174_v21  ;;  %v8715_v10 = vpack.c.bf16 %v224_v8, %v222_v5  ;;  %v6414_v5 = vld [vmem:[%s13318_s3 + $0x220] sm:$0xff]  ;;  %v6416_v8 = vld [vmem:[%s13318_s3 + $0x230] sm:$0xff] }
  0x4f   :  { %8706 = vmatpush1.bf16.msra.mxu0 %v8705_v13  ;;  %v221_v13 = vld [vmem:[%s13318_s3 + $0x40] sm:$0xff] }
  0x50   :  { %8708 = vmatprep.subr.bf16.mxu0 %v8707_v16  ;;  %8813 = vmatpush1.bf16.msra.mxu1 %v8812_v45  ;;  %v226_v16 = vld [vmem:[%s13318_s3 + $0x68] sm:$0xff]  ;;  %v8717_v20 = vpack.c.bf16 %v223_v14, %v221_v13  ;;  %v8733_v45 = vpack.c.bf16 %v239_v42, %v237_v41  ;;  %v8761_v13 = vpack.c.bf16 %v6416_v8, %v6414_v5 }
  0x51   :  { %8814 = vmatprep.subr.bf16.mxu1 %v10174_v21  ;;  %v8719_v22 = vpack.c.bf16 %v228_v18, %v226_v16  ;;  %v6420_v16 = vld [vmem:[%s13318_s3 + $0x250] sm:$0xff]  ;;  %v6423_v18 = vld [vmem:[%s13318_s3 + $0x268] sm:$0xff]  ;;  %v8781_v41 = vpack.c.bf16 %v6436_v38, %v6434_v37 }
  0x54   :  { %8816 = vmatpush1.bf16.msra.mxu1 %v8815_v50  ;;  %v243_v50 = vld [vmem:[%s13318_s3 + $0xf0] sm:$0xff] }
  0x55   :  { %8817 = vmatprep.subr.bf16.mxu1 %v10174_v21  ;;  %v8737_v59 = vpack.c.bf16 %v243_v50, %v241_v47  ;;  %v792_v50 = vlaneseq }
  0x57   :  { %v793_v57 = vshrl.u32 %v792_v50, 7 }
  0x59   :  { %v10732_v58 = vsub.s32 0, %v793_v57 }
  0xf5   :  { %v10496_v48 = vpop.f32.mrb[0].mxu0 }
  0xf6   :  { %v10498_v49 = vpop.f32.mrb[1].mxu0 }
  0xf7   :  { %v10500_v51 = vpop.f32.mrb[0].mxu1 }
  0xf8   :  { %v10503_v52 = vpop.f32.mrb[1].mxu1 }
  0xf9   :  { %v10505_v53 = vpop.f32.mrb[2].mxu0 }
  0xfa   :  { %v10507_v54 = vpop.f32.mrb[3].mxu0 }
  0xfb   :  { %v10509_v55 = vpop.f32.mrb[2].mxu1 }
  0xfc   :  { %v10512_v56 = vpop.f32.mrb[3].mxu1 }
 0x105   :  { %v7723_v62 = vpop.f32.mrb[4].mxu0 }
 0x106   :  { %v328_v3 = vpop.f32.mrb[5].mxu0 }
 0x107   :  { %445 = vmatmul.mubr.f32.vlgmr.msra.gmra.mrb[8].mxu0 %v328_v3 }
 0x108   :  { %8710 = vmatpush1.bf16.msra.mxu0 %v8709_v61  ;;  %450 = vmatprep.mubr.f32.mxu0 %v10173_v17  ;;  %v6410_v61 = vld [vmem:[%s13318_s3 + $0x200] sm:$0xff] }
 0x109   :  { %8712 = vmatprep.subr.bf16.mxu0 %v8711_v63  ;;  %v7726_v15 = vpop.f32.mrb[6].mxu0  ;;  %v6415_v63 = vld [vmem:[%s13318_s3 + $0x228] sm:$0xff] }
 0x10a   :  { %v338_v19 = vpop.f32.mrb[7].mxu0  ;;  %v8759_v3 = vpack.c.bf16 %v6417_v0, %v6415_v63 }
 0x10b   :  { %451 = vmatmul.mubr.f32.gmra.mrb[10].mxu0 %v7723_v62  ;;  %v6412_v62 = vld [vmem:[%s13318_s3 + $0x210] sm:$0xff] }
 0x10c   :  { %8714 = vmatpush1.bf16.msra.mxu0 %v8713_v9  ;;  %456 = vmatprep.mubr.f32.mxu0 %v10173_v17  ;;  %v8757_v1 = vpack.c.bf16 %v6412_v62, %v6410_v61  ;;  %v6419_v9 = vld [vmem:[%s13318_s3 + $0x248] sm:$0xff] }
 0x10d   :  { %8716 = vmatprep.subr.bf16.mxu0 %v8715_v10  ;;  %v6421_v10 = vld [vmem:[%s13318_s3 + $0x258] sm:$0xff] }
 0x10e   :  { %v8763_v14 = vpack.c.bf16 %v6421_v10, %v6419_v9 }
 0x10f   :  { %457 = vmatmul.mubr.f32.gmra.mrb[12].mxu0 %v338_v19 }
 0x110   :  { %8718 = vmatpush1.bf16.msra.mxu0 %v8717_v20  ;;  %462 = vmatprep.mubr.f32.mxu0 %v10173_v17 }
 0x111   :  { %8720 = vmatprep.subr.bf16.mxu0 %v8719_v22  ;;  %v6422_v22 = vld [vmem:[%s13318_s3 + $0x260] sm:$0xff] }
 0x112   :  { %v8769_v25 = vpack.c.bf16 %v6424_v23, %v6422_v22 }
 0x113   :  { %463 = vmatmul.mubr.f32.gmra.mrb[14].mxu0 %v7726_v15  ;;  %v6418_v15 = vld [vmem:[%s13318_s3 + $0x240] sm:$0xff] }
 0x114   :  { %8722 = vmatpush1.bf16.msra.mxu0 %v8721_v27  ;;  %533 = vmatprep.mubr.f32.mxu0 %v10173_v17  ;;  %v8765_v19 = vpack.c.bf16 %v6420_v16, %v6418_v15  ;;  %v6426_v27 = vld [vmem:[%s13318_s3 + $0x280] sm:$0xff] }
 0x115   :  { %8724 = vmatprep.subr.bf16.mxu0 %v8723_v28  ;;  %v6428_v28 = vld [vmem:[%s13318_s3 + $0x290] sm:$0xff] }
 0x116   :  { %v8773_v30 = vpack.c.bf16 %v6428_v28, %v6426_v27 }
 0x118   :  { %8726 = vmatpush1.bf16.msra.mxu0 %v8725_v33  ;;  %v6432_v33 = vld [vmem:[%s13318_s3 + $0x2b0] sm:$0xff] }
 0x119   :  { %8728 = vmatprep.subr.bf16.mxu0 %v8727_v34  ;;  %v6435_v34 = vld [vmem:[%s13318_s3 + $0x2c8] sm:$0xff]  ;;  %v8777_v35 = vpack.c.bf16 %v6432_v33, %v6430_v32 }
 0x11c   :  { %8730 = vmatpush1.bf16.msra.mxu0 %v8729_v39  ;;  %v6439_v39 = vld [vmem:[%s13318_s3 + $0x2e8] sm:$0xff] }
 0x11d   :  { %8732 = vmatprep.subr.bf16.mxu0 %v8731_v40  ;;  %v6441_v40 = vld [vmem:[%s13318_s3 + $0x2f8] sm:$0xff] }
 0x11e   :  { %v8783_v42 = vpack.c.bf16 %v6441_v40, %v6439_v39 }
 0x120   :  { %8734 = vmatpush1.bf16.msra.mxu0 %v8733_v45  ;;  %v8785_v45 = vpack.c.bf16 %v6440_v44, %v6438_v43 }
 0x121   :  { %8736 = vmatprep.subr.bf16.mxu0 %v8735_v46  ;;  %v846_v46 = vld [vmem:[%s13319_s4 + $0xa0] sm:$0xff] }
 0x124   :  { %8738 = vmatpush1.bf16.msra.mxu0 %v8737_v59  ;;  %v790_v59 = vld [vmem:[%s13321_s6] sm:$0x3] }
 0x125   :  { %8756 = vmatprep.subr.bf16.mxu0 %v8755_v60  ;;  %v10737_v60 = vsub.s32 1, %v793_v57  ;;  %v795_v61 = vrot.slane %v790_v59, %v10732_v58 }
 0x127   :  { %534 = vmatmul.mubr.f32.vlgmr.msra.gmra.mrb[8].mxu0 %v10498_v49  ;;  %v6425_v49 = vld [vmem:[%s13318_s3 + $0x278] sm:$0xff]  ;;  %v799_v62 = vrot.slane %v790_v59, %v10737_v60 }
 0x128   :  { %8758 = vmatpush1.bf16.msra.mxu0 %v8757_v1  ;;  %539 = vmatprep.mubr.f32.mxu0 %v10173_v17  ;;  %v8767_v20 = vpack.c.bf16 %v6425_v49, %v6423_v18 }
 0x129   :  { %8760 = vmatprep.subr.bf16.mxu0 %v8759_v3 }
 0x12b   :  { %540 = vmatmul.mubr.f32.gmra.mrb[10].mxu0 %v10496_v48  ;;  %v6429_v48 = vld [vmem:[%s13318_s3 + $0x298] sm:$0xff] }
 0x12c   :  { %8762 = vmatpush1.bf16.msra.mxu0 %v8761_v13  ;;  %545 = vmatprep.mubr.f32.mxu0 %v10173_v17  ;;  %v8771_v26 = vpack.c.bf16 %v6429_v48, %v6427_v24 }
 0x12d   :  { %8764 = vmatprep.subr.bf16.mxu0 %v8763_v14 }
 0x12f   :  { %546 = vmatmul.mubr.f32.gmra.mrb[12].mxu0 %v10507_v54  ;;  %v6433_v54 = vld [vmem:[%s13318_s3 + $0x2b8] sm:$0xff] }
 0x130   :  { %8766 = vmatpush1.bf16.msra.mxu0 %v8765_v19  ;;  %551 = vmatprep.mubr.f32.mxu0 %v10173_v17  ;;  %v8775_v31 = vpack.c.bf16 %v6433_v54, %v6431_v29 }
 0x131   :  { %8768 = vmatprep.subr.bf16.mxu0 %v8767_v20 }
 0x133   :  { %552 = vmatmul.mubr.f32.gmra.mrb[14].mxu0 %v10505_v53  ;;  %v6437_v53 = vld [vmem:[%s13318_s3 + $0x2d8] sm:$0xff] }
 0x134   :  { %8770 = vmatpush1.bf16.msra.mxu0 %v8769_v25  ;;  %757 = vmatprep.mubr.f32.mxu0 %v10173_v17  ;;  %v8779_v36 = vpack.c.bf16 %v6437_v53, %v6435_v34 }
 0x135   :  { %8772 = vmatprep.subr.bf16.mxu0 %v8771_v26 }
 0x138   :  { %8774 = vmatpush1.bf16.msra.mxu0 %v8773_v30 }
 0x139   :  { %8776 = vmatprep.subr.bf16.mxu0 %v8775_v31 }
 0x13c   :  { %8778 = vmatpush1.bf16.msra.mxu0 %v8777_v35  ;;  %v6442_v35 = vld [vmem:[%s13322_s7] ss:$0 sm:$0xff] }
 0x13d   :  { %8780 = vmatprep.subr.bf16.mxu0 %v8779_v36 }
 0x140   :  { %8782 = vmatpush1.bf16.msra.mxu0 %v8781_v41 }
 0x141   :  { %8784 = vmatprep.subr.bf16.mxu0 %v8783_v42 }
 0x144   :  { %8786 = vmatpush1.bf16.msra.mxu0 %v8785_v45 }
 0x147   :  { %758 = vmatmul.mubr.f32.vlgmr.msra.gmra.mrb[8].mxu0 %v10503_v52  ;;  %v847_v52 = vld [vmem:[%s13319_s4 + $0xa8] sm:$0xff] }
 0x148   :  { %763 = vmatprep.mubr.f32.mxu0 %v10173_v17  ;;  %v8818_v47 = vpack.c.bf16 %v847_v52, %v846_v46 }
 0x14a   :  { %8819 = vmatpush1.bf16.msra.mxu1 %v8818_v47 }
 0x14b   :  { %764 = vmatmul.mubr.f32.gmra.mrb[10].mxu0 %v10500_v51  ;;  %8820 = vmatprep.subr.bf16.mxu1 %v10174_v21  ;;  %v848_v51 = vld [vmem:[%s13319_s4 + $0xb0] sm:$0xff] }
 0x14c   :  { %769 = vmatprep.mubr.f32.mxu0 %v10173_v17 }
 0x14f   :  { %770 = vmatmul.mubr.f32.gmra.mrb[12].mxu0 %v10512_v56 }
 0x150   :  { %775 = vmatprep.mubr.f32.mxu0 %v10173_v17 }
 0x153   :  { %776 = vmatmul.mubr.f32.gmra.mrb[14].mxu0 %v10509_v55  ;;  %v849_v55 = vld [vmem:[%s13319_s4 + $0xb8] sm:$0xff] }
 0x154   :  { %v8821_v56 = vpack.c.bf16 %v849_v55, %v848_v51 }
 0x156   :  { %8822 = vmatpush1.bf16.msra.mxu1 %v8821_v56 }
 0x21a   :  { %v759_v63 = vpop.f32.mrb[8].mxu0 }
 0x21b   :  { %v802_v0 = vadd.f32 %v795_v61, %v759_v63  ;;  %v761_v1 = vpop.f32.mrb[9].mxu0 }
 0x21c   :  { %v803_v3 = vadd.f32 %v799_v62, %v761_v1 }
 0x21d   :  { %v810_v5 = vmul.f32 0.2, %v802_v0 }
 0x21e   :  { %v811_v8 = vmul.f32 0.2, %v803_v3  ;;  %v765_v9 = vpop.f32.mrb[10].mxu0 }
 0x21f   :  { %v804_v10 = vadd.f32 %v795_v61, %v765_v9  ;;  %v767_v13 = vpop.f32.mrb[11].mxu0  ;;  %v818_v16 = vmax.f32 %v802_v0, %v810_v5  ;;  %v6449_v0 = vld [vmem:[%s13320_s5 + $0x90] sm:$0xff]  ;;  %v1015_v9 = vld [vmem:[%s13320_s5 + $0x28] sm:$0xff] }
 0x220   :  { %v819_v14 = vmax.f32 %v803_v3, %v811_v8  ;;  %v805_v15 = vadd.f32 %v799_v62, %v767_v13  ;;  %v6450_v3 = vld [vmem:[%s13320_s5 + $0x98] sm:$0xff]  ;;  %v1014_v8 = vld [vmem:[%s13320_s5 + $0x20] sm:$0xff] }
 0x221   :  { %v812_v18 = vmul.f32 0.2, %v804_v10  ;;  %v8859_v5 = vpack.c.bf16 %v6450_v3, %v6449_v0  ;;  %v8831_v13 = vpack.c.bf16 %v1015_v9, %v1014_v8 }
 0x222   :  { %v813_v49 = vmul.f32 0.2, %v805_v15  ;;  %v771_v19 = vpop.f32.mrb[12].mxu0  ;;  %6443 = vmatprep.mubr.msk.f32.mxu1 %vm115_vm0, %v819_v14  ;;  %v6452_v14 = vld [vmem:[%s13320_s5 + $0xa8] sm:$0xff] }
 0x223   :  { %v806_v20 = vadd.f32 %v795_v61, %v771_v19  ;;  %v773_v22 = vpop.f32.mrb[13].mxu0  ;;  %934 = vmatmul.mubr.f32.vlgmr.msra.gmra.mrb[4].mxu1 %v818_v16  ;;  %v820_v48 = vmax.f32 %v804_v10, %v812_v18  ;;  %v6451_v10 = vld [vmem:[%s13320_s5 + $0xa0] sm:$0xff]  ;;  %v1016_v16 = vld [vmem:[%s13320_s5 + $0x30] sm:$0xff]  ;;  %v1017_v18 = vld [vmem:[%s13320_s5 + $0x38] sm:$0xff] }
 0x224   :  { %v821_v23 = vmax.f32 %v805_v15, %v813_v49  ;;  %v807_v24 = vadd.f32 %v799_v62, %v773_v22  ;;  %v8863_v15 = vpack.c.bf16 %v6452_v14, %v6451_v10  ;;  %v6453_v49 = vld [vmem:[%s13320_s5 + $0xb0] sm:$0xff]  ;;  %v8835_v19 = vpack.c.bf16 %v1017_v18, %v1016_v16 }
 0x225   :  { %v814_v25 = vmul.f32 0.2, %v806_v20 }
 0x226   :  { %v815_v26 = vmul.f32 0.2, %v807_v24  ;;  %v777_v27 = vpop.f32.mrb[14].mxu0  ;;  %6444 = vmatprep.mubr.msk.f32.mxu1 %vm115_vm0, %v821_v23  ;;  %v1018_v23 = vld [vmem:[%s13320_s5 + $0x40] sm:$0xff] }
 0x227   :  { %v808_v28 = vadd.f32 %v795_v61, %v777_v27  ;;  %v779_v29 = vpop.f32.mrb[15].mxu0  ;;  %939 = vmatmul.mubr.f32.gmra.mrb[6].mxu1 %v820_v48  ;;  %v822_v31 = vmax.f32 %v806_v20, %v814_v25  ;;  %v6454_v20 = vld [vmem:[%s13320_s5 + $0xb8] sm:$0xff]  ;;  %v6455_v48 = vld [vmem:[%s13320_s5 + $0xc0] sm:$0xff] }
 0x228   :  { %v823_v54 = vmax.f32 %v807_v24, %v815_v26  ;;  %v809_v30 = vadd.f32 %v799_v62, %v779_v29  ;;  %v1010_v62 = vld [vmem:[%s13320_s5] sm:$0xff]  ;;  %v8867_v22 = vpack.c.bf16 %v6454_v20, %v6453_v49  ;;  %v1019_v24 = vld [vmem:[%s13320_s5 + $0x48] sm:$0xff]  ;;  %v1021_v29 = vld [vmem:[%s13320_s5 + $0x58] sm:$0xff] }
 0x229   :  { %v816_v32 = vmul.f32 0.2, %v808_v28  ;;  %v8839_v25 = vpack.c.bf16 %v1019_v24, %v1018_v23  ;;  %v6456_v26 = vld [vmem:[%s13320_s5 + $0xc8] sm:$0xff] }
 0x22a   :  { %v817_v33 = vmul.f32 0.2, %v809_v30  ;;  %6445 = vmatprep.mubr.msk.f32.mxu1 %vm115_vm0, %v823_v54  ;;  %v8871_v27 = vpack.c.bf16 %v6456_v26, %v6455_v48  ;;  %v6457_v54 = vld [vmem:[%s13320_s5 + $0xd0] sm:$0xff] }
 0x22b   :  { %944 = vmatmul.mubr.f32.gmra.mrb[8].mxu1 %v822_v31  ;;  %v824_v53 = vmax.f32 %v808_v28, %v816_v32  ;;  %v1020_v28 = vld [vmem:[%s13320_s5 + $0x50] sm:$0xff]  ;;  %v6458_v31 = vld [vmem:[%s13320_s5 + $0xd8] sm:$0xff] }
 0x22c   :  { %v825_v34 = vmax.f32 %v809_v30, %v817_v33  ;;  %v8843_v30 = vpack.c.bf16 %v1021_v29, %v1020_v28  ;;  %v8875_v32 = vpack.c.bf16 %v6458_v31, %v6457_v54  ;;  %v1022_v33 = vld [vmem:[%s13320_s5 + $0x60] sm:$0xff] }
 0x22e   :  { %6446 = vmatprep.mubr.msk.f32.mxu1 %vm115_vm0, %v825_v34  ;;  %v1023_v34 = vld [vmem:[%s13320_s5 + $0x68] sm:$0xff] }
 0x22f   :  { %949 = vmatmul.mubr.f32.gmra.mrb[10].mxu1 %v824_v53  ;;  %v6459_v53 = vld [vmem:[%s13320_s5 + $0xe0] sm:$0xff] }
 0x2f6   :  { %v935_v36 = vpop.f32.mrb[4].mxu1 }
 0x2f7   :  { %v936_v37 = vadd.f32 %v6442_v35, %v935_v36  ;;  %v937_v38 = vpop.f32.mrb[5].mxu1  ;;  %v6460_v36 = vld [vmem:[%s13320_s5 + $0xe8] sm:$0xff] }
 0x2f8   :  { %v1025_v38 = vld [vmem:[%s13320_s5 + $0x78] sm:$0xff] }
 0x2f9   :  { %v954_v39 = vmul.f32 0.2, %v936_v37 }
 0x2fa   :  { %v940_v40 = vpop.f32.mrb[6].mxu1 }
 0x2fb   :  { %v10748_v41 = vmax.f32 %v936_v37, %v954_v39  ;;  %v941_v42 = vadd.f32 %v6442_v35, %v940_v40  ;;  %v942_v43 = vpop.f32.mrb[7].mxu1  ;;  %v1024_v37 = vld [vmem:[%s13320_s5 + $0x70] sm:$0xff]  ;;  %v8879_v39 = vpack.c.bf16 %v6460_v36, %v6459_v53 }
 0x2fc   :  { %v8851_v40 = vpack.c.bf16 %v1025_v38, %v1024_v37  ;;  %v6462_v43 = vld [vmem:[%s13320_s5 + $0xf8] sm:$0xff] }
 0x2fd   :  { %v955_v44 = vmul.f32 0.2, %v941_v42  ;;  %962 = vmin.xlane.f32.xlu0 %v10748_v41 }
 0x2fe   :  { %v945_v45 = vpop.f32.mrb[8].mxu1 }
 0x2ff   :  { %v10751_v46 = vmax.f32 %v941_v42, %v955_v44  ;;  %v946_v52 = vadd.f32 %v6442_v35, %v945_v45  ;;  %v947_v47 = vpop.f32.mrb[9].mxu1  ;;  %v6461_v42 = vld [vmem:[%s13320_s5 + $0xf0] sm:$0xff]  ;;  %v54_v45 = vpop.xlane.xlu0 %53 }
 0x300   :  { %v8883_v44 = vpack.c.bf16 %v6462_v43, %v6461_v42 }
 0x301   :  { %v956_v51 = vmul.f32 0.2, %v946_v52  ;;  %979 = vmax.xlane.f32.xlu0 %v10748_v41  ;;  %981 = vmax.xlane.f32.xlu1 %v10751_v46 }
 0x302   :  { %v950_v55 = vpop.f32.mrb[10].mxu1 }
 0x303   :  { %v10755_v56 = vmax.f32 %v946_v52, %v956_v51  ;;  %v951_v50 = vadd.f32 %v6442_v35, %v950_v55  ;;  %v952_v57 = vpop.f32.mrb[11].mxu1  ;;  %v8847_v35 = vpack.c.bf16 %v1023_v34, %v1022_v33  ;;  %v56_v52 = vpop.xlane.xlu1 %55 }
 0x304   :  { %v58_v47 = vpop.xlane.xlu0 %57 }
 0x305   :  { %v957_v59 = vmul.f32 0.2, %v951_v50  ;;  %964 = vmin.xlane.f32.xlu0 %v10751_v46  ;;  %966 = vmin.xlane.f32.xlu1 %v10755_v56 }
 0x307   :  { %v10759_v61 = vmax.f32 %v951_v50, %v957_v59  ;;  %v60_v51 = vpop.xlane.xlu1 %59 }
 0x308   :  { %v62_v55 = vpop.xlane.xlu0 %61 }
 0x309   :  { %983 = vmax.xlane.f32.xlu0 %v10755_v56  ;;  %968 = vmin.xlane.f32.xlu1 %v10759_v61  ;;  %v69_v0 = vmin.f32 %v54_v45, %v62_v55 }
 0x30b   :  { %v64_v50 = vpop.xlane.xlu1 %63 }
 0x30c   :  { %v66_v57 = vpop.xlane.xlu0 %65 }
 0x30d   :  { %86 = vmax.xlane.f32.xlu0 %v10237_v2  ;;  %985 = vmax.xlane.f32.xlu1 %v10759_v61  ;;  %v1011_v2 = vld [vmem:[%s13320_s5 + $0x8] sm:$0xff]  ;;  %v71_v3 = vmin.f32 %v58_v47, %v66_v57 }
 0x30e   :  { %v8823_v63 = vpack.c.bf16 %v1011_v2, %v1010_v62 }
 0x30f   :  { %v68_v59 = vpop.xlane.xlu1 %67 }
 0x310   :  { %8824 = vmatprep.subr.bf16.mxu1 %v8823_v63  ;;  %v83_v62 = vpop.xlane.xlu0 %82 }
 0x311   :  { %90 = vmax.xlane.f32.xlu0 %v10249_v6  ;;  %88 = vmax.xlane.f32.xlu1 %v10242_v4  ;;  %v6447_v6 = vld [vmem:[%s13320_s5 + $0x80] sm:$0xff]  ;;  %v6448_v4 = vld [vmem:[%s13320_s5 + $0x88] sm:$0xff] }
 0x312   :  { %8826 = vmatpush3.bf16.msra.mxu1 %v8823_v63 }
 0x313   :  { %v85_v2 = vpop.xlane.xlu1 %84 }
 0x315   :  { %94 = vmax.xlane.f32.xlu0 %v10268_v11  ;;  %92 = vmax.xlane.f32.xlu1 %v10254_v7  ;;  %v8855_v7 = vpack.c.bf16 %v6448_v4, %v6447_v6  ;;  %v1012_v11 = vld [vmem:[%s13320_s5 + $0x10] sm:$0xff] }
 0x317   :  { %8856 = vmatprep.subr.bf16.mxu0 %v8855_v7 }
 0x318   :  { %8858 = vmatpush3.bf16.msra.mxu0 %v8855_v7 }
 0x319   :  { %96 = vmax.xlane.f32.xlu1 %v10273_v12  ;;  %v1013_v12 = vld [vmem:[%s13320_s5 + $0x18] sm:$0xff]  ;;  %8860 = vmatprep.subr.bf16.mxu0 %v8859_v5 }
 0x31a   :  { %v8827_v1 = vpack.c.bf16 %v1013_v12, %v1012_v11  ;;  %v70_v12 = vmin.f32 %v56_v52, %v64_v50 }
 0x31c   :  { %8828 = vmatprep.subr.bf16.mxu1 %v8827_v1  ;;  %8862 = vmatpush3.bf16.msra.mxu0 %v8859_v5  ;;  %v73_v14 = vmin.f32 %v69_v0, %v70_v12 }
 0x31d   :  { %8830 = vmatpush3.bf16.msra.mxu1 %v8827_v1  ;;  %8864 = vmatprep.subr.bf16.mxu0 %v8863_v15  ;;  %v72_v1 = vmin.f32 %v60_v51, %v68_v59 }
 0x31e   :  { %8832 = vmatprep.subr.bf16.mxu1 %v8831_v13 }
 0x320   :  { %8866 = vmatpush3.bf16.msra.mxu0 %v8863_v15  ;;  %v74_v15 = vmin.f32 %v71_v3, %v72_v1 }
 0x321   :  { %8834 = vmatpush3.bf16.msra.mxu1 %v8831_v13  ;;  %8868 = vmatprep.subr.bf16.mxu0 %v8867_v22 }
 0x322   :  { %8836 = vmatprep.subr.bf16.mxu1 %v8835_v19  ;;  %v75_v24 = vmin.f32 %v73_v14, %v74_v15 }
 0x324   :  { %8870 = vmatpush3.bf16.msra.mxu0 %v8867_v22  ;;  %v76_v29 = vrot.slane %v75_v24, 4 }
 0x325   :  { %8838 = vmatpush3.bf16.msra.mxu1 %v8835_v19  ;;  %8872 = vmatprep.subr.bf16.mxu0 %v8871_v27 }
 0x326   :  { %8840 = vmatprep.subr.bf16.mxu1 %v8839_v25  ;;  %v77_v53 = vmin.f32 %v75_v24, %v76_v29  ;;  %v6488_v29 = vld [vmem:[%s13320_s5 + $0x108] sm:$0xff] }
 0x328   :  { %8874 = vmatpush3.bf16.msra.mxu0 %v8871_v27  ;;  %v78_v52 = vrot.slane %v77_v53, 2 }
 0x329   :  { %8842 = vmatpush3.bf16.msra.mxu1 %v8839_v25  ;;  %8876 = vmatprep.subr.bf16.mxu0 %v8875_v32 }
 0x32a   :  { %8844 = vmatprep.subr.bf16.mxu1 %v8843_v30  ;;  %v79_v50 = vmin.f32 %v77_v53, %v78_v52  ;;  %v1111_v53 = vld [vmem:[%s13317_s2] sm:$0xff]  ;;  %v6493_v52 = vld [vmem:[%s13320_s5 + $0x130] sm:$0xff] }
 0x32c   :  { %8878 = vmatpush3.bf16.msra.mxu0 %v8875_v32 }
 0x32d   :  { %8846 = vmatpush3.bf16.msra.mxu1 %v8843_v30  ;;  %8880 = vmatprep.subr.bf16.mxu0 %v8879_v39 }
 0x32e   :  { %8848 = vmatprep.subr.bf16.mxu1 %v8847_v35 }
 0x330   :  { %8882 = vmatpush3.bf16.msra.mxu0 %v8879_v39 }
 0x331   :  { %8850 = vmatpush3.bf16.msra.mxu1 %v8847_v35  ;;  %8884 = vmatprep.subr.bf16.mxu0 %v8883_v44 }
 0x332   :  { %8852 = vmatprep.subr.bf16.mxu1 %v8851_v40 }
 0x334   :  { %8886 = vmatpush3.bf16.msra.mxu0 %v8883_v44 }
 0x335   :  { %8854 = vmatpush3.bf16.msra.mxu1 %v8851_v40 }
 0x38a   :  { %v963_v6 = vpop.xlane.xlu0 %962 }
 0x38e   :  { %v980_v63 = vpop.xlane.xlu0 %979  ;;  %v982_v4 = vpop.xlane.xlu1 %981 }
 0x38f   :  { %v987_v49 = vmax.f32 %v980_v63, %v982_v4 }
 0x392   :  { %v965_v7 = vpop.xlane.xlu0 %964  ;;  %v967_v11 = vpop.xlane.xlu1 %966 }
 0x393   :  { %v970_v9 = vmin.f32 %v963_v6, %v965_v7 }
 0x396   :  { %v984_v5 = vpop.xlane.xlu0 %983  ;;  %v969_v8 = vpop.xlane.xlu1 %968 }
 0x397   :  { %v971_v10 = vmin.f32 %v967_v11, %v969_v8 }
 0x399   :  { %v972_v13 = vmin.f32 %v970_v9, %v971_v10 }
 0x39a   :  { %v87_v16 = vpop.xlane.xlu0 %86  ;;  %v986_v18 = vpop.xlane.xlu1 %985 }
 0x39b   :  { %v973_v19 = vrot.slane %v972_v13, 4  ;;  %v988_v20 = vmax.f32 %v984_v5, %v986_v18 }
 0x39d   :  { %v974_v22 = vmin.f32 %v972_v13, %v973_v19  ;;  %v989_v23 = vmax.f32 %v987_v49, %v988_v20 }
 0x39e   :  { %v91_v48 = vpop.xlane.xlu0 %90  ;;  %v89_v25 = vpop.xlane.xlu1 %88 }
 0x39f   :  { %v975_v26 = vrot.slane %v974_v22, 2  ;;  %v990_v27 = vrot.slane %v989_v23, 4  ;;  %v98_v38 = vmax.f32 %v83_v62, %v91_v48 }
 0x3a1   :  { %v991_v28 = vmax.f32 %v989_v23, %v990_v27  ;;  %v976_v54 = vmin.f32 %v974_v22, %v975_v26  ;;  %v6464_v26 = vld [vmem:[%s13317_s2 + $0x48] sm:$0xff]  ;;  %v6465_v27 = vld [vmem:[%s13317_s2 + $0x50] sm:$0xff] }
 0x3a2   :  { %v93_v30 = vpop.xlane.xlu1 %92  ;;  %v95_v32 = vpop.xlane.xlu0 %94 }
 0x3a3   :  { %v992_v31 = vrot.slane %v991_v28, 2  ;;  %v99_v34 = vmax.f32 %v85_v2, %v93_v30  ;;  %v977_v35 = vrot.slane %v976_v54, 1  ;;  %v100_v39 = vmax.f32 %v87_v16, %v95_v32  ;;  %v6467_v30 = vld [vmem:[%s13317_s2 + $0x60] sm:$0xff]  ;;  %v6468_v32 = vld [vmem:[%s13317_s2 + $0x68] sm:$0xff] }
 0x3a4   :  { %v80_v2 = vrot.slane %v79_v50, 1 }
 0x3a5   :  { %v993_v33 = vmax.f32 %v991_v28, %v992_v31  ;;  %v102_v43 = vmax.f32 %v98_v38, %v99_v34  ;;  %v978_v45 = vmin.f32 %v976_v54, %v977_v35  ;;  %v6487_v28 = vld [vmem:[%s13320_s5 + $0x100] sm:$0xff]  ;;  %v6466_v54 = vld [vmem:[%s13317_s2 + $0x58] sm:$0xff]  ;;  %v6489_v35 = vld [vmem:[%s13320_s5 + $0x110] sm:$0xff] }
 0x3a6   :  { %v97_v36 = vpop.xlane.xlu1 %96  ;;  %v10866_v4 = vmin.f32 %v79_v50, %v80_v2  ;;  %v8903_v31 = vpack.c.bf16 %v6488_v29, %v6487_v28  ;;  %v6470_v34 = vld [vmem:[%s13317_s2 + $0x78] sm:$0xff]  ;;  %v1113_v38 = vld [vmem:[%s13317_s2 + $0x10] sm:$0xff] }
 0x3a7   :  { %v994_v37 = vrot.slane %v993_v33, 1  ;;  %v101_v40 = vmax.f32 %v89_v25, %v97_v36  ;;  %v6490_v36 = vld [vmem:[%s13320_s5 + $0x118] sm:$0xff] }
 0x3a8   :  { %v1118_v2 = vld [vmem:[%s13317_s2 + $0x38] sm:$0xff] }
 0x3a9   :  { %v995_v42 = vmax.f32 %v993_v33, %v994_v37  ;;  %v103_v44 = vmax.f32 %v100_v39, %v101_v40  ;;  %v6469_v33 = vld [vmem:[%s13317_s2 + $0x70] sm:$0xff]  ;;  %v1112_v37 = vld [vmem:[%s13317_s2 + $0x8] sm:$0xff]  ;;  %v8907_v39 = vpack.c.bf16 %v6490_v36, %v6489_v35  ;;  %v6491_v40 = vld [vmem:[%s13320_s5 + $0x120] sm:$0xff] }
 0x3ab   :  { %v104_v47 = vmax.f32 %v102_v43, %v103_v44  ;;  %v997_v51 = vsub.f32 %v995_v42, %v978_v45  ;;  %v6492_v42 = vld [vmem:[%s13320_s5 + $0x128] sm:$0xff]  ;;  %v1114_v43 = vld [vmem:[%s13317_s2 + $0x18] sm:$0xff]  ;;  %v1115_v44 = vld [vmem:[%s13317_s2 + $0x20] sm:$0xff] }
 0x3ad   :  { %v105_v55 = vrot.slane %v104_v47, 4  ;;  %9978 = vrcp.f32 %v997_v51  ;;  %v1116_v51 = vld [vmem:[%s13317_s2 + $0x28] sm:$0xff] }
 0x3af   :  { %v106_v57 = vmax.f32 %v104_v47, %v105_v55  ;;  %v6494_v47 = vld [vmem:[%s13320_s5 + $0x138] sm:$0xff]  ;;  %v1117_v55 = vld [vmem:[%s13317_s2 + $0x30] sm:$0xff] }
 0x3b0   :  { %v8915_v50 = vpack.c.bf16 %v6494_v47, %v6493_v52 }
 0x3b1   :  { %v107_v59 = vrot.slane %v106_v57, 2 }
 0x3b3   :  { %v108_v6 = vmax.f32 %v106_v57, %v107_v59  ;;  %v6495_v57 = vld [vmem:[%s13320_s5 + $0x140] sm:$0xff]  ;;  %v6496_v59 = vld [vmem:[%s13320_s5 + $0x148] sm:$0xff] }
 0x3b5   :  { %v109_v63 = vrot.slane %v108_v6, 1 }
 0x3b7   :  { %v110_v62 = vmax.f32 %v108_v6, %v109_v63  ;;  %v9979_v11 = vpop.eup %9978  ;;  %v8919_v6 = vpack.c.bf16 %v6496_v59, %v6495_v57  ;;  %v6497_v63 = vld [vmem:[%s13320_s5 + $0x150] sm:$0xff] }
 0x3b9   :  { %v10869_v7 = vsub.f32 %v110_v62, %v10866_v4  ;;  %v6498_v62 = vld [vmem:[%s13320_s5 + $0x158] sm:$0xff] }
 0x3bb   :  { %v999_v12 = vmul.f32 %v9979_v11, %v10869_v7  ;;  %v8923_v11 = vpack.c.bf16 %v6498_v62, %v6497_v63 }
 0x3bd   :  { %v1000_v0 = vmul.f32 %v999_v12, %v978_v45  ;;  %v1002_v3 = vmul.f32 %v999_v12, %v10748_v41  ;;  %v1003_v5 = vmul.f32 %v999_v12, %v10751_v46  ;;  %v1004_v10 = vmul.f32 %v999_v12, %v10755_v56  ;;  %v10050_v56 = vld [vmem:[%s13316_s1] sm:$0xff] }
 0x3be   :  { %v1005_v41 = vmul.f32 %v999_v12, %v10759_v61  ;;  %v6463_v61 = vld [vmem:[%s13317_s2 + $0x40] sm:$0xff]  ;;  %v8911_v45 = vpack.c.bf16 %v6492_v42, %v6491_v40 }
 0x3bf   :  { %v1001_v1 = vsub.f32 %v10866_v4, %v1000_v0  ;;  %v6499_v12 = vld [vmem:[%s13320_s5 + $0x160] sm:$0xff]  ;;  %v6500_v0 = vld [vmem:[%s13320_s5 + $0x168] sm:$0xff] }
 0x3c1   :  { %v10875_v8 = vadd.f32 %v1002_v3, %v1001_v1  ;;  %v10877_v9 = vadd.f32 %v1003_v5, %v1001_v1  ;;  %v10882_v13 = vadd.f32 %v1004_v10, %v1001_v1  ;;  %v10889_v46 = vadd.f32 %v1005_v41, %v1001_v1  ;;  %v6501_v3 = vld [vmem:[%s13320_s5 + $0x170] sm:$0xff]  ;;  %v6502_v5 = vld [vmem:[%s13320_s5 + $0x178] sm:$0xff]  ;;  %v6503_v10 = vld [vmem:[%s13317_s2 + $0x80] sm:$0xff] }
 0x3c2   :  { %v8927_v1 = vpack.c.bf16 %v6500_v0, %v6499_v12 }
 0x3c3   :  { %7781 = vmatprep.mubr.f32.mxu1 %v10875_v8  ;;  %7819 = vmatprep.mubr.f32.mxu0 %v10875_v8 }
 0x3c4   :  { %7782 = vmatmul.mubr.f32.vlgmr.msra.gmra.mrb[12].mxu1 %v10877_v9  ;;  %7820 = vmatmul.mubr.f32.vlgmr.msra.gmra.mrb[16].mxu0 %v10877_v9 }
 0x3c5   :  { %7784 = vmatprep.mubr.f32.mxu1 %v10882_v13  ;;  %7822 = vmatprep.mubr.f32.mxu0 %v10882_v13 }
 0x3c8   :  { %7785 = vmatmul.mubr.f32.gmra.mrb[14].mxu1 %v10889_v46  ;;  %7823 = vmatmul.mubr.f32.gmra.mrb[18].mxu0 %v10889_v46 }
 0x3c9   :  { %7939 = vmatprep.mubr.msk.f32.mxu0 %vm115_vm0, %v10050_v56  ;;  %7833 = vmatprep.mubr.msk.f32.mxu1 %vm1230_vm1, %v6463_v61 }
 0x497   :  { %v7783_v14 = vpop.f32.mrb[12].mxu1  ;;  %v7821_v15 = vpop.f32.mrb[16].mxu0 }
 0x498   :  { %v1092_v16 = vpop.f32.mrb[13].mxu1  ;;  %v1202_v18 = vpop.f32.mrb[17].mxu0 }
 0x499   :  { %v8895_v49 = vpack.c.bf16 %v7783_v14, %v1092_v16  ;;  %v8887_v19 = vpack.c.bf16 %v7821_v15, %v1202_v18  ;;  %v6507_v18 = vld [vmem:[%s13317_s2 + $0xa0] sm:$0xff] }
 0x49b   :  { %v7786_v20 = vpop.f32.mrb[14].mxu1  ;;  %v7824_v22 = vpop.f32.mrb[18].mxu0  ;;  %8888 = vmatprep.subr.bf16.mxu1 %v8887_v19 }
 0x49c   :  { %v1102_v23 = vpop.f32.mrb[15].mxu1  ;;  %v1212_v24 = vpop.f32.mrb[19].mxu0  ;;  %8890 = vmatpush3.bf16.msra.mxu1 %v8887_v19  ;;  %v6509_v19 = vld [vmem:[%s13317_s2 + $0xb0] sm:$0xff] }
 0x49d   :  { %v8899_v48 = vpack.c.bf16 %v7786_v20, %v1102_v23  ;;  %v8891_v25 = vpack.c.bf16 %v7824_v22, %v1212_v24  ;;  %v6510_v20 = vld [vmem:[%s13317_s2 + $0xb8] sm:$0xff]  ;;  %v10051_v22 = vld [vmem:[%s13316_s1 + $0x40] sm:$0xff]  ;;  %v1738_v23 = vstv %s1737_s10  ;;  %s7154_s10 = sld [smem:[#allocation2 + $0x3]] }
 0x49f   :  { %8892 = vmatprep.subr.bf16.mxu1 %v8891_v25 }
 0x4a0   :  { %8894 = vmatpush3.bf16.msra.mxu1 %v8891_v25 }
 0x4a1   :  { %8896 = vmatprep.subr.bf16.mxu1 %v8895_v49 }
 0x4a3   :  { %7834 = vmatmul.mubr.msk.f32.vlgmr.msra.gmra.mrb[16].mxu1 %vm1230_vm1, %v6464_v26 }
 0x4a4   :  { %8898 = vmatpush3.bf16.msra.mxu1 %v8895_v49  ;;  %7836 = vmatprep.mubr.msk.f32.mxu1 %vm1230_vm1, %v6465_v27  ;;  %v6508_v49 = vld [vmem:[%s13317_s2 + $0xa8] sm:$0xff] }
 0x4a5   :  { %8900 = vmatprep.subr.bf16.mxu1 %v8899_v48 }
 0x4a7   :  { %7837 = vmatmul.mubr.msk.f32.gmra.mrb[18].mxu1 %vm1230_vm1, %v6466_v54 }
 0x4a8   :  { %8902 = vmatpush3.bf16.msra.mxu1 %v8899_v48  ;;  %7839 = vmatprep.mubr.msk.f32.mxu1 %vm1230_vm1, %v6467_v30 }
 0x4a9   :  { %8904 = vmatprep.subr.bf16.mxu1 %v8903_v31 }
 0x4ab   :  { %7840 = vmatmul.mubr.msk.f32.gmra.mrb[20].mxu1 %vm1230_vm1, %v6468_v32 }
 0x4ac   :  { %7842 = vmatprep.mubr.msk.f32.mxu1 %vm1230_vm1, %v6469_v33 }
 0x4af   :  { %7843 = vmatmul.mubr.msk.f32.gmra.mrb[22].mxu1 %vm1230_vm1, %v6470_v34 }
 0x4b0   :  { %7853 = vmatprep.mubr.msk.f32.mxu1 %vm1230_vm1, %v1111_v53 }
 0x4b3   :  { %7854 = vmatmul.mubr.msk.f32.vlgmr.msra.gmra.mrb[16].mxu1 %vm1230_vm1, %v1112_v37 }
 0x4b4   :  { %8906 = vmatpush3.bf16.msra.mxu1 %v8903_v31  ;;  %7856 = vmatprep.mubr.msk.f32.mxu1 %vm1230_vm1, %v1113_v38 }
 0x4b5   :  { %8908 = vmatprep.subr.bf16.mxu1 %v8907_v39 }
 0x4b7   :  { %7857 = vmatmul.mubr.msk.f32.gmra.mrb[18].mxu1 %vm1230_vm1, %v1114_v43 }
 0x4b8   :  { %8910 = vmatpush3.bf16.msra.mxu1 %v8907_v39  ;;  %7859 = vmatprep.mubr.msk.f32.mxu1 %vm1230_vm1, %v1115_v44 }
 0x4b9   :  { %8912 = vmatprep.subr.bf16.mxu1 %v8911_v45 }
 0x4bb   :  { %7860 = vmatmul.mubr.msk.f32.gmra.mrb[20].mxu1 %vm1230_vm1, %v1116_v51 }
 0x4bc   :  { %8914 = vmatpush3.bf16.msra.mxu1 %v8911_v45  ;;  %7862 = vmatprep.mubr.msk.f32.mxu1 %vm1230_vm1, %v1117_v55 }
 0x4bd   :  { %8916 = vmatprep.subr.bf16.mxu1 %v8915_v50 }
 0x4bf   :  { %7863 = vmatmul.mubr.msk.f32.gmra.mrb[22].mxu1 %vm1230_vm1, %v1118_v2 }
 0x4c0   :  { %8918 = vmatpush3.bf16.msra.mxu1 %v8915_v50  ;;  %7897 = vmatprep.mubr.f32.mxu1 %v10875_v8  ;;  %v8931_v8 = vpack.c.bf16 %v6502_v5, %v6501_v3 }
 0x4c1   :  { %8920 = vmatprep.subr.bf16.mxu1 %v8919_v6 }
 0x4c4   :  { %8922 = vmatpush3.bf16.msra.mxu1 %v8919_v6 }
 0x4c5   :  { %8924 = vmatprep.subr.bf16.mxu1 %v8923_v11 }
 0x4c8   :  { %8926 = vmatpush3.bf16.msra.mxu1 %v8923_v11 }
 0x4c9   :  { %8928 = vmatprep.subr.bf16.mxu1 %v8927_v1 }
 0x4cc   :  { %8930 = vmatpush3.bf16.msra.mxu1 %v8927_v1 }
 0x4cd   :  { %8932 = vmatprep.subr.bf16.mxu1 %v8931_v8 }
 0x4d0   :  { %8934 = vmatpush3.bf16.msra.mxu1 %v8931_v8 }
 0x4d3   :  { %7898 = vmatmul.mubr.f32.vlgmr.msra.gmra.mrb[24].mxu1 %v10877_v9  ;;  %v6504_v9 = vld [vmem:[%s13317_s2 + $0x88] sm:$0xff] }
 0x4d4   :  { %7900 = vmatprep.mubr.f32.mxu1 %v10882_v13  ;;  %v6505_v13 = vld [vmem:[%s13317_s2 + $0x90] sm:$0xff] }
 0x4d7   :  { %7901 = vmatmul.mubr.f32.gmra.mrb[26].mxu1 %v10889_v46  ;;  %v6506_v46 = vld [vmem:[%s13317_s2 + $0x98] sm:$0xff] }
 0x4d8   :  { %7911 = vmatprep.mubr.msk.f32.mxu1 %vm1230_vm1, %v6503_v10 }
 0x5a6   :  { %v7899_v41 = vpop.f32.mrb[24].mxu1 }
 0x5a7   :  { %v1572_v56 = vpop.f32.mrb[25].mxu1 }
 0x5a8   :  { %v8935_v61 = vpack.c.bf16 %v7899_v41, %v1572_v56 }
 0x5aa   :  { %v7902_v14 = vpop.f32.mrb[26].mxu1  ;;  %8936 = vmatprep.subr.bf16.mxu1 %v8935_v61 }
 0x5ab   :  { %v1582_v15 = vpop.f32.mrb[27].mxu1  ;;  %8938 = vmatpush3.bf16.msra.mxu1 %v8935_v61 }
 0x5ac   :  { %v8939_v16 = vpack.c.bf16 %v7902_v14, %v1582_v15 }
 0x5ae   :  { %8940 = vmatprep.subr.bf16.mxu1 %v8939_v16 }
 0x5af   :  { %8942 = vmatpush3.bf16.msra.mxu1 %v8939_v16 }
 0x5b2   :  { %7912 = vmatmul.mubr.msk.f32.vlgmr.msra.gmra.mrb[16].mxu1 %vm1230_vm1, %v6504_v9 }
 0x5b3   :  { %7914 = vmatprep.mubr.msk.f32.mxu1 %vm1230_vm1, %v6505_v13 }
 0x5b6   :  { %7915 = vmatmul.mubr.msk.f32.gmra.mrb[18].mxu1 %vm1230_vm1, %v6506_v46 }
 0x5b7   :  { %7917 = vmatprep.mubr.msk.f32.mxu1 %vm1230_vm1, %v6507_v18  ;;  %v10052_v18 = vld [vmem:[%s13316_s1 + $0x8] sm:$0xff] }
 0x5ba   :  { %7918 = vmatmul.mubr.msk.f32.gmra.mrb[20].mxu1 %vm1230_vm1, %v6508_v49  ;;  %v10053_v49 = vld [vmem:[%s13316_s1 + $0x48] sm:$0xff] }
 0x5bb   :  { %7920 = vmatprep.mubr.msk.f32.mxu1 %vm1230_vm1, %v6509_v19  ;;  %v10054_v19 = vld [vmem:[%s13316_s1 + $0x10] sm:$0xff] }
 0x5be   :  { %7921 = vmatmul.mubr.msk.f32.gmra.mrb[22].mxu1 %vm1230_vm1, %v6510_v20  ;;  %v10055_v20 = vld [vmem:[%s13316_s1 + $0x50] sm:$0xff] }
 0x5bf   :  { %7983 = vmatprep.mubr.msk.f32.mxu1 %vm115_vm0, %v10051_v22  ;;  %v10056_v22 = vld [vmem:[%s13316_s1 + $0x18] sm:$0xff] }
 0x685   :  { %v7913_v24 = vpop.f32.mrb[16].mxu1 }
 0x686   :  { %v1740_v48 = vadd.f32 %v7913_v24, %v1738_v23  ;;  %v1690_v25 = vpop.f32.mrb[17].mxu1  ;;  %v10058_v24 = vld [vmem:[%s13316_s1 + $0x20] sm:$0xff] }
 0x687   :  { %v1739_v26 = vadd.f32 %v1738_v23, %v1690_v25  ;;  %v6562_v25 = vld [vmem:[%s13318_s3 + $0x418] sm:$0xff] }
 0x688   :  { %v1748_v27 = vmul.f32 0.5, %v1740_v48  ;;  %v6560_v48 = vld [vmem:[%s13318_s3 + $0x408] sm:$0xff] }
 0x689   :  { %v1747_v28 = vmul.f32 0.5, %v1739_v26  ;;  %v7916_v29 = vpop.f32.mrb[18].mxu1  ;;  %v8975_v26 = vpack.c.bf16 %v6562_v25, %v6560_v48  ;;  %v6631_v48 = vld [vmem:[%s13319_s4 + $0xd8] sm:$0xff] }
 0x68a   :  { %9980 = vtanh.f32 %v1748_v27  ;;  %v1742_v54 = vadd.f32 %v7916_v29, %v1738_v23  ;;  %v1700_v30 = vpop.f32.mrb[19].mxu1  ;;  %v6559_v27 = vld [vmem:[%s13318_s3 + $0x400] sm:$0xff]  ;;  %v6564_v29 = vld [vmem:[%s13318_s3 + $0x428] sm:$0xff] }
 0x68b   :  { %9982 = vtanh.f32 %v1747_v28  ;;  %v1741_v31 = vadd.f32 %v1738_v23, %v1700_v30  ;;  %v6561_v28 = vld [vmem:[%s13318_s3 + $0x410] sm:$0xff] }
 0x68c   :  { %v1750_v32 = vmul.f32 0.5, %v1742_v54  ;;  %v6566_v54 = vld [vmem:[%s13318_s3 + $0x438] sm:$0xff]  ;;  %v8977_v30 = vpack.c.bf16 %v6561_v28, %v6559_v27  ;;  %v6633_v27 = vld [vmem:[%s13319_s4 + $0xe8] sm:$0xff] }
 0x68d   :  { %v1749_v33 = vmul.f32 0.5, %v1741_v31  ;;  %v7919_v34 = vpop.f32.mrb[20].mxu1  ;;  %v8979_v31 = vpack.c.bf16 %v6566_v54, %v6564_v29  ;;  %v6634_v29 = vld [vmem:[%s13319_s4 + $0xf0] sm:$0xff]  ;;  %v6635_v54 = vld [vmem:[%s13319_s4 + $0xf8] sm:$0xff] }
 0x68e   :  { %9984 = vtanh.f32 %v1750_v32  ;;  %v1744_v53 = vadd.f32 %v7919_v34, %v1738_v23  ;;  %v1710_v35 = vpop.f32.mrb[21].mxu1  ;;  %v6563_v32 = vld [vmem:[%s13318_s3 + $0x420] sm:$0xff]  ;;  %v6568_v34 = vld [vmem:[%s13318_s3 + $0x448] sm:$0xff] }
 0x68f   :  { %9986 = vtanh.f32 %v1749_v33  ;;  %v1743_v36 = vadd.f32 %v1738_v23, %v1710_v35  ;;  %v6565_v33 = vld [vmem:[%s13318_s3 + $0x430] sm:$0xff]  ;;  %v10059_v35 = vld [vmem:[%s13316_s1 + $0x28] sm:$0xff] }
 0x690   :  { %v1752_v37 = vmul.f32 0.5, %v1744_v53  ;;  %v6570_v53 = vld [vmem:[%s13318_s3 + $0x458] sm:$0xff] }
 0x691   :  { %v1751_v38 = vmul.f32 0.5, %v1743_v36  ;;  %v7922_v39 = vpop.f32.mrb[22].mxu1  ;;  %v10060_v36 = vld [vmem:[%s13316_s1 + $0x30] sm:$0xff] }
 0x692   :  { %9988 = vtanh.f32 %v1752_v37  ;;  %v1746_v40 = vadd.f32 %v7922_v39, %v1738_v23  ;;  %v1720_v42 = vpop.f32.mrb[23].mxu1  ;;  %v8981_v37 = vpack.c.bf16 %v6565_v33, %v6563_v32  ;;  %v6567_v39 = vld [vmem:[%s13318_s3 + $0x440] sm:$0xff]  ;;  %v6637_v32 = vld [vmem:[%s13319_s4 + $0x108] sm:$0xff] }
 0x693   :  { %9990 = vtanh.f32 %v1751_v38  ;;  %v1745_v43 = vadd.f32 %v1738_v23, %v1720_v42  ;;  %v10057_v23 = vld [vmem:[%s13316_s1 + $0x58] sm:$0xff]  ;;  %v8983_v38 = vpack.c.bf16 %v6570_v53, %v6568_v34  ;;  %v6572_v42 = vld [vmem:[%s13318_s3 + $0x468] sm:$0xff]  ;;  %v6638_v34 = vld [vmem:[%s13319_s4 + $0x110] sm:$0xff] }
 0x694   :  { %v9981_v44 = vpop.eup %9980  ;;  %v1754_v45 = vmul.f32 0.5, %v1746_v40  ;;  %v6569_v40 = vld [vmem:[%s13318_s3 + $0x450] sm:$0xff]  ;;  %v6639_v53 = vld [vmem:[%s13319_s4 + $0x118] sm:$0xff] }
 0x695   :  { %v9983_v52 = vpop.eup %9982  ;;  %v1764_v47 = vadd.f32 1.0, %v9981_v44  ;;  %v1753_v51 = vmul.f32 0.5, %v1745_v43  ;;  %v6574_v43 = vld [vmem:[%s13318_s3 + $0x478] sm:$0xff] }
 0x696   :  { %v1763_v55 = vadd.f32 1.0, %v9983_v52  ;;  %9992 = vtanh.f32 %v1754_v45  ;;  %v10061_v44 = vld [vmem:[%s13316_s1 + $0x38] sm:$0xff]  ;;  %v8985_v45 = vpack.c.bf16 %v6569_v40, %v6567_v39  ;;  %v8987_v52 = vpack.c.bf16 %v6574_v43, %v6572_v42  ;;  %v6642_v39 = vld [vmem:[%s13319_s4 + $0x130] sm:$0xff]  ;;  %v6644_v43 = vld [vmem:[%s13319_s4 + $0x140] sm:$0xff] }
 0x697   :  { %v1772_v50 = vmul.f32 0.5, %v1764_v47  ;;  %9994 = vtanh.f32 %v1753_v51  ;;  %v6571_v47 = vld [vmem:[%s13318_s3 + $0x460] sm:$0xff]  ;;  %v6573_v51 = vld [vmem:[%s13318_s3 + $0x470] sm:$0xff]  ;;  %v6643_v40 = vld [vmem:[%s13319_s4 + $0x138] sm:$0xff] }
 0x698   :  { %v9985_v57 = vpop.eup %9984  ;;  %v1771_v59 = vmul.f32 0.5, %v1763_v55  ;;  %v8989_v55 = vpack.c.bf16 %v6573_v51, %v6571_v47  ;;  %v9109_v42 = vpack.c.bf16 %v6643_v40, %v6642_v39  ;;  %v6647_v47 = vld [vmem:[%s13319_s4 + $0x158] sm:$0xff]  ;;  %v6549_v39 = vld [vmem:[%s13318_s3 + $0x3d0] sm:$0xff]  ;;  %v6552_v40 = vld [vmem:[%s13318_s3 + $0x3e8] sm:$0xff] }
 0x699   :  { %v9987_v2 = vpop.eup %9986  ;;  %v1766_v6 = vadd.f32 1.0, %v9985_v57  ;;  %v6578_v57 = vld [vmem:[%s13318_s3 + $0x498] sm:$0xff] }
 0x69a   :  { %v8943_v63 = vpack.c.bf16 %v1772_v50, %v1771_v59  ;;  %v1765_v62 = vadd.f32 1.0, %v9987_v2  ;;  %v6576_v50 = vld [vmem:[%s13318_s3 + $0x488] sm:$0xff]  ;;  %v6575_v2 = vld [vmem:[%s13318_s3 + $0x480] sm:$0xff] }
 0x69b   :  { %v1774_v11 = vmul.f32 0.5, %v1766_v6  ;;  %v8991_v59 = vpack.c.bf16 %v6578_v57, %v6576_v50  ;;  %v6577_v6 = vld [vmem:[%s13318_s3 + $0x490] sm:$0xff] }
 0x69c   :  { %v9989_v12 = vpop.eup %9988  ;;  %v1773_v0 = vmul.f32 0.5, %v1765_v62  ;;  %8944 = vmatprep.subr.bf16.mxu0 %v8943_v63  ;;  %9040 = vmatprep.subr.bf16.mxu1 %v8943_v63  ;;  %v6580_v62 = vld [vmem:[%s13318_s3 + $0x4a8] sm:$0xff] }
 0x69d   :  { %v9991_v1 = vpop.eup %9990  ;;  %v1768_v3 = vadd.f32 1.0, %v9989_v12  ;;  %8946 = vmatpush3.bf16.msra.mxu0 %v8943_v63  ;;  %9042 = vmatpush3.bf16.msra.mxu1 %v8943_v63  ;;  %v6579_v12 = vld [vmem:[%s13318_s3 + $0x4a0] sm:$0xff] }
 0x69e   :  { %v8947_v5 = vpack.c.bf16 %v1774_v11, %v1773_v0  ;;  %v1767_v8 = vadd.f32 1.0, %v9991_v1  ;;  %v6582_v11 = vld [vmem:[%s13318_s3 + $0x4b8] sm:$0xff]  ;;  %v6581_v1 = vld [vmem:[%s13318_s3 + $0x4b0] sm:$0xff] }
 0x69f   :  { %v1776_v10 = vmul.f32 0.5, %v1768_v3  ;;  %v8995_v0 = vpack.c.bf16 %v6582_v11, %v6580_v62  ;;  %v6584_v3 = vld [vmem:[%s13318_s3 + $0x4c8] sm:$0xff]  ;;  %v6523_v11 = vld [vmem:[%s13318_s3 + $0x300] sm:$0xff] }
 0x6a0   :  { %v9993_v41 = vpop.eup %9992  ;;  %v1775_v56 = vmul.f32 0.5, %v1767_v8  ;;  %8948 = vmatprep.subr.bf16.mxu0 %v8947_v5  ;;  %9044 = vmatprep.subr.bf16.mxu1 %v8947_v5  ;;  %v8997_v8 = vpack.c.bf16 %v6581_v1, %v6579_v12  ;;  %v6525_v12 = vld [vmem:[%s13318_s3 + $0x310] sm:$0xff]  ;;  %v6530_v1 = vld [vmem:[%s13318_s3 + $0x338] sm:$0xff] }
 0x6a1   :  { %v9995_v61 = vpop.eup %9994  ;;  %v1770_v14 = vadd.f32 1.0, %v9993_v41  ;;  %8950 = vmatpush3.bf16.msra.mxu0 %v8947_v5  ;;  %9046 = vmatpush3.bf16.msra.mxu1 %v8947_v5  ;;  %v6583_v41 = vld [vmem:[%s13318_s3 + $0x4c0] sm:$0xff] }
 0x6a2   :  { %v8951_v15 = vpack.c.bf16 %v1776_v10, %v1775_v56  ;;  %v1769_v16 = vadd.f32 1.0, %v9995_v61  ;;  %v6585_v56 = vld [vmem:[%s13318_s3 + $0x4d0] sm:$0xff]  ;;  %v6588_v61 = vld [vmem:[%s13318_s3 + $0x4e8] sm:$0xff] }
 0x6a3   :  { %v1778_v9 = vmul.f32 0.5, %v1770_v14  ;;  %v6590_v14 = vld [vmem:[%s13318_s3 + $0x4f8] sm:$0xff] }
 0x6a4   :  { %v1777_v13 = vmul.f32 0.5, %v1769_v16  ;;  %8952 = vmatprep.subr.bf16.mxu0 %v8951_v15  ;;  %9048 = vmatprep.subr.bf16.mxu1 %v8951_v15  ;;  %v9003_v16 = vpack.c.bf16 %v6590_v14, %v6588_v61  ;;  %v6532_v61 = vld [vmem:[%s13318_s3 + $0x348] sm:$0xff]  ;;  %v6534_v14 = vld [vmem:[%s13318_s3 + $0x358] sm:$0xff] }
 0x6a5   :  { %8954 = vmatpush3.bf16.msra.mxu0 %v8951_v15  ;;  %9050 = vmatpush3.bf16.msra.mxu1 %v8951_v15 }
 0x6a6   :  { %v8955_v46 = vpack.c.bf16 %v1778_v9, %v1777_v13  ;;  %v6587_v9 = vld [vmem:[%s13318_s3 + $0x4e0] sm:$0xff]  ;;  %v6589_v13 = vld [vmem:[%s13318_s3 + $0x4f0] sm:$0xff] }
 0x6a8   :  { %8956 = vmatprep.subr.bf16.mxu0 %v8955_v46  ;;  %9052 = vmatprep.subr.bf16.mxu1 %v8955_v46 }
 0x6a9   :  { %8958 = vmatpush3.bf16.msra.mxu0 %v8955_v46  ;;  %9054 = vmatpush3.bf16.msra.mxu1 %v8955_v46 }
 0x6aa   :  { %8960 = vmatprep.subr.bf16.mxu0 %v8943_v63  ;;  %9087 = vmatprep.subr.bf16.mxu1 %v10174_v21 }
 0x6ac   :  { %7940 = vmatmul.mubr.msk.f32.vlgmr.msra.gmra.mrb[20].mxu0 %vm115_vm0, %v10052_v18  ;;  %7984 = vmatmul.mubr.msk.f32.vlgmr.msra.gmra.mrb[28].mxu1 %vm115_vm0, %v10053_v49  ;;  %v6524_v18 = vld [vmem:[%s13318_s3 + $0x308] sm:$0xff]  ;;  %v6526_v49 = vld [vmem:[%s13318_s3 + $0x318] sm:$0xff] }
 0x6ad   :  { %8962 = vmatpush3.bf16.msra.mxu0 %v8943_v63  ;;  %7942 = vmatprep.mubr.msk.f32.mxu0 %vm115_vm0, %v10054_v19  ;;  %v8993_v63 = vpack.c.bf16 %v6577_v6, %v6575_v2  ;;  %v9007_v19 = vpack.c.bf16 %v6526_v49, %v6524_v18  ;;  %v6536_v18 = vld [vmem:[%s13318_s3 + $0x368] sm:$0xff]  ;;  %v6538_v49 = vld [vmem:[%s13318_s3 + $0x378] sm:$0xff] }
 0x6ae   :  { %8964 = vmatprep.subr.bf16.mxu0 %v8947_v5  ;;  %7986 = vmatprep.mubr.msk.f32.mxu1 %vm115_vm0, %v10055_v20  ;;  %v6628_v20 = vld [vmem:[%s13319_s4 + $0xc0] sm:$0xff] }
 0x6b0   :  { %7943 = vmatmul.mubr.msk.f32.gmra.mrb[22].mxu0 %vm115_vm0, %v10056_v22  ;;  %7987 = vmatmul.mubr.msk.f32.gmra.mrb[30].mxu1 %vm115_vm0, %v10057_v23  ;;  %v6629_v22 = vld [vmem:[%s13319_s4 + $0xc8] sm:$0xff]  ;;  %v6630_v23 = vld [vmem:[%s13319_s4 + $0xd0] sm:$0xff] }
 0x6b1   :  { %8966 = vmatpush3.bf16.msra.mxu0 %v8947_v5  ;;  %7961 = vmatprep.mubr.msk.f32.mxu0 %vm115_vm0, %v10058_v24  ;;  %v6586_v5 = vld [vmem:[%s13318_s3 + $0x4d8] sm:$0xff]  ;;  %v9088_v24 = vpack.c.bf16 %v6629_v22, %v6628_v20  ;;  %v9091_v25 = vpack.c.bf16 %v6631_v48, %v6630_v23  ;;  %v9019_v22 = vpack.c.bf16 %v6538_v49, %v6536_v18  ;;  %v6535_v23 = vld [vmem:[%s13318_s3 + $0x360] sm:$0xff]  ;;  %v6540_v48 = vld [vmem:[%s13318_s3 + $0x388] sm:$0xff] }
 0x6b2   :  { %8968 = vmatprep.subr.bf16.mxu0 %v8951_v15  ;;  %v8999_v10 = vpack.c.bf16 %v6586_v5, %v6584_v3  ;;  %v9009_v3 = vpack.c.bf16 %v6525_v12, %v6523_v11 }
 0x6b3   :  { %9089 = vmatpush1.bf16.msra.mxu1 %v9088_v24  ;;  %v6537_v24 = vld [vmem:[%s13318_s3 + $0x370] sm:$0xff] }
 0x6b4   :  { %9090 = vmatprep.subr.bf16.mxu1 %v10174_v21 }
 0x6b5   :  { %8970 = vmatpush3.bf16.msra.mxu0 %v8951_v15  ;;  %v9001_v15 = vpack.c.bf16 %v6585_v56, %v6583_v41  ;;  %v6529_v41 = vld [vmem:[%s13318_s3 + $0x330] sm:$0xff] }
 0x6b6   :  { %8972 = vmatprep.subr.bf16.mxu0 %v8955_v46 }
 0x6b7   :  { %9092 = vmatpush1.bf16.msra.mxu1 %v9091_v25  ;;  %v6542_v25 = vld [vmem:[%s13318_s3 + $0x398] sm:$0xff] }
 0x6b8   :  { %9093 = vmatprep.subr.bf16.mxu1 %v10174_v21 }
 0x6b9   :  { %8974 = vmatpush3.bf16.msra.mxu0 %v8955_v46  ;;  %v9005_v46 = vpack.c.bf16 %v6589_v13, %v6587_v9  ;;  %v6531_v9 = vld [vmem:[%s13318_s3 + $0x340] sm:$0xff]  ;;  %v6533_v13 = vld [vmem:[%s13318_s3 + $0x350] sm:$0xff] }
 0x6ba   :  { %8976 = vmatprep.subr.bf16.mxu0 %v8975_v26  ;;  %v6632_v26 = vld [vmem:[%s13319_s4 + $0xe0] sm:$0xff]  ;;  %v9017_v20 = vpack.c.bf16 %v6533_v13, %v6531_v9  ;;  %v6605_v13 = vld [vmem:[%s13318_s3 + $0x550] sm:$0xff] }
 0x6bb   :  { %v9094_v28 = vpack.c.bf16 %v6633_v27, %v6632_v26  ;;  %v9021_v26 = vpack.c.bf16 %v6537_v24, %v6535_v23  ;;  %v9023_v27 = vpack.c.bf16 %v6542_v25, %v6540_v48  ;;  %v6603_v9 = vld [vmem:[%s13318_s3 + $0x540] sm:$0xff]  ;;  %v6613_v25 = vld [vmem:[%s13318_s3 + $0x590] sm:$0xff] }
 0x6bc   :  { %7962 = vmatmul.mubr.msk.f32.vlgmr.msra.gmra.mrb[24].mxu0 %vm115_vm0, %v10059_v35  ;;  %v9103_v35 = vpack.c.bf16 %v6639_v53, %v6638_v34  ;;  %v6545_v34 = vld [vmem:[%s13318_s3 + $0x3b0] sm:$0xff]  ;;  %v6548_v53 = vld [vmem:[%s13318_s3 + $0x3c8] sm:$0xff]  ;;  %v9065_v18 = vpack.c.bf16 %v6605_v13, %v6603_v9  ;;  %v6611_v48 = vld [vmem:[%s13318_s3 + $0x580] sm:$0xff] }
 0x6bd   :  { %7964 = vmatprep.mubr.msk.f32.mxu0 %vm115_vm0, %v10060_v36  ;;  %8978 = vmatpush1.bf16.msra.mxu0 %v8977_v30  ;;  %v9097_v30 = vpack.c.bf16 %v6635_v54, %v6634_v29  ;;  %v6640_v36 = vld [vmem:[%s13319_s4 + $0x120] sm:$0xff]  ;;  %v6541_v29 = vld [vmem:[%s13318_s3 + $0x390] sm:$0xff]  ;;  %v6544_v54 = vld [vmem:[%s13318_s3 + $0x3a8] sm:$0xff] }
 0x6be   :  { %8980 = vmatprep.subr.bf16.mxu0 %v8979_v31  ;;  %9095 = vmatpush1.bf16.msra.mxu1 %v9094_v28  ;;  %v6636_v31 = vld [vmem:[%s13319_s4 + $0x100] sm:$0xff] }
 0x6bf   :  { %9096 = vmatprep.subr.bf16.mxu1 %v10174_v21  ;;  %v9100_v33 = vpack.c.bf16 %v6637_v32, %v6636_v31  ;;  %v6539_v28 = vld [vmem:[%s13318_s3 + $0x380] sm:$0xff] }
 0x6c0   :  { %7965 = vmatmul.mubr.msk.f32.gmra.mrb[26].mxu0 %vm115_vm0, %v10061_v44  ;;  %v6645_v44 = vld [vmem:[%s13319_s4 + $0x148] sm:$0xff]  ;;  %v9025_v31 = vpack.c.bf16 %v6541_v29, %v6539_v28  ;;  %v6615_v29 = vld [vmem:[%s13318_s3 + $0x5a0] sm:$0xff] }
 0x6c1   :  { %8982 = vmatpush1.bf16.msra.mxu0 %v8981_v37  ;;  %2079 = vmatprep.mubr.f32.mxu0 %v10173_v17  ;;  %v6641_v37 = vld [vmem:[%s13319_s4 + $0x128] sm:$0xff] }
 0x6c2   :  { %8984 = vmatprep.subr.bf16.mxu0 %v8983_v38  ;;  %9098 = vmatpush1.bf16.msra.mxu1 %v9097_v30  ;;  %v9106_v38 = vpack.c.bf16 %v6641_v37, %v6640_v36  ;;  %v6546_v30 = vld [vmem:[%s13318_s3 + $0x3b8] sm:$0xff] }
 0x6c3   :  { %9099 = vmatprep.subr.bf16.mxu1 %v10174_v21  ;;  %v9027_v32 = vpack.c.bf16 %v6546_v30, %v6544_v54  ;;  %v6617_v54 = vld [vmem:[%s13318_s3 + $0x5b0] sm:$0xff]  ;;  %v6620_v30 = vld [vmem:[%s13318_s3 + $0x5c8] sm:$0xff] }
 0x6c5   :  { %8986 = vmatpush1.bf16.msra.mxu0 %v8985_v45  ;;  %v9112_v45 = vpack.c.bf16 %v6645_v44, %v6644_v43 }
 0x6c6   :  { %8988 = vmatprep.subr.bf16.mxu0 %v8987_v52  ;;  %9101 = vmatpush1.bf16.msra.mxu1 %v9100_v33  ;;  %v6646_v52 = vld [vmem:[%s13319_s4 + $0x150] sm:$0xff]  ;;  %v6543_v33 = vld [vmem:[%s13318_s3 + $0x3a0] sm:$0xff] }
 0x6c7   :  { %9102 = vmatprep.subr.bf16.mxu1 %v10174_v21  ;;  %v9029_v36 = vpack.c.bf16 %v6545_v34, %v6543_v33  ;;  %v6619_v33 = vld [vmem:[%s13318_s3 + $0x5c0] sm:$0xff]  ;;  %v6621_v34 = vld [vmem:[%s13318_s3 + $0x5d0] sm:$0xff] }
 0x6c9   :  { %8990 = vmatpush1.bf16.msra.mxu0 %v8989_v55 }
 0x6ca   :  { %8992 = vmatprep.subr.bf16.mxu0 %v8991_v59  ;;  %9104 = vmatpush1.bf16.msra.mxu1 %v9103_v35  ;;  %v9115_v59 = vpack.c.bf16 %v6647_v47, %v6646_v52  ;;  %v6550_v35 = vld [vmem:[%s13318_s3 + $0x3d8] sm:$0xff]  ;;  %v6553_v52 = vld [vmem:[%s13318_s3 + $0x3f0] sm:$0xff]  ;;  %v6596_v47 = vld [vmem:[%s13318_s3 + $0x508] sm:$0xff] }
 0x6cb   :  { %9105 = vmatprep.subr.bf16.mxu1 %v10174_v21  ;;  %v9031_v37 = vpack.c.bf16 %v6550_v35, %v6548_v53  ;;  %v6624_v53 = vld [vmem:[%s13318_s3 + $0x5e8] sm:$0xff]  ;;  %v6626_v35 = vld [vmem:[%s13318_s3 + $0x5f8] sm:$0xff] }
 0x6cd   :  { %8994 = vmatpush1.bf16.msra.mxu0 %v8993_v63 }
 0x6ce   :  { %8996 = vmatprep.subr.bf16.mxu0 %v8995_v0  ;;  %9107 = vmatpush1.bf16.msra.mxu1 %v9106_v38  ;;  %v6528_v0 = vld [vmem:[%s13318_s3 + $0x328] sm:$0xff]  ;;  %v6547_v38 = vld [vmem:[%s13318_s3 + $0x3c0] sm:$0xff] }
 0x6cf   :  { %9108 = vmatprep.subr.bf16.mxu1 %v10174_v21  ;;  %v9033_v43 = vpack.c.bf16 %v6549_v39, %v6547_v38  ;;  %v6623_v38 = vld [vmem:[%s13318_s3 + $0x5e0] sm:$0xff]  ;;  %v6625_v39 = vld [vmem:[%s13318_s3 + $0x5f0] sm:$0xff] }
 0x6d1   :  { %8998 = vmatpush1.bf16.msra.mxu0 %v8997_v8  ;;  %v9011_v8 = vpack.c.bf16 %v6530_v1, %v6528_v0  ;;  %v6595_v0 = vld [vmem:[%s13318_s3 + $0x500] sm:$0xff]  ;;  %v6597_v1 = vld [vmem:[%s13318_s3 + $0x510] sm:$0xff] }
 0x6d2   :  { %9000 = vmatprep.subr.bf16.mxu0 %v8999_v10  ;;  %9110 = vmatpush1.bf16.msra.mxu1 %v9109_v42  ;;  %v6527_v10 = vld [vmem:[%s13318_s3 + $0x320] sm:$0xff]  ;;  %v6554_v42 = vld [vmem:[%s13318_s3 + $0x3f8] sm:$0xff] }
 0x6d3   :  { %9111 = vmatprep.subr.bf16.mxu1 %v10174_v21  ;;  %v9035_v44 = vpack.c.bf16 %v6554_v42, %v6552_v40  ;;  %v9085_v40 = vpack.c.bf16 %v6625_v39, %v6623_v38  ;;  %v6648_v42 = vld [vmem:[%s13319_s4 + $0x160] sm:$0xff] }
 0x6d5   :  { %9002 = vmatpush1.bf16.msra.mxu0 %v9001_v15  ;;  %v9013_v15 = vpack.c.bf16 %v6529_v41, %v6527_v10  ;;  %v6599_v41 = vld [vmem:[%s13318_s3 + $0x520] sm:$0xff] }
 0x6d6   :  { %9004 = vmatprep.subr.bf16.mxu0 %v9003_v16  ;;  %9113 = vmatpush1.bf16.msra.mxu1 %v9112_v45  ;;  %v9015_v16 = vpack.c.bf16 %v6534_v14, %v6532_v61  ;;  %v6551_v45 = vld [vmem:[%s13318_s3 + $0x3e0] sm:$0xff]  ;;  %v6604_v61 = vld [vmem:[%s13318_s3 + $0x548] sm:$0xff]  ;;  %v6606_v14 = vld [vmem:[%s13318_s3 + $0x558] sm:$0xff] }
 0x6d7   :  { %9114 = vmatprep.subr.bf16.mxu1 %v10174_v21  ;;  %v9037_v11 = vpack.c.bf16 %v6553_v52, %v6551_v45 }
 0x6d9   :  { %9006 = vmatpush1.bf16.msra.mxu0 %v9005_v46 }
 0x6da   :  { %9008 = vmatprep.subr.bf16.mxu0 %v9007_v19  ;;  %9116 = vmatpush1.bf16.msra.mxu1 %v9115_v59  ;;  %v6598_v59 = vld [vmem:[%s13318_s3 + $0x518] sm:$0xff] }
 0x6db   :  { %9117 = vmatprep.subr.bf16.mxu1 %v10174_v21  ;;  %v9055_v12 = vpack.c.bf16 %v6598_v59, %v6596_v47 }
 0x77f   :  { %v11261_v51 = vpop.f32.mrb[20].mxu0  ;;  %v11263_v55 = vpop.f32.mrb[28].mxu1 }
 0x780   :  { %v11265_v50 = vpop.f32.mrb[21].mxu0  ;;  %v11267_v57 = vpop.f32.mrb[29].mxu1 }
 0x783   :  { %v11270_v2 = vpop.f32.mrb[22].mxu0  ;;  %v11272_v6 = vpop.f32.mrb[30].mxu1 }
 0x784   :  { %v11274_v63 = vpop.f32.mrb[23].mxu0  ;;  %v11276_v62 = vpop.f32.mrb[31].mxu1 }
 0x78f   :  { %v7963_v5 = vpop.f32.mrb[24].mxu0 }
 0x790   :  { %v1963_v56 = vpop.f32.mrb[25].mxu0 }
 0x791   :  { %2080 = vmatmul.mubr.f32.vlgmr.msra.gmra.mrb[28].mxu0 %v1963_v56  ;;  %v6601_v56 = vld [vmem:[%s13318_s3 + $0x530] sm:$0xff] }
 0x792   :  { %9010 = vmatpush1.bf16.msra.mxu0 %v9009_v3  ;;  %2085 = vmatprep.mubr.f32.mxu0 %v10173_v17  ;;  %v6600_v3 = vld [vmem:[%s13318_s3 + $0x528] sm:$0xff] }
 0x793   :  { %9012 = vmatprep.subr.bf16.mxu0 %v9011_v8  ;;  %v7966_v46 = vpop.f32.mrb[26].mxu0  ;;  %v9057_v8 = vpack.c.bf16 %v6597_v1, %v6595_v0 }
 0x794   :  { %v1973_v19 = vpop.f32.mrb[27].mxu0 }
 0x795   :  { %2086 = vmatmul.mubr.f32.gmra.mrb[30].mxu0 %v7963_v5  ;;  %v6602_v5 = vld [vmem:[%s13318_s3 + $0x538] sm:$0xff] }
 0x796   :  { %9014 = vmatpush1.bf16.msra.mxu0 %v9013_v15  ;;  %2091 = vmatprep.mubr.f32.mxu0 %v10173_v17  ;;  %v9059_v10 = vpack.c.bf16 %v6602_v5, %v6600_v3  ;;  %v9061_v15 = vpack.c.bf16 %v6601_v56, %v6599_v41 }
 0x797   :  { %9016 = vmatprep.subr.bf16.mxu0 %v9015_v16  ;;  %v9063_v16 = vpack.c.bf16 %v6606_v14, %v6604_v61 }
 0x799   :  { %2092 = vmatmul.mubr.f32.gmra.mrb[32].mxu0 %v1973_v19  ;;  %v6607_v19 = vld [vmem:[%s13318_s3 + $0x560] sm:$0xff] }
 0x79a   :  { %9018 = vmatpush1.bf16.msra.mxu0 %v9017_v20  ;;  %2097 = vmatprep.mubr.f32.mxu0 %v10173_v17  ;;  %v6609_v20 = vld [vmem:[%s13318_s3 + $0x570] sm:$0xff] }
 0x79b   :  { %9020 = vmatprep.subr.bf16.mxu0 %v9019_v22  ;;  %v6612_v22 = vld [vmem:[%s13318_s3 + $0x588] sm:$0xff]  ;;  %v9069_v23 = vpack.c.bf16 %v6609_v20, %v6607_v19 }
 0x79d   :  { %2098 = vmatmul.mubr.f32.gmra.mrb[34].mxu0 %v7966_v46  ;;  %v6608_v46 = vld [vmem:[%s13318_s3 + $0x568] sm:$0xff] }
 0x79e   :  { %9022 = vmatpush1.bf16.msra.mxu0 %v9021_v26  ;;  %2168 = vmatprep.mubr.f32.mxu0 %v10173_v17  ;;  %v6616_v26 = vld [vmem:[%s13318_s3 + $0x5a8] sm:$0xff] }
 0x79f   :  { %9024 = vmatprep.subr.bf16.mxu0 %v9023_v27  ;;  %v9073_v27 = vpack.c.bf16 %v6613_v25, %v6611_v48 }
 0x7a2   :  { %9026 = vmatpush1.bf16.msra.mxu0 %v9025_v31  ;;  %v9077_v31 = vpack.c.bf16 %v6617_v54, %v6615_v29 }
 0x7a3   :  { %9028 = vmatprep.subr.bf16.mxu0 %v9027_v32 }
 0x7a6   :  { %9030 = vmatpush1.bf16.msra.mxu0 %v9029_v36  ;;  %v9081_v36 = vpack.c.bf16 %v6621_v34, %v6619_v33 }
 0x7a7   :  { %9032 = vmatprep.subr.bf16.mxu0 %v9031_v37  ;;  %v9083_v37 = vpack.c.bf16 %v6626_v35, %v6624_v53 }
 0x7aa   :  { %9034 = vmatpush1.bf16.msra.mxu0 %v9033_v43 }
 0x7ab   :  { %9036 = vmatprep.subr.bf16.mxu0 %v9035_v44  ;;  %v6627_v44 = vld [vmem:[%s13321_s6 + $0x2] sm:$0x3] }
 0x7ac   :  { %v2414_v45 = vrot.slane %v6627_v44, %v10732_v58  ;;  %v2418_v52 = vrot.slane %v6627_v44, %v10737_v60  ;;  %v6674_v44 = vld [vmem:[%s13320_s5 + $0x200] sm:$0xff] }
 0x7ae   :  { %9038 = vmatpush1.bf16.msra.mxu0 %v9037_v11 }
 0x7af   :  { %9056 = vmatprep.subr.bf16.mxu0 %v9055_v12 }
 0x7b1   :  { %2169 = vmatmul.mubr.f32.vlgmr.msra.gmra.mrb[28].mxu0 %v11265_v50  ;;  %v6610_v50 = vld [vmem:[%s13318_s3 + $0x578] sm:$0xff] }
 0x7b2   :  { %9058 = vmatpush1.bf16.msra.mxu0 %v9057_v8  ;;  %2174 = vmatprep.mubr.f32.mxu0 %v10173_v17  ;;  %v9067_v49 = vpack.c.bf16 %v6610_v50, %v6608_v46 }
 0x7b3   :  { %9060 = vmatprep.subr.bf16.mxu0 %v9059_v10 }
 0x7b5   :  { %2175 = vmatmul.mubr.f32.gmra.mrb[30].mxu0 %v11261_v51  ;;  %v6614_v51 = vld [vmem:[%s13318_s3 + $0x598] sm:$0xff] }
 0x7b6   :  { %9062 = vmatpush1.bf16.msra.mxu0 %v9061_v15  ;;  %2180 = vmatprep.mubr.f32.mxu0 %v10173_v17  ;;  %v9071_v24 = vpack.c.bf16 %v6614_v51, %v6612_v22 }
 0x7b7   :  { %9064 = vmatprep.subr.bf16.mxu0 %v9063_v16 }
 0x7b9   :  { %2181 = vmatmul.mubr.f32.gmra.mrb[32].mxu0 %v11274_v63  ;;  %v6618_v63 = vld [vmem:[%s13318_s3 + $0x5b8] sm:$0xff] }
 0x7ba   :  { %9066 = vmatpush1.bf16.msra.mxu0 %v9065_v18  ;;  %2186 = vmatprep.mubr.f32.mxu0 %v10173_v17  ;;  %v9075_v28 = vpack.c.bf16 %v6618_v63, %v6616_v26 }
 0x7bb   :  { %9068 = vmatprep.subr.bf16.mxu0 %v9067_v49 }
 0x7bd   :  { %2187 = vmatmul.mubr.f32.gmra.mrb[34].mxu0 %v11270_v2  ;;  %v6622_v2 = vld [vmem:[%s13318_s3 + $0x5d8] sm:$0xff] }
 0x7be   :  { %9070 = vmatpush1.bf16.msra.mxu0 %v9069_v23  ;;  %2375 = vmatprep.mubr.f32.mxu0 %v10173_v17  ;;  %v9079_v32 = vpack.c.bf16 %v6622_v2, %v6620_v30 }
 0x7bf   :  { %9072 = vmatprep.subr.bf16.mxu0 %v9071_v24 }
 0x7c2   :  { %9074 = vmatpush1.bf16.msra.mxu0 %v9073_v27  ;;  %v6653_v27 = vld [vmem:[%s13322_s7 + $0x1] ss:$0 sm:$0xff] }
 0x7c3   :  { %9076 = vmatprep.subr.bf16.mxu0 %v9075_v28 }
 0x7c6   :  { %9078 = vmatpush1.bf16.msra.mxu0 %v9077_v31 }
 0x7c7   :  { %9080 = vmatprep.subr.bf16.mxu0 %v9079_v32 }
 0x7ca   :  { %9082 = vmatpush1.bf16.msra.mxu0 %v9081_v36 }
 0x7cb   :  { %9084 = vmatprep.subr.bf16.mxu0 %v9083_v37 }
 0x7ce   :  { %9086 = vmatpush1.bf16.msra.mxu0 %v9085_v40 }
 0x7d1   :  { %2376 = vmatmul.mubr.f32.vlgmr.msra.gmra.mrb[28].mxu0 %v11267_v57  ;;  %v6649_v57 = vld [vmem:[%s13319_s4 + $0x168] sm:$0xff] }
 0x7d2   :  { %2381 = vmatprep.mubr.f32.mxu0 %v10173_v17  ;;  %v9118_v43 = vpack.c.bf16 %v6649_v57, %v6648_v42 }
 0x7d4   :  { %9119 = vmatpush1.bf16.msra.mxu1 %v9118_v43 }
 0x7d5   :  { %2382 = vmatmul.mubr.f32.gmra.mrb[30].mxu0 %v11263_v55  ;;  %9120 = vmatprep.subr.bf16.mxu1 %v10174_v21  ;;  %v6650_v55 = vld [vmem:[%s13319_s4 + $0x170] sm:$0xff] }
 0x7d6   :  { %2387 = vmatprep.mubr.f32.mxu0 %v10173_v17 }
 0x7d9   :  { %2388 = vmatmul.mubr.f32.gmra.mrb[32].mxu0 %v11276_v62 }
 0x7da   :  { %2393 = vmatprep.mubr.f32.mxu0 %v10173_v17 }
 0x7dd   :  { %2394 = vmatmul.mubr.f32.gmra.mrb[34].mxu0 %v11272_v6  ;;  %v6651_v6 = vld [vmem:[%s13319_s4 + $0x178] sm:$0xff] }
 0x7de   :  { %v9121_v62 = vpack.c.bf16 %v6651_v6, %v6650_v55  ;;  %v6658_v6 = vld [vmem:[%s13320_s5 + $0x180] sm:$0xff] }
 0x7e0   :  { %9122 = vmatpush1.bf16.msra.mxu1 %v9121_v62  ;;  %v6659_v62 = vld [vmem:[%s13320_s5 + $0x188] sm:$0xff] }
 0x8a4   :  { %v2377_v47 = vpop.f32.mrb[28].mxu0 }
 0x8a5   :  { %v2421_v59 = vadd.f32 %v2414_v45, %v2377_v47  ;;  %v2379_v11 = vpop.f32.mrb[29].mxu0 }
 0x8a6   :  { %v2422_v12 = vadd.f32 %v2418_v52, %v2379_v11  ;;  %v6661_v11 = vld [vmem:[%s13320_s5 + $0x198] sm:$0xff] }
 0x8a7   :  { %v2429_v0 = vmul.f32 0.2, %v2421_v59 }
 0x8a8   :  { %v2430_v1 = vmul.f32 0.2, %v2422_v12  ;;  %v2383_v3 = vpop.f32.mrb[30].mxu0 }
 0x8a9   :  { %v2423_v5 = vadd.f32 %v2414_v45, %v2383_v3  ;;  %v2385_v8 = vpop.f32.mrb[31].mxu0  ;;  %v2437_v56 = vmax.f32 %v2421_v59, %v2429_v0  ;;  %v6660_v59 = vld [vmem:[%s13320_s5 + $0x190] sm:$0xff] }
 0x8aa   :  { %v2438_v10 = vmax.f32 %v2422_v12, %v2430_v1  ;;  %v2424_v41 = vadd.f32 %v2418_v52, %v2385_v8  ;;  %v6676_v12 = vld [vmem:[%s13320_s5 + $0x210] sm:$0xff]  ;;  %v9127_v0 = vpack.c.bf16 %v6661_v11, %v6660_v59  ;;  %v6677_v1 = vld [vmem:[%s13320_s5 + $0x218] sm:$0xff]  ;;  %v6663_v8 = vld [vmem:[%s13320_s5 + $0x1a8] sm:$0xff] }
 0x8ab   :  { %v2431_v61 = vmul.f32 0.2, %v2423_v5  ;;  %v9159_v3 = vpack.c.bf16 %v6677_v1, %v6676_v12 }
 0x8ac   :  { %v2432_v14 = vmul.f32 0.2, %v2424_v41  ;;  %v2389_v15 = vpop.f32.mrb[32].mxu0  ;;  %6654 = vmatprep.mubr.msk.f32.mxu1 %vm115_vm0, %v2438_v10  ;;  %v6678_v10 = vld [vmem:[%s13320_s5 + $0x220] sm:$0xff] }
 0x8ad   :  { %v2425_v16 = vadd.f32 %v2414_v45, %v2389_v15  ;;  %v2391_v9 = vpop.f32.mrb[33].mxu0  ;;  %2555 = vmatmul.mubr.f32.vlgmr.msra.gmra.mrb[32].mxu1 %v2437_v56  ;;  %v2439_v50 = vmax.f32 %v2423_v5, %v2431_v61  ;;  %v6662_v5 = vld [vmem:[%s13320_s5 + $0x1a0] sm:$0xff]  ;;  %v6679_v56 = vld [vmem:[%s13320_s5 + $0x228] sm:$0xff]  ;;  %v6665_v15 = vld [vmem:[%s13320_s5 + $0x1b8] sm:$0xff] }
 0x8ae   :  { %v2440_v13 = vmax.f32 %v2424_v41, %v2432_v14  ;;  %v2426_v46 = vadd.f32 %v2418_v52, %v2391_v9  ;;  %v9131_v41 = vpack.c.bf16 %v6663_v8, %v6662_v5  ;;  %v9163_v61 = vpack.c.bf16 %v6679_v56, %v6678_v10  ;;  %v6664_v14 = vld [vmem:[%s13320_s5 + $0x1b0] sm:$0xff] }
 0x8af   :  { %v2433_v18 = vmul.f32 0.2, %v2425_v16  ;;  %v9135_v9 = vpack.c.bf16 %v6665_v15, %v6664_v14 }
 0x8b0   :  { %v2434_v49 = vmul.f32 0.2, %v2426_v46  ;;  %v2395_v19 = vpop.f32.mrb[34].mxu0  ;;  %6655 = vmatprep.mubr.msk.f32.mxu1 %vm115_vm0, %v2440_v13  ;;  %v6681_v13 = vld [vmem:[%s13320_s5 + $0x238] sm:$0xff] }
 0x8b1   :  { %v2427_v20 = vadd.f32 %v2414_v45, %v2395_v19  ;;  %v2397_v22 = vpop.f32.mrb[35].mxu0  ;;  %2560 = vmatmul.mubr.f32.gmra.mrb[34].mxu1 %v2439_v50  ;;  %v2441_v24 = vmax.f32 %v2425_v16, %v2433_v18  ;;  %v9123_v45 = vpack.c.bf16 %v6659_v62, %v6658_v6  ;;  %v6680_v16 = vld [vmem:[%s13320_s5 + $0x230] sm:$0xff]  ;;  %v6666_v50 = vld [vmem:[%s13320_s5 + $0x1c0] sm:$0xff]  ;;  %v6667_v18 = vld [vmem:[%s13320_s5 + $0x1c8] sm:$0xff] }
 0x8b2   :  { %v2442_v51 = vmax.f32 %v2426_v46, %v2434_v49  ;;  %v2428_v23 = vadd.f32 %v2418_v52, %v2397_v22  ;;  %v6675_v52 = vld [vmem:[%s13320_s5 + $0x208] sm:$0xff]  ;;  %v9167_v46 = vpack.c.bf16 %v6681_v13, %v6680_v16  ;;  %v6682_v49 = vld [vmem:[%s13320_s5 + $0x240] sm:$0xff]  ;;  %v9139_v19 = vpack.c.bf16 %v6667_v18, %v6666_v50  ;;  %v6668_v22 = vld [vmem:[%s13320_s5 + $0x1d0] sm:$0xff] }
 0x8b3   :  { %v2435_v48 = vmul.f32 0.2, %v2427_v20  ;;  %v9155_v47 = vpack.c.bf16 %v6675_v52, %v6674_v44  ;;  %9124 = vmatprep.subr.bf16.mxu1 %v9123_v45 }
 0x8b4   :  { %v2436_v25 = vmul.f32 0.2, %v2428_v23  ;;  %6656 = vmatprep.mubr.msk.f32.mxu1 %vm115_vm0, %v2442_v51  ;;  %9126 = vmatpush3.bf16.msra.mxu1 %v9123_v45  ;;  %v6669_v51 = vld [vmem:[%s13320_s5 + $0x1d8] sm:$0xff] }
 0x8b5   :  { %2565 = vmatmul.mubr.f32.gmra.mrb[36].mxu1 %v2441_v24  ;;  %v2443_v63 = vmax.f32 %v2427_v20, %v2435_v48  ;;  %9156 = vmatprep.subr.bf16.mxu0 %v9155_v47  ;;  %v6683_v20 = vld [vmem:[%s13320_s5 + $0x248] sm:$0xff]  ;;  %v9143_v24 = vpack.c.bf16 %v6669_v51, %v6668_v22  ;;  %v6684_v48 = vld [vmem:[%s13320_s5 + $0x250] sm:$0xff] }
 0x8b6   :  { %v2444_v26 = vmax.f32 %v2428_v23, %v2436_v25  ;;  %9158 = vmatpush3.bf16.msra.mxu0 %v9155_v47  ;;  %9128 = vmatprep.subr.bf16.mxu1 %v9127_v0  ;;  %v9171_v23 = vpack.c.bf16 %v6683_v20, %v6682_v49  ;;  %v6685_v25 = vld [vmem:[%s13320_s5 + $0x258] sm:$0xff] }
 0x8b7   :  { %9160 = vmatprep.subr.bf16.mxu0 %v9159_v3 }
 0x8b8   :  { %6657 = vmatprep.mubr.msk.f32.mxu1 %vm115_vm0, %v2444_v26  ;;  %9130 = vmatpush3.bf16.msra.mxu1 %v9127_v0  ;;  %v9175_v26 = vpack.c.bf16 %v6685_v25, %v6684_v48 }
 0x8b9   :  { %2570 = vmatmul.mubr.f32.gmra.mrb[38].mxu1 %v2443_v63  ;;  %9132 = vmatprep.subr.bf16.mxu1 %v9131_v41  ;;  %v6670_v63 = vld [vmem:[%s13320_s5 + $0x1e0] sm:$0xff] }
 0x8ba   :  { %9162 = vmatpush3.bf16.msra.mxu0 %v9159_v3 }
 0x8bb   :  { %9164 = vmatprep.subr.bf16.mxu0 %v9163_v61 }
 0x8bc   :  { %9134 = vmatpush3.bf16.msra.mxu1 %v9131_v41 }
 0x8bd   :  { %9136 = vmatprep.subr.bf16.mxu1 %v9135_v9 }
 0x8be   :  { %9166 = vmatpush3.bf16.msra.mxu0 %v9163_v61 }
 0x8bf   :  { %9168 = vmatprep.subr.bf16.mxu0 %v9167_v46 }
 0x8c0   :  { %9138 = vmatpush3.bf16.msra.mxu1 %v9135_v9 }
 0x8c1   :  { %9140 = vmatprep.subr.bf16.mxu1 %v9139_v19 }
 0x8c2   :  { %9170 = vmatpush3.bf16.msra.mxu0 %v9167_v46 }
 0x8c3   :  { %9172 = vmatprep.subr.bf16.mxu0 %v9171_v23 }
 0x8c4   :  { %9142 = vmatpush3.bf16.msra.mxu1 %v9139_v19 }
 0x8c5   :  { %9144 = vmatprep.subr.bf16.mxu1 %v9143_v24 }
 0x8c6   :  { %9174 = vmatpush3.bf16.msra.mxu0 %v9171_v23 }
 0x8c7   :  { %9176 = vmatprep.subr.bf16.mxu0 %v9175_v26 }
 0x8c8   :  { %9146 = vmatpush3.bf16.msra.mxu1 %v9143_v24 }
 0x8ca   :  { %9178 = vmatpush3.bf16.msra.mxu0 %v9175_v26 }
 0x980   :  { %v2556_v28 = vpop.f32.mrb[32].mxu1 }
 0x981   :  { %v2557_v29 = vadd.f32 %v6653_v27, %v2556_v28  ;;  %v2558_v54 = vpop.f32.mrb[33].mxu1  ;;  %v6686_v28 = vld [vmem:[%s13320_s5 + $0x260] sm:$0xff] }
 0x983   :  { %v2575_v30 = vmul.f32 0.2, %v2557_v29 }
 0x984   :  { %v2561_v2 = vpop.f32.mrb[34].mxu1 }
 0x985   :  { %v11509_v31 = vmax.f32 %v2557_v29, %v2575_v30  ;;  %v2562_v32 = vadd.f32 %v6653_v27, %v2561_v2  ;;  %v2563_v33 = vpop.f32.mrb[35].mxu1  ;;  %v6687_v29 = vld [vmem:[%s13320_s5 + $0x268] sm:$0xff]  ;;  %v6672_v2 = vld [vmem:[%s13320_s5 + $0x1f0] sm:$0xff] }
 0x986   :  { %v9179_v30 = vpack.c.bf16 %v6687_v29, %v6686_v28  ;;  %v6688_v33 = vld [vmem:[%s13320_s5 + $0x270] sm:$0xff] }
 0x987   :  { %v2576_v34 = vmul.f32 0.2, %v2562_v32  ;;  %2583 = vmin.xlane.f32.xlu0 %v11509_v31 }
 0x988   :  { %v2566_v53 = vpop.f32.mrb[36].mxu1  ;;  %9180 = vmatprep.subr.bf16.mxu0 %v9179_v30 }
 0x989   :  { %v11512_v35 = vmax.f32 %v2562_v32, %v2576_v34  ;;  %v2567_v36 = vadd.f32 %v6653_v27, %v2566_v53  ;;  %v2568_v37 = vpop.f32.mrb[37].mxu1  ;;  %v6673_v32 = vld [vmem:[%s13320_s5 + $0x1f8] sm:$0xff]  ;;  %9182 = vmatpush3.bf16.msra.mxu0 %v9179_v30 }
 0x98a   :  { %v6689_v34 = vld [vmem:[%s13320_s5 + $0x278] sm:$0xff]  ;;  %v9151_v53 = vpack.c.bf16 %v6673_v32, %v6672_v2  ;;  %v6706_v32 = vld [vmem:[%s13320_s5 + $0x280] sm:$0xff] }
 0x98b   :  { %v2577_v38 = vmul.f32 0.2, %v2567_v36  ;;  %2600 = vmax.xlane.f32.xlu0 %v11509_v31  ;;  %2585 = vmin.xlane.f32.xlu1 %v11512_v35 }
 0x98c   :  { %v2571_v39 = vpop.f32.mrb[38].mxu1 }
 0x98d   :  { %v11516_v40 = vmax.f32 %v2567_v36, %v2577_v38  ;;  %v2572_v42 = vadd.f32 %v6653_v27, %v2571_v39  ;;  %v2573_v57 = vpop.f32.mrb[39].mxu1  ;;  %v6671_v27 = vld [vmem:[%s13320_s5 + $0x1e8] sm:$0xff]  ;;  %v9183_v36 = vpack.c.bf16 %v6689_v34, %v6688_v33 }
 0x98e   :  { %v9147_v54 = vpack.c.bf16 %v6671_v27, %v6670_v63  ;;  %v6707_v33 = vld [vmem:[%s13320_s5 + $0x288] sm:$0xff] }
 0x98f   :  { %v2578_v43 = vmul.f32 0.2, %v2572_v42  ;;  %2602 = vmax.xlane.f32.xlu1 %v11512_v35  ;;  %2587 = vmin.xlane.f32.xlu0 %v11516_v40  ;;  %v10064_v34 = vld [vmem:[%s13317_s2 + $0x48] sm:$0xff] }
 0x990   :  { %9148 = vmatprep.subr.bf16.mxu1 %v9147_v54  ;;  %9184 = vmatprep.subr.bf16.mxu0 %v9183_v36 }
 0x991   :  { %v11520_v55 = vmax.f32 %v2572_v42, %v2578_v43  ;;  %9150 = vmatpush3.bf16.msra.mxu1 %v9147_v54  ;;  %9186 = vmatpush3.bf16.msra.mxu0 %v9183_v36  ;;  %v9203_v36 = vpack.c.bf16 %v6707_v33, %v6706_v32 }
 0x992   :  { %9152 = vmatprep.subr.bf16.mxu1 %v9151_v53 }
 0x993   :  { %2604 = vmax.xlane.f32.xlu0 %v11516_v40  ;;  %2589 = vmin.xlane.f32.xlu1 %v11520_v55 }
 0x995   :  { %9154 = vmatpush3.bf16.msra.mxu1 %v9151_v53  ;;  %v10065_v53 = vld [vmem:[%s13317_s2 + $0x50] sm:$0xff] }
 0x997   :  { %2606 = vmax.xlane.f32.xlu1 %v11520_v55 }
 0xa14   :  { %v2584_v37 = vpop.xlane.xlu0 %2583 }
 0xa18   :  { %v2601_v38 = vpop.xlane.xlu0 %2600  ;;  %v2586_v39 = vpop.xlane.xlu1 %2585 }
 0xa19   :  { %v2591_v6 = vmin.f32 %v2584_v37, %v2586_v39  ;;  %v10066_v37 = vld [vmem:[%s13317_s2 + $0x58] sm:$0xff]  ;;  %v10068_v39 = vld [vmem:[%s13317_s2 + $0x68] sm:$0xff] }
 0xa1c   :  { %v2603_v42 = vpop.xlane.xlu1 %2602  ;;  %v2588_v57 = vpop.xlane.xlu0 %2587 }
 0xa1d   :  { %v2608_v47 = vmax.f32 %v2601_v38, %v2603_v42  ;;  %v10067_v38 = vld [vmem:[%s13317_s2 + $0x60] sm:$0xff]  ;;  %v10069_v42 = vld [vmem:[%s13317_s2 + $0x70] sm:$0xff] }
 0xa20   :  { %v2590_v43 = vpop.xlane.xlu1 %2589  ;;  %v2605_v45 = vpop.xlane.xlu0 %2604 }
 0xa21   :  { %v2592_v62 = vmin.f32 %v2588_v57, %v2590_v43  ;;  %v6708_v57 = vld [vmem:[%s13320_s5 + $0x290] sm:$0xff]  ;;  %v6709_v43 = vld [vmem:[%s13320_s5 + $0x298] sm:$0xff] }
 0xa23   :  { %v2593_v44 = vmin.f32 %v2591_v6, %v2592_v62  ;;  %v10070_v6 = vld [vmem:[%s13317_s2 + $0x78] sm:$0xff]  ;;  %v10071_v62 = vld [vmem:[%s13317_s2] sm:$0xff] }
 0xa24   :  { %v2607_v52 = vpop.xlane.xlu1 %2606 }
 0xa25   :  { %v2594_v59 = vrot.slane %v2593_v44, 4  ;;  %v2609_v11 = vmax.f32 %v2605_v45, %v2607_v52  ;;  %v6710_v45 = vld [vmem:[%s13320_s5 + $0x2a0] sm:$0xff]  ;;  %v6711_v52 = vld [vmem:[%s13320_s5 + $0x2a8] sm:$0xff] }
 0xa27   :  { %v2595_v12 = vmin.f32 %v2593_v44, %v2594_v59  ;;  %v2610_v0 = vmax.f32 %v2608_v47, %v2609_v11  ;;  %v9207_v44 = vpack.c.bf16 %v6709_v43, %v6708_v57  ;;  %v10072_v47 = vld [vmem:[%s13317_s2 + $0x8] sm:$0xff]  ;;  %v10073_v59 = vld [vmem:[%s13317_s2 + $0x10] sm:$0xff]  ;;  %v9211_v11 = vpack.c.bf16 %v6711_v52, %v6710_v45 }
 0xa29   :  { %v2596_v1 = vrot.slane %v2595_v12, 2  ;;  %v2611_v3 = vrot.slane %v2610_v0, 4 }
 0xa2b   :  { %v2597_v5 = vmin.f32 %v2595_v12, %v2596_v1  ;;  %v2612_v8 = vmax.f32 %v2610_v0, %v2611_v3  ;;  %v6712_v12 = vld [vmem:[%s13320_s5 + $0x2b0] sm:$0xff]  ;;  %v6713_v0 = vld [vmem:[%s13320_s5 + $0x2b8] sm:$0xff]  ;;  %v10075_v3 = vld [vmem:[%s13317_s2 + $0x20] sm:$0xff] }
 0xa2c   :  { %v10074_v1 = vld [vmem:[%s13317_s2 + $0x18] sm:$0xff] }
 0xa2d   :  { %v2613_v10 = vrot.slane %v2612_v8, 2  ;;  %v2598_v41 = vrot.slane %v2597_v5, 1 }
 0xa2f   :  { %v2614_v56 = vmax.f32 %v2612_v8, %v2613_v10  ;;  %v2599_v14 = vmin.f32 %v2597_v5, %v2598_v41  ;;  %v9215_v5 = vpack.c.bf16 %v6713_v0, %v6712_v12  ;;  %v6714_v8 = vld [vmem:[%s13320_s5 + $0x2c0] sm:$0xff]  ;;  %v6715_v10 = vld [vmem:[%s13320_s5 + $0x2c8] sm:$0xff] }
 0xa30   :  { %v10076_v41 = vld [vmem:[%s13317_s2 + $0x28] sm:$0xff] }
 0xa31   :  { %v2615_v61 = vrot.slane %v2614_v56, 1 }
 0xa33   :  { %v2616_v15 = vmax.f32 %v2614_v56, %v2615_v61  ;;  %v10077_v56 = vld [vmem:[%s13317_s2 + $0x30] sm:$0xff]  ;;  %v9219_v61 = vpack.c.bf16 %v6715_v10, %v6714_v8 }
 0xa35   :  { %v2617_v16 = vsub.f32 %v2616_v15, %v2599_v14  ;;  %v6717_v15 = vld [vmem:[%s13320_s5 + $0x2d8] sm:$0xff] }
 0xa37   :  { %9996 = vrcp.f32 %v2617_v16  ;;  %v10078_v16 = vld [vmem:[%s13317_s2 + $0x38] sm:$0xff] }
 0xa41   :  { %v9997_v9 = vpop.eup %9996 }
 0xa42   :  { %v2619_v13 = vmul.f32 %v9997_v9, %v10869_v7 }
 0xa44   :  { %v2620_v46 = vmul.f32 %v2619_v13, %v2599_v14  ;;  %v2622_v18 = vmul.f32 %v2619_v13, %v11509_v31  ;;  %v2623_v49 = vmul.f32 %v2619_v13, %v11512_v35  ;;  %v2624_v22 = vmul.f32 %v2619_v13, %v11516_v40  ;;  %v10062_v40 = vld [vmem:[%s13317_s2 + $0x40] sm:$0xff]  ;;  %v6716_v14 = vld [vmem:[%s13320_s5 + $0x2d0] sm:$0xff] }
 0xa45   :  { %v2625_v31 = vmul.f32 %v2619_v13, %v11520_v55  ;;  %v10063_v55 = vld [vmem:[%s13316_s1] sm:$0xff]  ;;  %v9223_v9 = vpack.c.bf16 %v6717_v15, %v6716_v14 }
 0xa46   :  { %v2621_v50 = vsub.f32 %v10866_v4, %v2620_v46  ;;  %v6718_v13 = vld [vmem:[%s13320_s5 + $0x2e0] sm:$0xff]  ;;  %v6719_v46 = vld [vmem:[%s13320_s5 + $0x2e8] sm:$0xff] }
 0xa48   :  { %v11625_v19 = vadd.f32 %v2622_v18, %v2621_v50  ;;  %v11627_v20 = vadd.f32 %v2623_v49, %v2621_v50  ;;  %v11632_v51 = vadd.f32 %v2624_v22, %v2621_v50  ;;  %v11639_v35 = vadd.f32 %v2625_v31, %v2621_v50  ;;  %v6720_v18 = vld [vmem:[%s13320_s5 + $0x2f0] sm:$0xff]  ;;  %v6721_v49 = vld [vmem:[%s13320_s5 + $0x2f8] sm:$0xff]  ;;  %v10079_v22 = vld [vmem:[%s13317_s2 + $0x80] sm:$0xff] }
 0xa49   :  { %v9227_v50 = vpack.c.bf16 %v6719_v46, %v6718_v13 }
 0xa4a   :  { %8021 = vmatprep.mubr.f32.mxu1 %v11625_v19  ;;  %8059 = vmatprep.mubr.f32.mxu0 %v11625_v19 }
 0xa4b   :  { %8022 = vmatmul.mubr.f32.vlgmr.msra.gmra.mrb[40].mxu1 %v11627_v20  ;;  %8060 = vmatmul.mubr.f32.vlgmr.msra.gmra.mrb[36].mxu0 %v11627_v20 }
 0xa4c   :  { %8024 = vmatprep.mubr.f32.mxu1 %v11632_v51  ;;  %8062 = vmatprep.mubr.f32.mxu0 %v11632_v51 }
 0xa4f   :  { %8025 = vmatmul.mubr.f32.gmra.mrb[42].mxu1 %v11639_v35  ;;  %8063 = vmatmul.mubr.f32.gmra.mrb[38].mxu0 %v11639_v35 }
 0xa50   :  { %8073 = vmatprep.mubr.msk.f32.mxu1 %vm1230_vm1, %v10062_v40  ;;  %8179 = vmatprep.mubr.msk.f32.mxu0 %vm115_vm0, %v10063_v55 }
 0xb1e   :  { %v8023_v23 = vpop.f32.mrb[40].mxu1  ;;  %v8061_v24 = vpop.f32.mrb[36].mxu0 }
 0xb1f   :  { %v2713_v48 = vpop.f32.mrb[41].mxu1  ;;  %v2815_v25 = vpop.f32.mrb[37].mxu0 }
 0xb20   :  { %v9195_v26 = vpack.c.bf16 %v8023_v23, %v2713_v48  ;;  %v9187_v63 = vpack.c.bf16 %v8061_v24, %v2815_v25  ;;  %v10083_v25 = vld [vmem:[%s13317_s2 + $0xa0] sm:$0xff] }
 0xb22   :  { %v8026_v27 = vpop.f32.mrb[42].mxu1  ;;  %v8064_v28 = vpop.f32.mrb[38].mxu0  ;;  %9188 = vmatprep.subr.bf16.mxu1 %v9187_v63 }
 0xb23   :  { %v2723_v29 = vpop.f32.mrb[43].mxu1  ;;  %v2825_v54 = vpop.f32.mrb[39].mxu0  ;;  %9190 = vmatpush3.bf16.msra.mxu1 %v9187_v63  ;;  %v10085_v63 = vld [vmem:[%s13317_s2 + $0xb0] sm:$0xff] }
 0xb24   :  { %v9199_v30 = vpack.c.bf16 %v8026_v27, %v2723_v29  ;;  %v9191_v2 = vpack.c.bf16 %v8064_v28, %v2825_v54  ;;  %v10086_v27 = vld [vmem:[%s13317_s2 + $0xb8] sm:$0xff]  ;;  %v10087_v28 = vld [vmem:[%s13316_s1 + $0x40] sm:$0xff]  ;;  %v3260_v29 = vstv %s6730_s30 }
 0xb26   :  { %9192 = vmatprep.subr.bf16.mxu1 %v9191_v2 }
 0xb27   :  { %9194 = vmatpush3.bf16.msra.mxu1 %v9191_v2 }
 0xb28   :  { %9196 = vmatprep.subr.bf16.mxu1 %v9195_v26 }
 0xb2a   :  { %8074 = vmatmul.mubr.msk.f32.vlgmr.msra.gmra.mrb[44].mxu1 %vm1230_vm1, %v10064_v34 }
 0xb2b   :  { %9198 = vmatpush3.bf16.msra.mxu1 %v9195_v26  ;;  %8076 = vmatprep.mubr.msk.f32.mxu1 %vm1230_vm1, %v10065_v53  ;;  %v10084_v26 = vld [vmem:[%s13317_s2 + $0xa8] sm:$0xff] }
 0xb2c   :  { %9200 = vmatprep.subr.bf16.mxu1 %v9199_v30 }
 0xb2e   :  { %8077 = vmatmul.mubr.msk.f32.gmra.mrb[46].mxu1 %vm1230_vm1, %v10066_v37 }
 0xb2f   :  { %9202 = vmatpush3.bf16.msra.mxu1 %v9199_v30  ;;  %8079 = vmatprep.mubr.msk.f32.mxu1 %vm1230_vm1, %v10067_v38 }
 0xb30   :  { %9204 = vmatprep.subr.bf16.mxu1 %v9203_v36 }
 0xb32   :  { %8080 = vmatmul.mubr.msk.f32.gmra.mrb[48].mxu1 %vm1230_vm1, %v10068_v39 }
 0xb33   :  { %8082 = vmatprep.mubr.msk.f32.mxu1 %vm1230_vm1, %v10069_v42 }
 0xb36   :  { %8083 = vmatmul.mubr.msk.f32.gmra.mrb[50].mxu1 %vm1230_vm1, %v10070_v6 }
 0xb37   :  { %8093 = vmatprep.mubr.msk.f32.mxu1 %vm1230_vm1, %v10071_v62 }
 0xb3a   :  { %8094 = vmatmul.mubr.msk.f32.vlgmr.msra.gmra.mrb[44].mxu1 %vm1230_vm1, %v10072_v47 }
 0xb3b   :  { %9206 = vmatpush3.bf16.msra.mxu1 %v9203_v36  ;;  %8096 = vmatprep.mubr.msk.f32.mxu1 %vm1230_vm1, %v10073_v59 }
 0xb3c   :  { %9208 = vmatprep.subr.bf16.mxu1 %v9207_v44 }
 0xb3e   :  { %8097 = vmatmul.mubr.msk.f32.gmra.mrb[46].mxu1 %vm1230_vm1, %v10074_v1 }
 0xb3f   :  { %9210 = vmatpush3.bf16.msra.mxu1 %v9207_v44  ;;  %8099 = vmatprep.mubr.msk.f32.mxu1 %vm1230_vm1, %v10075_v3 }
 0xb40   :  { %9212 = vmatprep.subr.bf16.mxu1 %v9211_v11 }
 0xb42   :  { %8100 = vmatmul.mubr.msk.f32.gmra.mrb[48].mxu1 %vm1230_vm1, %v10076_v41 }
 0xb43   :  { %9214 = vmatpush3.bf16.msra.mxu1 %v9211_v11  ;;  %8102 = vmatprep.mubr.msk.f32.mxu1 %vm1230_vm1, %v10077_v56 }
 0xb44   :  { %9216 = vmatprep.subr.bf16.mxu1 %v9215_v5 }
 0xb46   :  { %8103 = vmatmul.mubr.msk.f32.gmra.mrb[50].mxu1 %vm1230_vm1, %v10078_v16 }
 0xb47   :  { %9218 = vmatpush3.bf16.msra.mxu1 %v9215_v5  ;;  %8137 = vmatprep.mubr.f32.mxu1 %v11625_v19  ;;  %v9231_v19 = vpack.c.bf16 %v6721_v49, %v6720_v18 }
 0xb48   :  { %9220 = vmatprep.subr.bf16.mxu1 %v9219_v61 }
 0xb4b   :  { %9222 = vmatpush3.bf16.msra.mxu1 %v9219_v61 }
 0xb4c   :  { %9224 = vmatprep.subr.bf16.mxu1 %v9223_v9 }
 0xb4f   :  { %9226 = vmatpush3.bf16.msra.mxu1 %v9223_v9 }
 0xb50   :  { %9228 = vmatprep.subr.bf16.mxu1 %v9227_v50 }
 0xb53   :  { %9230 = vmatpush3.bf16.msra.mxu1 %v9227_v50 }
 0xb54   :  { %9232 = vmatprep.subr.bf16.mxu1 %v9231_v19 }
 0xb57   :  { %9234 = vmatpush3.bf16.msra.mxu1 %v9231_v19 }
 0xb5a   :  { %8138 = vmatmul.mubr.f32.vlgmr.msra.gmra.mrb[52].mxu1 %v11627_v20  ;;  %v10080_v20 = vld [vmem:[%s13317_s2 + $0x88] sm:$0xff] }
 0xb5b   :  { %8140 = vmatprep.mubr.f32.mxu1 %v11632_v51  ;;  %v10081_v51 = vld [vmem:[%s13317_s2 + $0x90] sm:$0xff] }
 0xb5e   :  { %8141 = vmatmul.mubr.f32.gmra.mrb[54].mxu1 %v11639_v35  ;;  %v10082_v35 = vld [vmem:[%s13317_s2 + $0x98] sm:$0xff] }
 0xb5f   :  { %8151 = vmatprep.mubr.msk.f32.mxu1 %vm1230_vm1, %v10079_v22 }
 0xc2d   :  { %v8139_v31 = vpop.f32.mrb[52].mxu1 }
 0xc2e   :  { %v3127_v40 = vpop.f32.mrb[53].mxu1 }
 0xc2f   :  { %v9235_v55 = vpack.c.bf16 %v8139_v31, %v3127_v40 }
 0xc31   :  { %v8142_v23 = vpop.f32.mrb[54].mxu1  ;;  %9236 = vmatprep.subr.bf16.mxu1 %v9235_v55 }
 0xc32   :  { %v3137_v24 = vpop.f32.mrb[55].mxu1  ;;  %9238 = vmatpush3.bf16.msra.mxu1 %v9235_v55 }
 0xc33   :  { %v9239_v48 = vpack.c.bf16 %v8142_v23, %v3137_v24 }
 0xc35   :  { %9240 = vmatprep.subr.bf16.mxu1 %v9239_v48 }
 0xc36   :  { %9242 = vmatpush3.bf16.msra.mxu1 %v9239_v48 }
 0xc39   :  { %8152 = vmatmul.mubr.msk.f32.vlgmr.msra.gmra.mrb[44].mxu1 %vm1230_vm1, %v10080_v20 }
 0xc3a   :  { %8154 = vmatprep.mubr.msk.f32.mxu1 %vm1230_vm1, %v10081_v51 }
 0xc3d   :  { %8155 = vmatmul.mubr.msk.f32.gmra.mrb[46].mxu1 %vm1230_vm1, %v10082_v35 }
 0xc3e   :  { %8157 = vmatprep.mubr.msk.f32.mxu1 %vm1230_vm1, %v10083_v25  ;;  %v10088_v25 = vld [vmem:[%s13316_s1 + $0x8] sm:$0xff] }
 0xc41   :  { %8158 = vmatmul.mubr.msk.f32.gmra.mrb[48].mxu1 %vm1230_vm1, %v10084_v26  ;;  %v10089_v26 = vld [vmem:[%s13316_s1 + $0x48] sm:$0xff] }
 0xc42   :  { %8160 = vmatprep.mubr.msk.f32.mxu1 %vm1230_vm1, %v10085_v63  ;;  %v10090_v63 = vld [vmem:[%s13316_s1 + $0x10] sm:$0xff] }
 0xc45   :  { %8161 = vmatmul.mubr.msk.f32.gmra.mrb[50].mxu1 %vm1230_vm1, %v10086_v27  ;;  %v10091_v27 = vld [vmem:[%s13316_s1 + $0x50] sm:$0xff] }
 0xc46   :  { %8223 = vmatprep.mubr.msk.f32.mxu1 %vm115_vm0, %v10087_v28  ;;  %v10092_v28 = vld [vmem:[%s13316_s1 + $0x18] sm:$0xff] }
 0xd0c   :  { %v8153_v54 = vpop.f32.mrb[44].mxu1 }
 0xd0d   :  { %v3262_v30 = vadd.f32 %v8153_v54, %v3260_v29  ;;  %v3212_v2 = vpop.f32.mrb[45].mxu1  ;;  %v10094_v54 = vld [vmem:[%s13316_s1 + $0x20] sm:$0xff] }
 0xd0e   :  { %v3261_v32 = vadd.f32 %v3260_v29, %v3212_v2  ;;  %v6774_v2 = vld [vmem:[%s13318_s3 + $0x718] sm:$0xff] }
 0xd0f   :  { %v3270_v33 = vmul.f32 0.5, %v3262_v30  ;;  %v6772_v30 = vld [vmem:[%s13318_s3 + $0x708] sm:$0xff] }
 0xd10   :  { %v3269_v34 = vmul.f32 0.5, %v3261_v32  ;;  %v8156_v53 = vpop.f32.mrb[46].mxu1  ;;  %v9275_v32 = vpack.c.bf16 %v6774_v2, %v6772_v30  ;;  %v6843_v30 = vld [vmem:[%s13319_s4 + $0x198] sm:$0xff] }
 0xd11   :  { %9998 = vtanh.f32 %v3270_v33  ;;  %v3264_v36 = vadd.f32 %v8156_v53, %v3260_v29  ;;  %v3222_v37 = vpop.f32.mrb[47].mxu1  ;;  %v6771_v33 = vld [vmem:[%s13318_s3 + $0x700] sm:$0xff]  ;;  %v6776_v53 = vld [vmem:[%s13318_s3 + $0x728] sm:$0xff] }
 0xd12   :  { %10000 = vtanh.f32 %v3269_v34  ;;  %v3263_v38 = vadd.f32 %v3260_v29, %v3222_v37  ;;  %v6773_v34 = vld [vmem:[%s13318_s3 + $0x710] sm:$0xff] }
 0xd13   :  { %v3272_v39 = vmul.f32 0.5, %v3264_v36  ;;  %v6778_v36 = vld [vmem:[%s13318_s3 + $0x738] sm:$0xff]  ;;  %v9277_v37 = vpack.c.bf16 %v6773_v34, %v6771_v33  ;;  %v6845_v33 = vld [vmem:[%s13319_s4 + $0x1a8] sm:$0xff] }
 0xd14   :  { %v3271_v42 = vmul.f32 0.5, %v3263_v38  ;;  %v8159_v57 = vpop.f32.mrb[48].mxu1  ;;  %v9279_v38 = vpack.c.bf16 %v6778_v36, %v6776_v53  ;;  %v6846_v53 = vld [vmem:[%s13319_s4 + $0x1b0] sm:$0xff]  ;;  %v6847_v36 = vld [vmem:[%s13319_s4 + $0x1b8] sm:$0xff] }
 0xd15   :  { %10002 = vtanh.f32 %v3272_v39  ;;  %v3266_v43 = vadd.f32 %v8159_v57, %v3260_v29  ;;  %v3232_v6 = vpop.f32.mrb[49].mxu1  ;;  %v6775_v39 = vld [vmem:[%s13318_s3 + $0x720] sm:$0xff]  ;;  %v6780_v57 = vld [vmem:[%s13318_s3 + $0x748] sm:$0xff] }
 0xd16   :  { %10004 = vtanh.f32 %v3271_v42  ;;  %v3265_v62 = vadd.f32 %v3260_v29, %v3232_v6  ;;  %v6777_v42 = vld [vmem:[%s13318_s3 + $0x730] sm:$0xff]  ;;  %v10095_v6 = vld [vmem:[%s13316_s1 + $0x28] sm:$0xff] }
 0xd17   :  { %v3274_v44 = vmul.f32 0.5, %v3266_v43  ;;  %v6782_v43 = vld [vmem:[%s13318_s3 + $0x758] sm:$0xff] }
 0xd18   :  { %v3273_v45 = vmul.f32 0.5, %v3265_v62  ;;  %v8162_v52 = vpop.f32.mrb[50].mxu1  ;;  %v10096_v62 = vld [vmem:[%s13316_s1 + $0x30] sm:$0xff] }
 0xd19   :  { %10006 = vtanh.f32 %v3274_v44  ;;  %v3268_v47 = vadd.f32 %v8162_v52, %v3260_v29  ;;  %v3242_v59 = vpop.f32.mrb[51].mxu1  ;;  %v9281_v44 = vpack.c.bf16 %v6777_v42, %v6775_v39  ;;  %v6779_v52 = vld [vmem:[%s13318_s3 + $0x740] sm:$0xff]  ;;  %v6849_v39 = vld [vmem:[%s13319_s4 + $0x1c8] sm:$0xff] }
 0xd1a   :  { %10008 = vtanh.f32 %v3273_v45  ;;  %v3267_v11 = vadd.f32 %v3260_v29, %v3242_v59  ;;  %v10093_v29 = vld [vmem:[%s13316_s1 + $0x58] sm:$0xff]  ;;  %v9283_v45 = vpack.c.bf16 %v6782_v43, %v6780_v57  ;;  %v6784_v59 = vld [vmem:[%s13318_s3 + $0x768] sm:$0xff]  ;;  %v6850_v57 = vld [vmem:[%s13319_s4 + $0x1d0] sm:$0xff] }
 0xd1b   :  { %v9999_v12 = vpop.eup %9998  ;;  %v3276_v0 = vmul.f32 0.5, %v3268_v47  ;;  %v6781_v47 = vld [vmem:[%s13318_s3 + $0x750] sm:$0xff]  ;;  %v6851_v43 = vld [vmem:[%s13319_s4 + $0x1d8] sm:$0xff] }
 0xd1c   :  { %v10001_v1 = vpop.eup %10000  ;;  %v3286_v3 = vadd.f32 1.0, %v9999_v12  ;;  %v3275_v5 = vmul.f32 0.5, %v3267_v11  ;;  %v6786_v11 = vld [vmem:[%s13318_s3 + $0x778] sm:$0xff] }
 0xd1d   :  { %v3285_v8 = vadd.f32 1.0, %v10001_v1  ;;  %10010 = vtanh.f32 %v3276_v0  ;;  %v10097_v12 = vld [vmem:[%s13316_s1 + $0x38] sm:$0xff]  ;;  %v9285_v0 = vpack.c.bf16 %v6781_v47, %v6779_v52  ;;  %v9287_v1 = vpack.c.bf16 %v6786_v11, %v6784_v59  ;;  %v6854_v52 = vld [vmem:[%s13319_s4 + $0x1f0] sm:$0xff]  ;;  %v6856_v11 = vld [vmem:[%s13319_s4 + $0x200] sm:$0xff] }
 0xd1e   :  { %v3294_v10 = vmul.f32 0.5, %v3286_v3  ;;  %10012 = vtanh.f32 %v3275_v5  ;;  %v6783_v3 = vld [vmem:[%s13318_s3 + $0x760] sm:$0xff]  ;;  %v6785_v5 = vld [vmem:[%s13318_s3 + $0x770] sm:$0xff]  ;;  %v6855_v47 = vld [vmem:[%s13319_s4 + $0x1f8] sm:$0xff] }
 0xd1f   :  { %v10003_v41 = vpop.eup %10002  ;;  %v3293_v56 = vmul.f32 0.5, %v3285_v8  ;;  %v9289_v8 = vpack.c.bf16 %v6785_v5, %v6783_v3  ;;  %v9409_v59 = vpack.c.bf16 %v6855_v47, %v6854_v52  ;;  %v6859_v3 = vld [vmem:[%s13319_s4 + $0x218] sm:$0xff]  ;;  %v6761_v52 = vld [vmem:[%s13318_s3 + $0x6d0] sm:$0xff]  ;;  %v6764_v47 = vld [vmem:[%s13318_s3 + $0x6e8] sm:$0xff] }
 0xd20   :  { %v10005_v61 = vpop.eup %10004  ;;  %v3288_v14 = vadd.f32 1.0, %v10003_v41  ;;  %v6790_v41 = vld [vmem:[%s13318_s3 + $0x798] sm:$0xff] }
 0xd21   :  { %v9243_v15 = vpack.c.bf16 %v3294_v10, %v3293_v56  ;;  %v3287_v16 = vadd.f32 1.0, %v10005_v61  ;;  %v6788_v10 = vld [vmem:[%s13318_s3 + $0x788] sm:$0xff]  ;;  %v6787_v61 = vld [vmem:[%s13318_s3 + $0x780] sm:$0xff] }
 0xd22   :  { %v3296_v9 = vmul.f32 0.5, %v3288_v14  ;;  %v9291_v56 = vpack.c.bf16 %v6790_v41, %v6788_v10  ;;  %v6789_v14 = vld [vmem:[%s13318_s3 + $0x790] sm:$0xff] }
 0xd23   :  { %v10007_v13 = vpop.eup %10006  ;;  %v3295_v46 = vmul.f32 0.5, %v3287_v16  ;;  %9244 = vmatprep.subr.bf16.mxu0 %v9243_v15  ;;  %9340 = vmatprep.subr.bf16.mxu1 %v9243_v15  ;;  %v6792_v16 = vld [vmem:[%s13318_s3 + $0x7a8] sm:$0xff] }
 0xd24   :  { %v10009_v50 = vpop.eup %10008  ;;  %v3290_v18 = vadd.f32 1.0, %v10007_v13  ;;  %9246 = vmatpush3.bf16.msra.mxu0 %v9243_v15  ;;  %9342 = vmatpush3.bf16.msra.mxu1 %v9243_v15  ;;  %v6791_v13 = vld [vmem:[%s13318_s3 + $0x7a0] sm:$0xff] }
 0xd25   :  { %v9247_v49 = vpack.c.bf16 %v3296_v9, %v3295_v46  ;;  %v3289_v19 = vadd.f32 1.0, %v10009_v50  ;;  %v6794_v9 = vld [vmem:[%s13318_s3 + $0x7b8] sm:$0xff]  ;;  %v6793_v50 = vld [vmem:[%s13318_s3 + $0x7b0] sm:$0xff] }
 0xd26   :  { %v3298_v22 = vmul.f32 0.5, %v3290_v18  ;;  %v9295_v46 = vpack.c.bf16 %v6794_v9, %v6792_v16  ;;  %v6796_v18 = vld [vmem:[%s13318_s3 + $0x7c8] sm:$0xff]  ;;  %v6735_v9 = vld [vmem:[%s13318_s3 + $0x600] sm:$0xff] }
 0xd27   :  { %v10011_v31 = vpop.eup %10010  ;;  %v3297_v40 = vmul.f32 0.5, %v3289_v19  ;;  %9248 = vmatprep.subr.bf16.mxu0 %v9247_v49  ;;  %9344 = vmatprep.subr.bf16.mxu1 %v9247_v49  ;;  %v9297_v19 = vpack.c.bf16 %v6793_v50, %v6791_v13  ;;  %v6737_v13 = vld [vmem:[%s13318_s3 + $0x610] sm:$0xff]  ;;  %v6742_v50 = vld [vmem:[%s13318_s3 + $0x638] sm:$0xff] }
 0xd28   :  { %v10013_v55 = vpop.eup %10012  ;;  %v3292_v23 = vadd.f32 1.0, %v10011_v31  ;;  %9250 = vmatpush3.bf16.msra.mxu0 %v9247_v49  ;;  %9346 = vmatpush3.bf16.msra.mxu1 %v9247_v49  ;;  %v6795_v31 = vld [vmem:[%s13318_s3 + $0x7c0] sm:$0xff] }
 0xd29   :  { %v9251_v24 = vpack.c.bf16 %v3298_v22, %v3297_v40  ;;  %v3291_v48 = vadd.f32 1.0, %v10013_v55  ;;  %v6797_v40 = vld [vmem:[%s13318_s3 + $0x7d0] sm:$0xff]  ;;  %v6800_v55 = vld [vmem:[%s13318_s3 + $0x7e8] sm:$0xff] }
 0xd2a   :  { %v3300_v20 = vmul.f32 0.5, %v3292_v23  ;;  %v6802_v23 = vld [vmem:[%s13318_s3 + $0x7f8] sm:$0xff] }
 0xd2b   :  { %v3299_v51 = vmul.f32 0.5, %v3291_v48  ;;  %9252 = vmatprep.subr.bf16.mxu0 %v9251_v24  ;;  %9348 = vmatprep.subr.bf16.mxu1 %v9251_v24  ;;  %v9303_v48 = vpack.c.bf16 %v6802_v23, %v6800_v55  ;;  %v6744_v55 = vld [vmem:[%s13318_s3 + $0x648] sm:$0xff]  ;;  %v6746_v23 = vld [vmem:[%s13318_s3 + $0x658] sm:$0xff] }
 0xd2c   :  { %9254 = vmatpush3.bf16.msra.mxu0 %v9251_v24  ;;  %9350 = vmatpush3.bf16.msra.mxu1 %v9251_v24 }
 0xd2d   :  { %v9255_v35 = vpack.c.bf16 %v3300_v20, %v3299_v51  ;;  %v6799_v20 = vld [vmem:[%s13318_s3 + $0x7e0] sm:$0xff]  ;;  %v6801_v51 = vld [vmem:[%s13318_s3 + $0x7f0] sm:$0xff] }
 0xd2f   :  { %9256 = vmatprep.subr.bf16.mxu0 %v9255_v35  ;;  %9352 = vmatprep.subr.bf16.mxu1 %v9255_v35 }
 0xd30   :  { %9258 = vmatpush3.bf16.msra.mxu0 %v9255_v35  ;;  %9354 = vmatpush3.bf16.msra.mxu1 %v9255_v35 }
 0xd31   :  { %9260 = vmatprep.subr.bf16.mxu0 %v9243_v15  ;;  %9387 = vmatprep.subr.bf16.mxu1 %v10174_v21 }
 0xd33   :  { %8180 = vmatmul.mubr.msk.f32.vlgmr.msra.gmra.mrb[40].mxu0 %vm115_vm0, %v10088_v25  ;;  %8224 = vmatmul.mubr.msk.f32.vlgmr.msra.gmra.mrb[56].mxu1 %vm115_vm0, %v10089_v26  ;;  %v6736_v25 = vld [vmem:[%s13318_s3 + $0x608] sm:$0xff]  ;;  %v6738_v26 = vld [vmem:[%s13318_s3 + $0x618] sm:$0xff] }
 0xd34   :  { %9262 = vmatpush3.bf16.msra.mxu0 %v9243_v15  ;;  %8182 = vmatprep.mubr.msk.f32.mxu0 %vm115_vm0, %v10090_v63  ;;  %v9293_v15 = vpack.c.bf16 %v6789_v14, %v6787_v61  ;;  %v9307_v63 = vpack.c.bf16 %v6738_v26, %v6736_v25  ;;  %v6748_v25 = vld [vmem:[%s13318_s3 + $0x668] sm:$0xff]  ;;  %v6750_v26 = vld [vmem:[%s13318_s3 + $0x678] sm:$0xff] }
 0xd35   :  { %9264 = vmatprep.subr.bf16.mxu0 %v9247_v49  ;;  %8226 = vmatprep.mubr.msk.f32.mxu1 %vm115_vm0, %v10091_v27  ;;  %v6840_v27 = vld [vmem:[%s13319_s4 + $0x180] sm:$0xff] }
 0xd37   :  { %8183 = vmatmul.mubr.msk.f32.gmra.mrb[42].mxu0 %vm115_vm0, %v10092_v28  ;;  %8227 = vmatmul.mubr.msk.f32.gmra.mrb[58].mxu1 %vm115_vm0, %v10093_v29  ;;  %v6841_v28 = vld [vmem:[%s13319_s4 + $0x188] sm:$0xff]  ;;  %v6842_v29 = vld [vmem:[%s13319_s4 + $0x190] sm:$0xff] }
 0xd38   :  { %9266 = vmatpush3.bf16.msra.mxu0 %v9247_v49  ;;  %8201 = vmatprep.mubr.msk.f32.mxu0 %vm115_vm0, %v10094_v54  ;;  %v6798_v49 = vld [vmem:[%s13318_s3 + $0x7d8] sm:$0xff]  ;;  %v9388_v54 = vpack.c.bf16 %v6841_v28, %v6840_v27  ;;  %v9391_v2 = vpack.c.bf16 %v6843_v30, %v6842_v29  ;;  %v9319_v28 = vpack.c.bf16 %v6750_v26, %v6748_v25  ;;  %v6747_v29 = vld [vmem:[%s13318_s3 + $0x660] sm:$0xff]  ;;  %v6752_v30 = vld [vmem:[%s13318_s3 + $0x688] sm:$0xff] }
 0xd39   :  { %9268 = vmatprep.subr.bf16.mxu0 %v9251_v24  ;;  %v9299_v22 = vpack.c.bf16 %v6798_v49, %v6796_v18  ;;  %v9309_v18 = vpack.c.bf16 %v6737_v13, %v6735_v9 }
 0xd3a   :  { %9389 = vmatpush1.bf16.msra.mxu1 %v9388_v54  ;;  %v6749_v54 = vld [vmem:[%s13318_s3 + $0x670] sm:$0xff] }
 0xd3b   :  { %9390 = vmatprep.subr.bf16.mxu1 %v10174_v21 }
 0xd3c   :  { %9270 = vmatpush3.bf16.msra.mxu0 %v9251_v24  ;;  %v9301_v24 = vpack.c.bf16 %v6797_v40, %v6795_v31  ;;  %v6741_v31 = vld [vmem:[%s13318_s3 + $0x630] sm:$0xff] }
 0xd3d   :  { %9272 = vmatprep.subr.bf16.mxu0 %v9255_v35 }
 0xd3e   :  { %9392 = vmatpush1.bf16.msra.mxu1 %v9391_v2  ;;  %v6754_v2 = vld [vmem:[%s13318_s3 + $0x698] sm:$0xff] }
 0xd3f   :  { %9393 = vmatprep.subr.bf16.mxu1 %v10174_v21 }
 0xd40   :  { %9274 = vmatpush3.bf16.msra.mxu0 %v9255_v35  ;;  %v9305_v35 = vpack.c.bf16 %v6801_v51, %v6799_v20  ;;  %v6743_v20 = vld [vmem:[%s13318_s3 + $0x640] sm:$0xff]  ;;  %v6745_v51 = vld [vmem:[%s13318_s3 + $0x650] sm:$0xff] }
 0xd41   :  { %9276 = vmatprep.subr.bf16.mxu0 %v9275_v32  ;;  %v6844_v32 = vld [vmem:[%s13319_s4 + $0x1a0] sm:$0xff]  ;;  %v9317_v27 = vpack.c.bf16 %v6745_v51, %v6743_v20  ;;  %v6817_v51 = vld [vmem:[%s13318_s3 + $0x850] sm:$0xff] }
 0xd42   :  { %v9394_v34 = vpack.c.bf16 %v6845_v33, %v6844_v32  ;;  %v9321_v32 = vpack.c.bf16 %v6749_v54, %v6747_v29  ;;  %v9323_v33 = vpack.c.bf16 %v6754_v2, %v6752_v30  ;;  %v6815_v20 = vld [vmem:[%s13318_s3 + $0x840] sm:$0xff]  ;;  %v6825_v2 = vld [vmem:[%s13318_s3 + $0x890] sm:$0xff] }
 0xd43   :  { %8202 = vmatmul.mubr.msk.f32.vlgmr.msra.gmra.mrb[44].mxu0 %vm115_vm0, %v10095_v6  ;;  %v9403_v6 = vpack.c.bf16 %v6851_v43, %v6850_v57  ;;  %v6757_v57 = vld [vmem:[%s13318_s3 + $0x6b0] sm:$0xff]  ;;  %v6760_v43 = vld [vmem:[%s13318_s3 + $0x6c8] sm:$0xff]  ;;  %v9365_v25 = vpack.c.bf16 %v6817_v51, %v6815_v20  ;;  %v6823_v30 = vld [vmem:[%s13318_s3 + $0x880] sm:$0xff] }
 0xd44   :  { %8204 = vmatprep.mubr.msk.f32.mxu0 %vm115_vm0, %v10096_v62  ;;  %9278 = vmatpush1.bf16.msra.mxu0 %v9277_v37  ;;  %v9397_v37 = vpack.c.bf16 %v6847_v36, %v6846_v53  ;;  %v6852_v62 = vld [vmem:[%s13319_s4 + $0x1e0] sm:$0xff]  ;;  %v6753_v53 = vld [vmem:[%s13318_s3 + $0x690] sm:$0xff]  ;;  %v6756_v36 = vld [vmem:[%s13318_s3 + $0x6a8] sm:$0xff] }
 0xd45   :  { %9280 = vmatprep.subr.bf16.mxu0 %v9279_v38  ;;  %9395 = vmatpush1.bf16.msra.mxu1 %v9394_v34  ;;  %v6848_v38 = vld [vmem:[%s13319_s4 + $0x1c0] sm:$0xff] }
 0xd46   :  { %9396 = vmatprep.subr.bf16.mxu1 %v10174_v21  ;;  %v9400_v42 = vpack.c.bf16 %v6849_v39, %v6848_v38  ;;  %v6751_v34 = vld [vmem:[%s13318_s3 + $0x680] sm:$0xff] }
 0xd47   :  { %8205 = vmatmul.mubr.msk.f32.gmra.mrb[46].mxu0 %vm115_vm0, %v10097_v12  ;;  %v6857_v12 = vld [vmem:[%s13319_s4 + $0x208] sm:$0xff]  ;;  %v9325_v38 = vpack.c.bf16 %v6753_v53, %v6751_v34  ;;  %v6827_v53 = vld [vmem:[%s13318_s3 + $0x8a0] sm:$0xff] }
 0xd48   :  { %9282 = vmatpush1.bf16.msra.mxu0 %v9281_v44  ;;  %3601 = vmatprep.mubr.f32.mxu0 %v10173_v17  ;;  %v6853_v44 = vld [vmem:[%s13319_s4 + $0x1e8] sm:$0xff] }
 0xd49   :  { %9284 = vmatprep.subr.bf16.mxu0 %v9283_v45  ;;  %9398 = vmatpush1.bf16.msra.mxu1 %v9397_v37  ;;  %v9406_v45 = vpack.c.bf16 %v6853_v44, %v6852_v62  ;;  %v6758_v37 = vld [vmem:[%s13318_s3 + $0x6b8] sm:$0xff] }
 0xd4a   :  { %9399 = vmatprep.subr.bf16.mxu1 %v10174_v21  ;;  %v9327_v39 = vpack.c.bf16 %v6758_v37, %v6756_v36  ;;  %v6829_v36 = vld [vmem:[%s13318_s3 + $0x8b0] sm:$0xff]  ;;  %v6832_v37 = vld [vmem:[%s13318_s3 + $0x8c8] sm:$0xff] }
 0xd4c   :  { %9286 = vmatpush1.bf16.msra.mxu0 %v9285_v0  ;;  %v9412_v0 = vpack.c.bf16 %v6857_v12, %v6856_v11 }
 0xd4d   :  { %9288 = vmatprep.subr.bf16.mxu0 %v9287_v1  ;;  %9401 = vmatpush1.bf16.msra.mxu1 %v9400_v42  ;;  %v6858_v1 = vld [vmem:[%s13319_s4 + $0x210] sm:$0xff]  ;;  %v6755_v42 = vld [vmem:[%s13318_s3 + $0x6a0] sm:$0xff] }
 0xd4e   :  { %9402 = vmatprep.subr.bf16.mxu1 %v10174_v21  ;;  %v9329_v62 = vpack.c.bf16 %v6757_v57, %v6755_v42  ;;  %v6831_v42 = vld [vmem:[%s13318_s3 + $0x8c0] sm:$0xff]  ;;  %v6833_v57 = vld [vmem:[%s13318_s3 + $0x8d0] sm:$0xff] }
 0xd50   :  { %9290 = vmatpush1.bf16.msra.mxu0 %v9289_v8 }
 0xd51   :  { %9292 = vmatprep.subr.bf16.mxu0 %v9291_v56  ;;  %9404 = vmatpush1.bf16.msra.mxu1 %v9403_v6  ;;  %v9415_v56 = vpack.c.bf16 %v6859_v3, %v6858_v1  ;;  %v6762_v6 = vld [vmem:[%s13318_s3 + $0x6d8] sm:$0xff]  ;;  %v6765_v1 = vld [vmem:[%s13318_s3 + $0x6f0] sm:$0xff]  ;;  %v6808_v3 = vld [vmem:[%s13318_s3 + $0x808] sm:$0xff] }
 0xd52   :  { %9405 = vmatprep.subr.bf16.mxu1 %v10174_v21  ;;  %v9331_v44 = vpack.c.bf16 %v6762_v6, %v6760_v43  ;;  %v6836_v43 = vld [vmem:[%s13318_s3 + $0x8e8] sm:$0xff]  ;;  %v6838_v6 = vld [vmem:[%s13318_s3 + $0x8f8] sm:$0xff] }
 0xd54   :  { %9294 = vmatpush1.bf16.msra.mxu0 %v9293_v15 }
 0xd55   :  { %9296 = vmatprep.subr.bf16.mxu0 %v9295_v46  ;;  %9407 = vmatpush1.bf16.msra.mxu1 %v9406_v45  ;;  %v6740_v46 = vld [vmem:[%s13318_s3 + $0x628] sm:$0xff]  ;;  %v6759_v45 = vld [vmem:[%s13318_s3 + $0x6c0] sm:$0xff] }
 0xd56   :  { %9408 = vmatprep.subr.bf16.mxu1 %v10174_v21  ;;  %v9333_v11 = vpack.c.bf16 %v6761_v52, %v6759_v45  ;;  %v6835_v45 = vld [vmem:[%s13318_s3 + $0x8e0] sm:$0xff]  ;;  %v6837_v52 = vld [vmem:[%s13318_s3 + $0x8f0] sm:$0xff] }
 0xd58   :  { %9298 = vmatpush1.bf16.msra.mxu0 %v9297_v19  ;;  %v9311_v19 = vpack.c.bf16 %v6742_v50, %v6740_v46  ;;  %v6807_v46 = vld [vmem:[%s13318_s3 + $0x800] sm:$0xff]  ;;  %v6809_v50 = vld [vmem:[%s13318_s3 + $0x810] sm:$0xff] }
 0xd59   :  { %9300 = vmatprep.subr.bf16.mxu0 %v9299_v22  ;;  %9410 = vmatpush1.bf16.msra.mxu1 %v9409_v59  ;;  %v6739_v22 = vld [vmem:[%s13318_s3 + $0x620] sm:$0xff]  ;;  %v6766_v59 = vld [vmem:[%s13318_s3 + $0x6f8] sm:$0xff] }
 0xd5a   :  { %9411 = vmatprep.subr.bf16.mxu1 %v10174_v21  ;;  %v9335_v12 = vpack.c.bf16 %v6766_v59, %v6764_v47  ;;  %v9385_v47 = vpack.c.bf16 %v6837_v52, %v6835_v45  ;;  %v6860_v59 = vld [vmem:[%s13319_s4 + $0x220] sm:$0xff] }
 0xd5c   :  { %9302 = vmatpush1.bf16.msra.mxu0 %v9301_v24  ;;  %v9313_v24 = vpack.c.bf16 %v6741_v31, %v6739_v22  ;;  %v6811_v31 = vld [vmem:[%s13318_s3 + $0x820] sm:$0xff] }
 0xd5d   :  { %9304 = vmatprep.subr.bf16.mxu0 %v9303_v48  ;;  %9413 = vmatpush1.bf16.msra.mxu1 %v9412_v0  ;;  %v9315_v48 = vpack.c.bf16 %v6746_v23, %v6744_v55  ;;  %v6763_v0 = vld [vmem:[%s13318_s3 + $0x6e0] sm:$0xff]  ;;  %v6816_v55 = vld [vmem:[%s13318_s3 + $0x848] sm:$0xff]  ;;  %v6818_v23 = vld [vmem:[%s13318_s3 + $0x858] sm:$0xff] }
 0xd5e   :  { %9414 = vmatprep.subr.bf16.mxu1 %v10174_v21  ;;  %v9337_v9 = vpack.c.bf16 %v6765_v1, %v6763_v0 }
 0xd60   :  { %9306 = vmatpush1.bf16.msra.mxu0 %v9305_v35 }
 0xd61   :  { %9308 = vmatprep.subr.bf16.mxu0 %v9307_v63  ;;  %9416 = vmatpush1.bf16.msra.mxu1 %v9415_v56  ;;  %v6810_v56 = vld [vmem:[%s13318_s3 + $0x818] sm:$0xff] }
 0xd62   :  { %9417 = vmatprep.subr.bf16.mxu1 %v10174_v21  ;;  %v9355_v13 = vpack.c.bf16 %v6810_v56, %v6808_v3 }
 0xe06   :  { %v12011_v5 = vpop.f32.mrb[40].mxu0  ;;  %v12013_v8 = vpop.f32.mrb[56].mxu1 }
 0xe07   :  { %v12015_v10 = vpop.f32.mrb[41].mxu0  ;;  %v12017_v41 = vpop.f32.mrb[57].mxu1 }
 0xe0a   :  { %v12020_v61 = vpop.f32.mrb[42].mxu0  ;;  %v12022_v14 = vpop.f32.mrb[58].mxu1 }
 0xe0b   :  { %v12024_v15 = vpop.f32.mrb[43].mxu0  ;;  %v12026_v16 = vpop.f32.mrb[59].mxu1 }
 0xe16   :  { %v8203_v49 = vpop.f32.mrb[44].mxu0 }
 0xe17   :  { %v3485_v40 = vpop.f32.mrb[45].mxu0 }
 0xe18   :  { %3602 = vmatmul.mubr.f32.vlgmr.msra.gmra.mrb[48].mxu0 %v3485_v40  ;;  %v6813_v40 = vld [vmem:[%s13318_s3 + $0x830] sm:$0xff] }
 0xe19   :  { %9310 = vmatpush1.bf16.msra.mxu0 %v9309_v18  ;;  %3607 = vmatprep.mubr.f32.mxu0 %v10173_v17  ;;  %v6812_v18 = vld [vmem:[%s13318_s3 + $0x828] sm:$0xff] }
 0xe1a   :  { %9312 = vmatprep.subr.bf16.mxu0 %v9311_v19  ;;  %v8206_v35 = vpop.f32.mrb[46].mxu0  ;;  %v9357_v19 = vpack.c.bf16 %v6809_v50, %v6807_v46 }
 0xe1b   :  { %v3495_v63 = vpop.f32.mrb[47].mxu0 }
 0xe1c   :  { %3608 = vmatmul.mubr.f32.gmra.mrb[50].mxu0 %v8203_v49  ;;  %v6814_v49 = vld [vmem:[%s13318_s3 + $0x838] sm:$0xff] }
 0xe1d   :  { %9314 = vmatpush1.bf16.msra.mxu0 %v9313_v24  ;;  %3613 = vmatprep.mubr.f32.mxu0 %v10173_v17  ;;  %v9359_v22 = vpack.c.bf16 %v6814_v49, %v6812_v18  ;;  %v9361_v24 = vpack.c.bf16 %v6813_v40, %v6811_v31 }
 0xe1e   :  { %9316 = vmatprep.subr.bf16.mxu0 %v9315_v48  ;;  %v9363_v48 = vpack.c.bf16 %v6818_v23, %v6816_v55 }
 0xe20   :  { %3614 = vmatmul.mubr.f32.gmra.mrb[52].mxu0 %v3495_v63  ;;  %v6819_v63 = vld [vmem:[%s13318_s3 + $0x860] sm:$0xff] }
 0xe21   :  { %9318 = vmatpush1.bf16.msra.mxu0 %v9317_v27  ;;  %3619 = vmatprep.mubr.f32.mxu0 %v10173_v17  ;;  %v6821_v27 = vld [vmem:[%s13318_s3 + $0x870] sm:$0xff] }
 0xe22   :  { %9320 = vmatprep.subr.bf16.mxu0 %v9319_v28  ;;  %v6824_v28 = vld [vmem:[%s13318_s3 + $0x888] sm:$0xff]  ;;  %v9369_v29 = vpack.c.bf16 %v6821_v27, %v6819_v63 }
 0xe24   :  { %3620 = vmatmul.mubr.f32.gmra.mrb[54].mxu0 %v8206_v35  ;;  %v6820_v35 = vld [vmem:[%s13318_s3 + $0x868] sm:$0xff] }
 0xe25   :  { %9322 = vmatpush1.bf16.msra.mxu0 %v9321_v32  ;;  %3690 = vmatprep.mubr.f32.mxu0 %v10173_v17  ;;  %v6828_v32 = vld [vmem:[%s13318_s3 + $0x8a8] sm:$0xff] }
 0xe26   :  { %9324 = vmatprep.subr.bf16.mxu0 %v9323_v33  ;;  %v9373_v33 = vpack.c.bf16 %v6825_v2, %v6823_v30 }
 0xe29   :  { %9326 = vmatpush1.bf16.msra.mxu0 %v9325_v38  ;;  %v9377_v38 = vpack.c.bf16 %v6829_v36, %v6827_v53 }
 0xe2a   :  { %9328 = vmatprep.subr.bf16.mxu0 %v9327_v39 }
 0xe2d   :  { %9330 = vmatpush1.bf16.msra.mxu0 %v9329_v62  ;;  %v9381_v62 = vpack.c.bf16 %v6833_v57, %v6831_v42 }
 0xe2e   :  { %9332 = vmatprep.subr.bf16.mxu0 %v9331_v44  ;;  %v9383_v44 = vpack.c.bf16 %v6838_v6, %v6836_v43 }
 0xe31   :  { %9334 = vmatpush1.bf16.msra.mxu0 %v9333_v11 }
 0xe32   :  { %9336 = vmatprep.subr.bf16.mxu0 %v9335_v12  ;;  %v6839_v12 = vld [vmem:[%s13321_s6 + $0x4] sm:$0x3] }
 0xe33   :  { %v3936_v0 = vrot.slane %v6839_v12, %v10732_v58  ;;  %v3940_v1 = vrot.slane %v6839_v12, %v10737_v60  ;;  %v6886_v12 = vld [vmem:[%s13320_s5 + $0x380] sm:$0xff] }
 0xe35   :  { %9338 = vmatpush1.bf16.msra.mxu0 %v9337_v9 }
 0xe36   :  { %9356 = vmatprep.subr.bf16.mxu0 %v9355_v13 }
 0xe38   :  { %3691 = vmatmul.mubr.f32.vlgmr.msra.gmra.mrb[48].mxu0 %v12015_v10  ;;  %v6822_v10 = vld [vmem:[%s13318_s3 + $0x878] sm:$0xff] }
 0xe39   :  { %9358 = vmatpush1.bf16.msra.mxu0 %v9357_v19  ;;  %3696 = vmatprep.mubr.f32.mxu0 %v10173_v17  ;;  %v9367_v26 = vpack.c.bf16 %v6822_v10, %v6820_v35 }
 0xe3a   :  { %9360 = vmatprep.subr.bf16.mxu0 %v9359_v22 }
 0xe3c   :  { %3697 = vmatmul.mubr.f32.gmra.mrb[50].mxu0 %v12011_v5  ;;  %v6826_v5 = vld [vmem:[%s13318_s3 + $0x898] sm:$0xff] }
 0xe3d   :  { %9362 = vmatpush1.bf16.msra.mxu0 %v9361_v24  ;;  %3702 = vmatprep.mubr.f32.mxu0 %v10173_v17  ;;  %v9371_v54 = vpack.c.bf16 %v6826_v5, %v6824_v28 }
 0xe3e   :  { %9364 = vmatprep.subr.bf16.mxu0 %v9363_v48 }
 0xe40   :  { %3703 = vmatmul.mubr.f32.gmra.mrb[52].mxu0 %v12024_v15  ;;  %v6830_v15 = vld [vmem:[%s13318_s3 + $0x8b8] sm:$0xff] }
 0xe41   :  { %9366 = vmatpush1.bf16.msra.mxu0 %v9365_v25  ;;  %3708 = vmatprep.mubr.f32.mxu0 %v10173_v17  ;;  %v9375_v34 = vpack.c.bf16 %v6830_v15, %v6828_v32 }
 0xe42   :  { %9368 = vmatprep.subr.bf16.mxu0 %v9367_v26 }
 0xe44   :  { %3709 = vmatmul.mubr.f32.gmra.mrb[54].mxu0 %v12020_v61  ;;  %v6834_v61 = vld [vmem:[%s13318_s3 + $0x8d8] sm:$0xff] }
 0xe45   :  { %9370 = vmatpush1.bf16.msra.mxu0 %v9369_v29  ;;  %3897 = vmatprep.mubr.f32.mxu0 %v10173_v17  ;;  %v9379_v39 = vpack.c.bf16 %v6834_v61, %v6832_v37 }
 0xe46   :  { %9372 = vmatprep.subr.bf16.mxu0 %v9371_v54 }
 0xe49   :  { %9374 = vmatpush1.bf16.msra.mxu0 %v9373_v33  ;;  %v6865_v33 = vld [vmem:[%s13322_s7 + $0x2] ss:$0 sm:$0xff] }
 0xe4a   :  { %9376 = vmatprep.subr.bf16.mxu0 %v9375_v34 }
 0xe4d   :  { %9378 = vmatpush1.bf16.msra.mxu0 %v9377_v38 }
 0xe4e   :  { %9380 = vmatprep.subr.bf16.mxu0 %v9379_v39 }
 0xe51   :  { %9382 = vmatpush1.bf16.msra.mxu0 %v9381_v62 }
 0xe52   :  { %9384 = vmatprep.subr.bf16.mxu0 %v9383_v44 }
 0xe55   :  { %9386 = vmatpush1.bf16.msra.mxu0 %v9385_v47 }
 0xe58   :  { %3898 = vmatmul.mubr.f32.vlgmr.msra.gmra.mrb[48].mxu0 %v12017_v41  ;;  %v6861_v41 = vld [vmem:[%s13319_s4 + $0x228] sm:$0xff] }
 0xe59   :  { %3903 = vmatprep.mubr.f32.mxu0 %v10173_v17  ;;  %v9418_v11 = vpack.c.bf16 %v6861_v41, %v6860_v59 }
 0xe5b   :  { %9419 = vmatpush1.bf16.msra.mxu1 %v9418_v11 }
 0xe5c   :  { %3904 = vmatmul.mubr.f32.gmra.mrb[50].mxu0 %v12013_v8  ;;  %9420 = vmatprep.subr.bf16.mxu1 %v10174_v21  ;;  %v6862_v8 = vld [vmem:[%s13319_s4 + $0x230] sm:$0xff] }
 0xe5d   :  { %3909 = vmatprep.mubr.f32.mxu0 %v10173_v17 }
 0xe60   :  { %3910 = vmatmul.mubr.f32.gmra.mrb[52].mxu0 %v12026_v16 }
 0xe61   :  { %3915 = vmatprep.mubr.f32.mxu0 %v10173_v17 }
 0xe64   :  { %3916 = vmatmul.mubr.f32.gmra.mrb[54].mxu0 %v12022_v14  ;;  %v6863_v14 = vld [vmem:[%s13319_s4 + $0x238] sm:$0xff] }
 0xe65   :  { %v9421_v16 = vpack.c.bf16 %v6863_v14, %v6862_v8  ;;  %v6870_v14 = vld [vmem:[%s13320_s5 + $0x300] sm:$0xff] }
 0xe67   :  { %9422 = vmatpush1.bf16.msra.mxu1 %v9421_v16  ;;  %v6871_v16 = vld [vmem:[%s13320_s5 + $0x308] sm:$0xff] }
 0xf2b   :  { %v3899_v3 = vpop.f32.mrb[48].mxu0 }
 0xf2c   :  { %v3943_v56 = vadd.f32 %v3936_v0, %v3899_v3  ;;  %v3901_v9 = vpop.f32.mrb[49].mxu0 }
 0xf2d   :  { %v3944_v13 = vadd.f32 %v3940_v1, %v3901_v9  ;;  %v6873_v9 = vld [vmem:[%s13320_s5 + $0x318] sm:$0xff] }
 0xf2e   :  { %v3951_v46 = vmul.f32 0.2, %v3943_v56 }
 0xf2f   :  { %v3952_v50 = vmul.f32 0.2, %v3944_v13  ;;  %v3905_v18 = vpop.f32.mrb[50].mxu0 }
 0xf30   :  { %v3945_v49 = vadd.f32 %v3936_v0, %v3905_v18  ;;  %v3907_v19 = vpop.f32.mrb[51].mxu0  ;;  %v3959_v40 = vmax.f32 %v3943_v56, %v3951_v46  ;;  %v6872_v56 = vld [vmem:[%s13320_s5 + $0x310] sm:$0xff] }
 0xf31   :  { %v3960_v22 = vmax.f32 %v3944_v13, %v3952_v50  ;;  %v3946_v31 = vadd.f32 %v3940_v1, %v3907_v19  ;;  %v6888_v13 = vld [vmem:[%s13320_s5 + $0x390] sm:$0xff]  ;;  %v9427_v46 = vpack.c.bf16 %v6873_v9, %v6872_v56  ;;  %v6889_v50 = vld [vmem:[%s13320_s5 + $0x398] sm:$0xff]  ;;  %v6875_v19 = vld [vmem:[%s13320_s5 + $0x328] sm:$0xff] }
 0xf32   :  { %v3953_v55 = vmul.f32 0.2, %v3945_v49  ;;  %v9459_v18 = vpack.c.bf16 %v6889_v50, %v6888_v13 }
 0xf33   :  { %v3954_v23 = vmul.f32 0.2, %v3946_v31  ;;  %v3911_v24 = vpop.f32.mrb[52].mxu0  ;;  %6866 = vmatprep.mubr.msk.f32.mxu1 %vm115_vm0, %v3960_v22  ;;  %v6890_v22 = vld [vmem:[%s13320_s5 + $0x3a0] sm:$0xff] }
 0xf34   :  { %v3947_v48 = vadd.f32 %v3936_v0, %v3911_v24  ;;  %v3913_v20 = vpop.f32.mrb[53].mxu0  ;;  %4077 = vmatmul.mubr.f32.vlgmr.msra.gmra.mrb[60].mxu1 %v3959_v40  ;;  %v3961_v10 = vmax.f32 %v3945_v49, %v3953_v55  ;;  %v6874_v49 = vld [vmem:[%s13320_s5 + $0x320] sm:$0xff]  ;;  %v6891_v40 = vld [vmem:[%s13320_s5 + $0x3a8] sm:$0xff]  ;;  %v6877_v24 = vld [vmem:[%s13320_s5 + $0x338] sm:$0xff] }
 0xf35   :  { %v3962_v51 = vmax.f32 %v3946_v31, %v3954_v23  ;;  %v3948_v35 = vadd.f32 %v3940_v1, %v3913_v20  ;;  %v9431_v31 = vpack.c.bf16 %v6875_v19, %v6874_v49  ;;  %v9463_v55 = vpack.c.bf16 %v6891_v40, %v6890_v22  ;;  %v6876_v23 = vld [vmem:[%s13320_s5 + $0x330] sm:$0xff] }
 0xf36   :  { %v3955_v25 = vmul.f32 0.2, %v3947_v48  ;;  %v9435_v20 = vpack.c.bf16 %v6877_v24, %v6876_v23 }
 0xf37   :  { %v3956_v26 = vmul.f32 0.2, %v3948_v35  ;;  %v3917_v63 = vpop.f32.mrb[54].mxu0  ;;  %6867 = vmatprep.mubr.msk.f32.mxu1 %vm115_vm0, %v3962_v51  ;;  %v6893_v51 = vld [vmem:[%s13320_s5 + $0x3b8] sm:$0xff] }
 0xf38   :  { %v3949_v27 = vadd.f32 %v3936_v0, %v3917_v63  ;;  %v3919_v28 = vpop.f32.mrb[55].mxu0  ;;  %4082 = vmatmul.mubr.f32.gmra.mrb[62].mxu1 %v3961_v10  ;;  %v3963_v54 = vmax.f32 %v3947_v48, %v3955_v25  ;;  %v9423_v0 = vpack.c.bf16 %v6871_v16, %v6870_v14  ;;  %v6892_v48 = vld [vmem:[%s13320_s5 + $0x3b0] sm:$0xff]  ;;  %v6878_v10 = vld [vmem:[%s13320_s5 + $0x340] sm:$0xff]  ;;  %v6879_v25 = vld [vmem:[%s13320_s5 + $0x348] sm:$0xff] }
 0xf39   :  { %v3964_v5 = vmax.f32 %v3948_v35, %v3956_v26  ;;  %v3950_v29 = vadd.f32 %v3940_v1, %v3919_v28  ;;  %v6887_v1 = vld [vmem:[%s13320_s5 + $0x388] sm:$0xff]  ;;  %v9467_v35 = vpack.c.bf16 %v6893_v51, %v6892_v48  ;;  %v6894_v26 = vld [vmem:[%s13320_s5 + $0x3c0] sm:$0xff]  ;;  %v9439_v63 = vpack.c.bf16 %v6879_v25, %v6878_v10  ;;  %v6880_v28 = vld [vmem:[%s13320_s5 + $0x350] sm:$0xff] }
 0xf3a   :  { %v3957_v30 = vmul.f32 0.2, %v3949_v27  ;;  %v9455_v3 = vpack.c.bf16 %v6887_v1, %v6886_v12  ;;  %9424 = vmatprep.subr.bf16.mxu1 %v9423_v0 }
 0xf3b   :  { %v3958_v2 = vmul.f32 0.2, %v3950_v29  ;;  %6868 = vmatprep.mubr.msk.f32.mxu1 %vm115_vm0, %v3964_v5  ;;  %9426 = vmatpush3.bf16.msra.mxu1 %v9423_v0  ;;  %v6881_v5 = vld [vmem:[%s13320_s5 + $0x358] sm:$0xff] }
 0xf3c   :  { %4087 = vmatmul.mubr.f32.gmra.mrb[64].mxu1 %v3963_v54  ;;  %v3965_v15 = vmax.f32 %v3949_v27, %v3957_v30  ;;  %9456 = vmatprep.subr.bf16.mxu0 %v9455_v3  ;;  %v6895_v27 = vld [vmem:[%s13320_s5 + $0x3c8] sm:$0xff]  ;;  %v9443_v54 = vpack.c.bf16 %v6881_v5, %v6880_v28  ;;  %v6896_v30 = vld [vmem:[%s13320_s5 + $0x3d0] sm:$0xff] }
 0xf3d   :  { %v3966_v32 = vmax.f32 %v3950_v29, %v3958_v2  ;;  %9458 = vmatpush3.bf16.msra.mxu0 %v9455_v3  ;;  %9428 = vmatprep.subr.bf16.mxu1 %v9427_v46  ;;  %v9471_v29 = vpack.c.bf16 %v6895_v27, %v6894_v26  ;;  %v6897_v2 = vld [vmem:[%s13320_s5 + $0x3d8] sm:$0xff] }
 0xf3e   :  { %9460 = vmatprep.subr.bf16.mxu0 %v9459_v18 }
 0xf3f   :  { %6869 = vmatprep.mubr.msk.f32.mxu1 %vm115_vm0, %v3966_v32  ;;  %9430 = vmatpush3.bf16.msra.mxu1 %v9427_v46  ;;  %v9475_v32 = vpack.c.bf16 %v6897_v2, %v6896_v30 }
 0xf40   :  { %4092 = vmatmul.mubr.f32.gmra.mrb[66].mxu1 %v3965_v15  ;;  %9432 = vmatprep.subr.bf16.mxu1 %v9431_v31  ;;  %v6882_v15 = vld [vmem:[%s13320_s5 + $0x360] sm:$0xff] }
 0xf41   :  { %9462 = vmatpush3.bf16.msra.mxu0 %v9459_v18 }
 0xf42   :  { %9464 = vmatprep.subr.bf16.mxu0 %v9463_v55 }
 0xf43   :  { %9434 = vmatpush3.bf16.msra.mxu1 %v9431_v31 }
 0xf44   :  { %9436 = vmatprep.subr.bf16.mxu1 %v9435_v20 }
 0xf45   :  { %9466 = vmatpush3.bf16.msra.mxu0 %v9463_v55 }
 0xf46   :  { %9468 = vmatprep.subr.bf16.mxu0 %v9467_v35 }
 0xf47   :  { %9438 = vmatpush3.bf16.msra.mxu1 %v9435_v20 }
 0xf48   :  { %9440 = vmatprep.subr.bf16.mxu1 %v9439_v63 }
 0xf49   :  { %9470 = vmatpush3.bf16.msra.mxu0 %v9467_v35 }
 0xf4a   :  { %9472 = vmatprep.subr.bf16.mxu0 %v9471_v29 }
 0xf4b   :  { %9442 = vmatpush3.bf16.msra.mxu1 %v9439_v63 }
 0xf4c   :  { %9444 = vmatprep.subr.bf16.mxu1 %v9443_v54 }
 0xf4d   :  { %9474 = vmatpush3.bf16.msra.mxu0 %v9471_v29 }
 0xf4e   :  { %9476 = vmatprep.subr.bf16.mxu0 %v9475_v32 }
 0xf4f   :  { %9446 = vmatpush3.bf16.msra.mxu1 %v9443_v54 }
 0xf51   :  { %9478 = vmatpush3.bf16.msra.mxu0 %v9475_v32 }
0x1007   :  { %v4078_v34 = vpop.f32.mrb[60].mxu1 }
0x1008   :  { %v4079_v53 = vadd.f32 %v6865_v33, %v4078_v34  ;;  %v4080_v36 = vpop.f32.mrb[61].mxu1  ;;  %v6898_v34 = vld [vmem:[%s13320_s5 + $0x3e0] sm:$0xff] }
0x100a   :  { %v4097_v37 = vmul.f32 0.2, %v4079_v53 }
0x100b   :  { %v4083_v61 = vpop.f32.mrb[62].mxu1 }
0x100c   :  { %v12259_v38 = vmax.f32 %v4079_v53, %v4097_v37  ;;  %v4084_v39 = vadd.f32 %v6865_v33, %v4083_v61  ;;  %v4085_v42 = vpop.f32.mrb[63].mxu1  ;;  %v6899_v53 = vld [vmem:[%s13320_s5 + $0x3e8] sm:$0xff]  ;;  %v6884_v61 = vld [vmem:[%s13320_s5 + $0x370] sm:$0xff] }
0x100d   :  { %v9479_v37 = vpack.c.bf16 %v6899_v53, %v6898_v34  ;;  %v6900_v42 = vld [vmem:[%s13320_s5 + $0x3f0] sm:$0xff] }
0x100e   :  { %v4098_v57 = vmul.f32 0.2, %v4084_v39  ;;  %4105 = vmin.xlane.f32.xlu0 %v12259_v38 }
0x100f   :  { %v4088_v43 = vpop.f32.mrb[64].mxu1  ;;  %9480 = vmatprep.subr.bf16.mxu0 %v9479_v37 }
0x1010   :  { %v12262_v6 = vmax.f32 %v4084_v39, %v4098_v57  ;;  %v4089_v62 = vadd.f32 %v6865_v33, %v4088_v43  ;;  %v4090_v44 = vpop.f32.mrb[65].mxu1  ;;  %v6885_v39 = vld [vmem:[%s13320_s5 + $0x378] sm:$0xff]  ;;  %9482 = vmatpush3.bf16.msra.mxu0 %v9479_v37 }
0x1011   :  { %v6901_v57 = vld [vmem:[%s13320_s5 + $0x3f8] sm:$0xff]  ;;  %v9451_v43 = vpack.c.bf16 %v6885_v39, %v6884_v61  ;;  %v6918_v39 = vld [vmem:[%s13320_s5 + $0x400] sm:$0xff] }
0x1012   :  { %v4099_v45 = vmul.f32 0.2, %v4089_v62  ;;  %4122 = vmax.xlane.f32.xlu0 %v12259_v38  ;;  %4107 = vmin.xlane.f32.xlu1 %v12262_v6 }
0x1013   :  { %v4093_v52 = vpop.f32.mrb[66].mxu1 }
0x1014   :  { %v12266_v47 = vmax.f32 %v4089_v62, %v4099_v45  ;;  %v4094_v59 = vadd.f32 %v6865_v33, %v4093_v52  ;;  %v4095_v41 = vpop.f32.mrb[67].mxu1  ;;  %v6883_v33 = vld [vmem:[%s13320_s5 + $0x368] sm:$0xff]  ;;  %v9483_v62 = vpack.c.bf16 %v6901_v57, %v6900_v42 }
0x1015   :  { %v9447_v36 = vpack.c.bf16 %v6883_v33, %v6882_v15  ;;  %v6919_v42 = vld [vmem:[%s13320_s5 + $0x408] sm:$0xff] }
0x1016   :  { %v4100_v11 = vmul.f32 0.2, %v4094_v59  ;;  %4124 = vmax.xlane.f32.xlu1 %v12262_v6  ;;  %4109 = vmin.xlane.f32.xlu0 %v12266_v47  ;;  %v10100_v57 = vld [vmem:[%s13317_s2 + $0x48] sm:$0xff] }
0x1017   :  { %9448 = vmatprep.subr.bf16.mxu1 %v9447_v36  ;;  %9484 = vmatprep.subr.bf16.mxu0 %v9483_v62 }
0x1018   :  { %v12270_v8 = vmax.f32 %v4094_v59, %v4100_v11  ;;  %9450 = vmatpush3.bf16.msra.mxu1 %v9447_v36  ;;  %9486 = vmatpush3.bf16.msra.mxu0 %v9483_v62  ;;  %v9503_v62 = vpack.c.bf16 %v6919_v42, %v6918_v39 }
0x1019   :  { %9452 = vmatprep.subr.bf16.mxu1 %v9451_v43 }
0x101a   :  { %4126 = vmax.xlane.f32.xlu0 %v12266_v47  ;;  %4111 = vmin.xlane.f32.xlu1 %v12270_v8 }
0x101c   :  { %9454 = vmatpush3.bf16.msra.mxu1 %v9451_v43  ;;  %v10101_v43 = vld [vmem:[%s13317_s2 + $0x50] sm:$0xff] }
0x101e   :  { %4128 = vmax.xlane.f32.xlu1 %v12270_v8 }
0x109b   :  { %v4106_v44 = vpop.xlane.xlu0 %4105 }
0x109f   :  { %v4123_v45 = vpop.xlane.xlu0 %4122  ;;  %v4108_v52 = vpop.xlane.xlu1 %4107 }
0x10a0   :  { %v4113_v14 = vmin.f32 %v4106_v44, %v4108_v52  ;;  %v10102_v44 = vld [vmem:[%s13317_s2 + $0x58] sm:$0xff]  ;;  %v10104_v52 = vld [vmem:[%s13317_s2 + $0x68] sm:$0xff] }
0x10a3   :  { %v4125_v59 = vpop.xlane.xlu1 %4124  ;;  %v4110_v41 = vpop.xlane.xlu0 %4109 }
0x10a4   :  { %v4130_v3 = vmax.f32 %v4123_v45, %v4125_v59  ;;  %v10103_v45 = vld [vmem:[%s13317_s2 + $0x60] sm:$0xff]  ;;  %v10105_v59 = vld [vmem:[%s13317_s2 + $0x70] sm:$0xff] }
0x10a7   :  { %v4112_v11 = vpop.xlane.xlu1 %4111  ;;  %v4127_v0 = vpop.xlane.xlu0 %4126 }
0x10a8   :  { %v4114_v16 = vmin.f32 %v4110_v41, %v4112_v11  ;;  %v6920_v41 = vld [vmem:[%s13320_s5 + $0x410] sm:$0xff]  ;;  %v6921_v11 = vld [vmem:[%s13320_s5 + $0x418] sm:$0xff] }
0x10aa   :  { %v4115_v12 = vmin.f32 %v4113_v14, %v4114_v16  ;;  %v10106_v14 = vld [vmem:[%s13317_s2 + $0x78] sm:$0xff]  ;;  %v10107_v16 = vld [vmem:[%s13317_s2] sm:$0xff] }
0x10ab   :  { %v4129_v1 = vpop.xlane.xlu1 %4128 }
0x10ac   :  { %v4116_v56 = vrot.slane %v4115_v12, 4  ;;  %v4131_v9 = vmax.f32 %v4127_v0, %v4129_v1  ;;  %v6922_v0 = vld [vmem:[%s13320_s5 + $0x420] sm:$0xff]  ;;  %v6923_v1 = vld [vmem:[%s13320_s5 + $0x428] sm:$0xff] }
0x10ae   :  { %v4117_v13 = vmin.f32 %v4115_v12, %v4116_v56  ;;  %v4132_v46 = vmax.f32 %v4130_v3, %v4131_v9  ;;  %v9507_v12 = vpack.c.bf16 %v6921_v11, %v6920_v41  ;;  %v10108_v3 = vld [vmem:[%s13317_s2 + $0x8] sm:$0xff]  ;;  %v10109_v56 = vld [vmem:[%s13317_s2 + $0x10] sm:$0xff]  ;;  %v9511_v9 = vpack.c.bf16 %v6923_v1, %v6922_v0 }
0x10b0   :  { %v4118_v50 = vrot.slane %v4117_v13, 2  ;;  %v4133_v18 = vrot.slane %v4132_v46, 4 }
0x10b2   :  { %v4119_v49 = vmin.f32 %v4117_v13, %v4118_v50  ;;  %v4134_v19 = vmax.f32 %v4132_v46, %v4133_v18  ;;  %v6924_v13 = vld [vmem:[%s13320_s5 + $0x430] sm:$0xff]  ;;  %v6925_v46 = vld [vmem:[%s13320_s5 + $0x438] sm:$0xff]  ;;  %v10111_v18 = vld [vmem:[%s13317_s2 + $0x20] sm:$0xff] }
0x10b3   :  { %v10110_v50 = vld [vmem:[%s13317_s2 + $0x18] sm:$0xff] }
0x10b4   :  { %v4135_v22 = vrot.slane %v4134_v19, 2  ;;  %v4120_v31 = vrot.slane %v4119_v49, 1 }
0x10b6   :  { %v4136_v40 = vmax.f32 %v4134_v19, %v4135_v22  ;;  %v4121_v23 = vmin.f32 %v4119_v49, %v4120_v31  ;;  %v9515_v49 = vpack.c.bf16 %v6925_v46, %v6924_v13  ;;  %v6926_v19 = vld [vmem:[%s13320_s5 + $0x440] sm:$0xff]  ;;  %v6927_v22 = vld [vmem:[%s13320_s5 + $0x448] sm:$0xff] }
0x10b7   :  { %v10112_v31 = vld [vmem:[%s13317_s2 + $0x28] sm:$0xff] }
0x10b8   :  { %v4137_v55 = vrot.slane %v4136_v40, 1 }
0x10ba   :  { %v4138_v24 = vmax.f32 %v4136_v40, %v4137_v55  ;;  %v10113_v40 = vld [vmem:[%s13317_s2 + $0x30] sm:$0xff]  ;;  %v9519_v55 = vpack.c.bf16 %v6927_v22, %v6926_v19 }
0x10bc   :  { %v4139_v48 = vsub.f32 %v4138_v24, %v4121_v23  ;;  %v6929_v24 = vld [vmem:[%s13320_s5 + $0x458] sm:$0xff] }
0x10be   :  { %10014 = vrcp.f32 %v4139_v48  ;;  %v10114_v48 = vld [vmem:[%s13317_s2 + $0x38] sm:$0xff] }
0x10c8   :  { %v10015_v20 = vpop.eup %10014 }
0x10c9   :  { %v4141_v51 = vmul.f32 %v10015_v20, %v10869_v7 }
0x10cb   :  { %v4142_v35 = vmul.f32 %v4141_v51, %v4121_v23  ;;  %v4144_v25 = vmul.f32 %v4141_v51, %v12259_v38  ;;  %v4145_v26 = vmul.f32 %v4141_v51, %v12262_v6  ;;  %v4146_v28 = vmul.f32 %v4141_v51, %v12266_v47  ;;  %v10098_v47 = vld [vmem:[%s13317_s2 + $0x40] sm:$0xff]  ;;  %v6928_v23 = vld [vmem:[%s13320_s5 + $0x450] sm:$0xff] }
0x10cc   :  { %v4147_v38 = vmul.f32 %v4141_v51, %v12270_v8  ;;  %v10099_v8 = vld [vmem:[%s13316_s1] sm:$0xff]  ;;  %v9523_v20 = vpack.c.bf16 %v6929_v24, %v6928_v23 }
0x10cd   :  { %v4143_v10 = vsub.f32 %v10866_v4, %v4142_v35  ;;  %v6930_v51 = vld [vmem:[%s13320_s5 + $0x460] sm:$0xff]  ;;  %v6931_v35 = vld [vmem:[%s13320_s5 + $0x468] sm:$0xff] }
0x10cf   :  { %v12375_v63 = vadd.f32 %v4144_v25, %v4143_v10  ;;  %v12377_v27 = vadd.f32 %v4145_v26, %v4143_v10  ;;  %v12382_v5 = vadd.f32 %v4146_v28, %v4143_v10  ;;  %v12389_v6 = vadd.f32 %v4147_v38, %v4143_v10  ;;  %v6932_v25 = vld [vmem:[%s13320_s5 + $0x470] sm:$0xff]  ;;  %v6933_v26 = vld [vmem:[%s13320_s5 + $0x478] sm:$0xff]  ;;  %v10115_v28 = vld [vmem:[%s13317_s2 + $0x80] sm:$0xff] }
0x10d0   :  { %v9527_v10 = vpack.c.bf16 %v6931_v35, %v6930_v51 }
0x10d1   :  { %8261 = vmatprep.mubr.f32.mxu1 %v12375_v63  ;;  %8299 = vmatprep.mubr.f32.mxu0 %v12375_v63 }
0x10d2   :  { %8262 = vmatmul.mubr.f32.vlgmr.msra.gmra.mrb[68].mxu1 %v12377_v27  ;;  %8300 = vmatmul.mubr.f32.vlgmr.msra.gmra.mrb[56].mxu0 %v12377_v27 }
0x10d3   :  { %8264 = vmatprep.mubr.f32.mxu1 %v12382_v5  ;;  %8302 = vmatprep.mubr.f32.mxu0 %v12382_v5 }
0x10d6   :  { %8265 = vmatmul.mubr.f32.gmra.mrb[70].mxu1 %v12389_v6  ;;  %8303 = vmatmul.mubr.f32.gmra.mrb[58].mxu0 %v12389_v6 }
0x10d7   :  { %8313 = vmatprep.mubr.msk.f32.mxu1 %vm1230_vm1, %v10098_v47  ;;  %8419 = vmatprep.mubr.msk.f32.mxu0 %vm115_vm0, %v10099_v8 }
0x11a5   :  { %v8263_v29 = vpop.f32.mrb[68].mxu1  ;;  %v8301_v54 = vpop.f32.mrb[56].mxu0 }
0x11a6   :  { %v4235_v30 = vpop.f32.mrb[69].mxu1  ;;  %v4337_v2 = vpop.f32.mrb[57].mxu0 }
0x11a7   :  { %v9495_v32 = vpack.c.bf16 %v8263_v29, %v4235_v30  ;;  %v9487_v15 = vpack.c.bf16 %v8301_v54, %v4337_v2  ;;  %v10119_v2 = vld [vmem:[%s13317_s2 + $0xa0] sm:$0xff] }
0x11a9   :  { %v8266_v33 = vpop.f32.mrb[70].mxu1  ;;  %v8304_v34 = vpop.f32.mrb[58].mxu0  ;;  %9488 = vmatprep.subr.bf16.mxu1 %v9487_v15 }
0x11aa   :  { %v4245_v53 = vpop.f32.mrb[71].mxu1  ;;  %v4347_v36 = vpop.f32.mrb[59].mxu0  ;;  %9490 = vmatpush3.bf16.msra.mxu1 %v9487_v15  ;;  %v10121_v15 = vld [vmem:[%s13317_s2 + $0xb0] sm:$0xff] }
0x11ab   :  { %v9499_v37 = vpack.c.bf16 %v8266_v33, %v4245_v53  ;;  %v9491_v61 = vpack.c.bf16 %v8304_v34, %v4347_v36  ;;  %v10122_v33 = vld [vmem:[%s13317_s2 + $0xb8] sm:$0xff]  ;;  %v10123_v34 = vld [vmem:[%s13316_s1 + $0x40] sm:$0xff]  ;;  %v4782_v53 = vstv %s6942_s29 }
0x11ad   :  { %9492 = vmatprep.subr.bf16.mxu1 %v9491_v61 }
0x11ae   :  { %9494 = vmatpush3.bf16.msra.mxu1 %v9491_v61 }
0x11af   :  { %9496 = vmatprep.subr.bf16.mxu1 %v9495_v32 }
0x11b1   :  { %8314 = vmatmul.mubr.msk.f32.vlgmr.msra.gmra.mrb[72].mxu1 %vm1230_vm1, %v10100_v57 }
0x11b2   :  { %9498 = vmatpush3.bf16.msra.mxu1 %v9495_v32  ;;  %8316 = vmatprep.mubr.msk.f32.mxu1 %vm1230_vm1, %v10101_v43  ;;  %v10120_v32 = vld [vmem:[%s13317_s2 + $0xa8] sm:$0xff] }
0x11b3   :  { %9500 = vmatprep.subr.bf16.mxu1 %v9499_v37 }
0x11b5   :  { %8317 = vmatmul.mubr.msk.f32.gmra.mrb[74].mxu1 %vm1230_vm1, %v10102_v44 }
0x11b6   :  { %9502 = vmatpush3.bf16.msra.mxu1 %v9499_v37  ;;  %8319 = vmatprep.mubr.msk.f32.mxu1 %vm1230_vm1, %v10103_v45 }
0x11b7   :  { %9504 = vmatprep.subr.bf16.mxu1 %v9503_v62 }
0x11b9   :  { %8320 = vmatmul.mubr.msk.f32.gmra.mrb[76].mxu1 %vm1230_vm1, %v10104_v52 }
0x11ba   :  { %8322 = vmatprep.mubr.msk.f32.mxu1 %vm1230_vm1, %v10105_v59 }
0x11bd   :  { %8323 = vmatmul.mubr.msk.f32.gmra.mrb[78].mxu1 %vm1230_vm1, %v10106_v14 }
0x11be   :  { %8333 = vmatprep.mubr.msk.f32.mxu1 %vm1230_vm1, %v10107_v16 }
0x11c1   :  { %8334 = vmatmul.mubr.msk.f32.vlgmr.msra.gmra.mrb[72].mxu1 %vm1230_vm1, %v10108_v3 }
0x11c2   :  { %9506 = vmatpush3.bf16.msra.mxu1 %v9503_v62  ;;  %8336 = vmatprep.mubr.msk.f32.mxu1 %vm1230_vm1, %v10109_v56 }
0x11c3   :  { %9508 = vmatprep.subr.bf16.mxu1 %v9507_v12 }
0x11c5   :  { %8337 = vmatmul.mubr.msk.f32.gmra.mrb[74].mxu1 %vm1230_vm1, %v10110_v50 }
0x11c6   :  { %9510 = vmatpush3.bf16.msra.mxu1 %v9507_v12  ;;  %8339 = vmatprep.mubr.msk.f32.mxu1 %vm1230_vm1, %v10111_v18 }
0x11c7   :  { %9512 = vmatprep.subr.bf16.mxu1 %v9511_v9 }
0x11c9   :  { %8340 = vmatmul.mubr.msk.f32.gmra.mrb[76].mxu1 %vm1230_vm1, %v10112_v31 }
0x11ca   :  { %9514 = vmatpush3.bf16.msra.mxu1 %v9511_v9  ;;  %8342 = vmatprep.mubr.msk.f32.mxu1 %vm1230_vm1, %v10113_v40 }
0x11cb   :  { %9516 = vmatprep.subr.bf16.mxu1 %v9515_v49 }
0x11cd   :  { %8343 = vmatmul.mubr.msk.f32.gmra.mrb[78].mxu1 %vm1230_vm1, %v10114_v48 }
0x11ce   :  { %9518 = vmatpush3.bf16.msra.mxu1 %v9515_v49  ;;  %8377 = vmatprep.mubr.f32.mxu1 %v12375_v63  ;;  %v9531_v63 = vpack.c.bf16 %v6933_v26, %v6932_v25 }
0x11cf   :  { %9520 = vmatprep.subr.bf16.mxu1 %v9519_v55 }
0x11d2   :  { %9522 = vmatpush3.bf16.msra.mxu1 %v9519_v55 }
0x11d3   :  { %9524 = vmatprep.subr.bf16.mxu1 %v9523_v20 }
0x11d6   :  { %9526 = vmatpush3.bf16.msra.mxu1 %v9523_v20 }
0x11d7   :  { %9528 = vmatprep.subr.bf16.mxu1 %v9527_v10 }
0x11da   :  { %9530 = vmatpush3.bf16.msra.mxu1 %v9527_v10 }
0x11db   :  { %9532 = vmatprep.subr.bf16.mxu1 %v9531_v63 }
0x11de   :  { %9534 = vmatpush3.bf16.msra.mxu1 %v9531_v63 }
0x11e1   :  { %8378 = vmatmul.mubr.f32.vlgmr.msra.gmra.mrb[80].mxu1 %v12377_v27  ;;  %v10116_v27 = vld [vmem:[%s13317_s2 + $0x88] sm:$0xff] }
0x11e2   :  { %8380 = vmatprep.mubr.f32.mxu1 %v12382_v5  ;;  %v10117_v5 = vld [vmem:[%s13317_s2 + $0x90] sm:$0xff] }
0x11e5   :  { %8381 = vmatmul.mubr.f32.gmra.mrb[82].mxu1 %v12389_v6  ;;  %v10118_v6 = vld [vmem:[%s13317_s2 + $0x98] sm:$0xff] }
0x11e6   :  { %8391 = vmatprep.mubr.msk.f32.mxu1 %vm1230_vm1, %v10115_v28 }
0x12b4   :  { %v8379_v38 = vpop.f32.mrb[80].mxu1 }
0x12b5   :  { %v4649_v47 = vpop.f32.mrb[81].mxu1 }
0x12b6   :  { %v9535_v8 = vpack.c.bf16 %v8379_v38, %v4649_v47 }
0x12b8   :  { %v8382_v29 = vpop.f32.mrb[82].mxu1  ;;  %9536 = vmatprep.subr.bf16.mxu1 %v9535_v8 }
0x12b9   :  { %v4659_v54 = vpop.f32.mrb[83].mxu1  ;;  %9538 = vmatpush3.bf16.msra.mxu1 %v9535_v8 }
0x12ba   :  { %v9539_v30 = vpack.c.bf16 %v8382_v29, %v4659_v54 }
0x12bc   :  { %9540 = vmatprep.subr.bf16.mxu1 %v9539_v30 }
0x12bd   :  { %9542 = vmatpush3.bf16.msra.mxu1 %v9539_v30 }
0x12c0   :  { %8392 = vmatmul.mubr.msk.f32.vlgmr.msra.gmra.mrb[72].mxu1 %vm1230_vm1, %v10116_v27 }
0x12c1   :  { %8394 = vmatprep.mubr.msk.f32.mxu1 %vm1230_vm1, %v10117_v5 }
0x12c4   :  { %8395 = vmatmul.mubr.msk.f32.gmra.mrb[74].mxu1 %vm1230_vm1, %v10118_v6 }
0x12c5   :  { %8397 = vmatprep.mubr.msk.f32.mxu1 %vm1230_vm1, %v10119_v2  ;;  %v10124_v2 = vld [vmem:[%s13316_s1 + $0x8] sm:$0xff] }
0x12c8   :  { %8398 = vmatmul.mubr.msk.f32.gmra.mrb[76].mxu1 %vm1230_vm1, %v10120_v32  ;;  %v10125_v32 = vld [vmem:[%s13316_s1 + $0x48] sm:$0xff] }
0x12c9   :  { %8400 = vmatprep.mubr.msk.f32.mxu1 %vm1230_vm1, %v10121_v15  ;;  %v10126_v15 = vld [vmem:[%s13316_s1 + $0x10] sm:$0xff] }
0x12cc   :  { %8401 = vmatmul.mubr.msk.f32.gmra.mrb[78].mxu1 %vm1230_vm1, %v10122_v33  ;;  %v10127_v33 = vld [vmem:[%s13316_s1 + $0x50] sm:$0xff] }
0x12cd   :  { %8463 = vmatprep.mubr.msk.f32.mxu1 %vm115_vm0, %v10123_v34  ;;  %v10128_v34 = vld [vmem:[%s13316_s1 + $0x18] sm:$0xff] }
0x1393   :  { %v8393_v36 = vpop.f32.mrb[72].mxu1 }
0x1394   :  { %v4784_v37 = vadd.f32 %v8393_v36, %v4782_v53  ;;  %v4734_v61 = vpop.f32.mrb[73].mxu1  ;;  %v10130_v36 = vld [vmem:[%s13316_s1 + $0x20] sm:$0xff] }
0x1395   :  { %v4783_v39 = vadd.f32 %v4782_v53, %v4734_v61  ;;  %v6986_v61 = vld [vmem:[%s13318_s3 + $0xa18] sm:$0xff] }
0x1396   :  { %v4792_v42 = vmul.f32 0.5, %v4784_v37  ;;  %v6984_v37 = vld [vmem:[%s13318_s3 + $0xa08] sm:$0xff] }
0x1397   :  { %v4791_v57 = vmul.f32 0.5, %v4783_v39  ;;  %v8396_v43 = vpop.f32.mrb[74].mxu1  ;;  %v9575_v39 = vpack.c.bf16 %v6986_v61, %v6984_v37  ;;  %v7055_v37 = vld [vmem:[%s13319_s4 + $0x258] sm:$0xff] }
0x1398   :  { %10016 = vtanh.f32 %v4792_v42  ;;  %v4786_v62 = vadd.f32 %v8396_v43, %v4782_v53  ;;  %v4744_v44 = vpop.f32.mrb[75].mxu1  ;;  %v6983_v42 = vld [vmem:[%s13318_s3 + $0xa00] sm:$0xff]  ;;  %v6988_v43 = vld [vmem:[%s13318_s3 + $0xa28] sm:$0xff] }
0x1399   :  { %10018 = vtanh.f32 %v4791_v57  ;;  %v4785_v45 = vadd.f32 %v4782_v53, %v4744_v44  ;;  %v6985_v57 = vld [vmem:[%s13318_s3 + $0xa10] sm:$0xff] }
0x139a   :  { %v4794_v52 = vmul.f32 0.5, %v4786_v62  ;;  %v6990_v62 = vld [vmem:[%s13318_s3 + $0xa38] sm:$0xff]  ;;  %v9577_v44 = vpack.c.bf16 %v6985_v57, %v6983_v42  ;;  %v7057_v42 = vld [vmem:[%s13319_s4 + $0x268] sm:$0xff] }
0x139b   :  { %v4793_v59 = vmul.f32 0.5, %v4785_v45  ;;  %v8399_v41 = vpop.f32.mrb[76].mxu1  ;;  %v9579_v45 = vpack.c.bf16 %v6990_v62, %v6988_v43  ;;  %v7058_v43 = vld [vmem:[%s13319_s4 + $0x270] sm:$0xff]  ;;  %v7059_v62 = vld [vmem:[%s13319_s4 + $0x278] sm:$0xff] }
0x139c   :  { %10020 = vtanh.f32 %v4794_v52  ;;  %v4788_v11 = vadd.f32 %v8399_v41, %v4782_v53  ;;  %v4754_v14 = vpop.f32.mrb[77].mxu1  ;;  %v6987_v52 = vld [vmem:[%s13318_s3 + $0xa20] sm:$0xff]  ;;  %v6992_v41 = vld [vmem:[%s13318_s3 + $0xa48] sm:$0xff] }
0x139d   :  { %10022 = vtanh.f32 %v4793_v59  ;;  %v4787_v16 = vadd.f32 %v4782_v53, %v4754_v14  ;;  %v6989_v59 = vld [vmem:[%s13318_s3 + $0xa30] sm:$0xff]  ;;  %v10131_v14 = vld [vmem:[%s13316_s1 + $0x28] sm:$0xff] }
0x139e   :  { %v4796_v12 = vmul.f32 0.5, %v4788_v11  ;;  %v6994_v11 = vld [vmem:[%s13318_s3 + $0xa58] sm:$0xff] }
0x139f   :  { %v4795_v0 = vmul.f32 0.5, %v4787_v16  ;;  %v8402_v1 = vpop.f32.mrb[78].mxu1  ;;  %v10132_v16 = vld [vmem:[%s13316_s1 + $0x30] sm:$0xff] }
0x13a0   :  { %10024 = vtanh.f32 %v4796_v12  ;;  %v4790_v3 = vadd.f32 %v8402_v1, %v4782_v53  ;;  %v4764_v56 = vpop.f32.mrb[79].mxu1  ;;  %v9581_v12 = vpack.c.bf16 %v6989_v59, %v6987_v52  ;;  %v6991_v1 = vld [vmem:[%s13318_s3 + $0xa40] sm:$0xff]  ;;  %v7061_v52 = vld [vmem:[%s13319_s4 + $0x288] sm:$0xff] }
0x13a1   :  { %10026 = vtanh.f32 %v4795_v0  ;;  %v4789_v9 = vadd.f32 %v4782_v53, %v4764_v56  ;;  %v10129_v53 = vld [vmem:[%s13316_s1 + $0x58] sm:$0xff]  ;;  %v9583_v0 = vpack.c.bf16 %v6994_v11, %v6992_v41  ;;  %v6996_v56 = vld [vmem:[%s13318_s3 + $0xa68] sm:$0xff]  ;;  %v7062_v41 = vld [vmem:[%s13319_s4 + $0x290] sm:$0xff] }
0x13a2   :  { %v10017_v13 = vpop.eup %10016  ;;  %v4798_v46 = vmul.f32 0.5, %v4790_v3  ;;  %v6993_v3 = vld [vmem:[%s13318_s3 + $0xa50] sm:$0xff]  ;;  %v7063_v11 = vld [vmem:[%s13319_s4 + $0x298] sm:$0xff] }
0x13a3   :  { %v10019_v50 = vpop.eup %10018  ;;  %v4808_v18 = vadd.f32 1.0, %v10017_v13  ;;  %v4797_v49 = vmul.f32 0.5, %v4789_v9  ;;  %v6998_v9 = vld [vmem:[%s13318_s3 + $0xa78] sm:$0xff] }
0x13a4   :  { %v4807_v19 = vadd.f32 1.0, %v10019_v50  ;;  %10028 = vtanh.f32 %v4798_v46  ;;  %v10133_v13 = vld [vmem:[%s13316_s1 + $0x38] sm:$0xff]  ;;  %v9585_v46 = vpack.c.bf16 %v6993_v3, %v6991_v1  ;;  %v9587_v50 = vpack.c.bf16 %v6998_v9, %v6996_v56  ;;  %v7066_v1 = vld [vmem:[%s13319_s4 + $0x2b0] sm:$0xff]  ;;  %v7068_v9 = vld [vmem:[%s13319_s4 + $0x2c0] sm:$0xff] }
0x13a5   :  { %v4816_v22 = vmul.f32 0.5, %v4808_v18  ;;  %10030 = vtanh.f32 %v4797_v49  ;;  %v6995_v18 = vld [vmem:[%s13318_s3 + $0xa60] sm:$0xff]  ;;  %v6997_v49 = vld [vmem:[%s13318_s3 + $0xa70] sm:$0xff]  ;;  %v7067_v3 = vld [vmem:[%s13319_s4 + $0x2b8] sm:$0xff] }
0x13a6   :  { %v10021_v31 = vpop.eup %10020  ;;  %v4815_v40 = vmul.f32 0.5, %v4807_v19  ;;  %v9589_v19 = vpack.c.bf16 %v6997_v49, %v6995_v18  ;;  %v9709_v56 = vpack.c.bf16 %v7067_v3, %v7066_v1  ;;  %v7071_v18 = vld [vmem:[%s13319_s4 + $0x2d8] sm:$0xff]  ;;  %v6973_v1 = vld [vmem:[%s13318_s3 + $0x9d0] sm:$0xff]  ;;  %v6976_v3 = vld [vmem:[%s13318_s3 + $0x9e8] sm:$0xff] }
0x13a7   :  { %v10023_v55 = vpop.eup %10022  ;;  %v4810_v23 = vadd.f32 1.0, %v10021_v31  ;;  %v7002_v31 = vld [vmem:[%s13318_s3 + $0xa98] sm:$0xff] }
0x13a8   :  { %v9543_v24 = vpack.c.bf16 %v4816_v22, %v4815_v40  ;;  %v4809_v48 = vadd.f32 1.0, %v10023_v55  ;;  %v7000_v22 = vld [vmem:[%s13318_s3 + $0xa88] sm:$0xff]  ;;  %v6999_v55 = vld [vmem:[%s13318_s3 + $0xa80] sm:$0xff] }
0x13a9   :  { %v4818_v20 = vmul.f32 0.5, %v4810_v23  ;;  %v9591_v40 = vpack.c.bf16 %v7002_v31, %v7000_v22  ;;  %v7001_v23 = vld [vmem:[%s13318_s3 + $0xa90] sm:$0xff] }
0x13aa   :  { %v10025_v51 = vpop.eup %10024  ;;  %v4817_v35 = vmul.f32 0.5, %v4809_v48  ;;  %9544 = vmatprep.subr.bf16.mxu0 %v9543_v24  ;;  %9640 = vmatprep.subr.bf16.mxu1 %v9543_v24  ;;  %v7004_v48 = vld [vmem:[%s13318_s3 + $0xaa8] sm:$0xff] }
0x13ab   :  { %v10027_v10 = vpop.eup %10026  ;;  %v4812_v25 = vadd.f32 1.0, %v10025_v51  ;;  %9546 = vmatpush3.bf16.msra.mxu0 %v9543_v24  ;;  %9642 = vmatpush3.bf16.msra.mxu1 %v9543_v24  ;;  %v7003_v51 = vld [vmem:[%s13318_s3 + $0xaa0] sm:$0xff] }
0x13ac   :  { %v9547_v26 = vpack.c.bf16 %v4818_v20, %v4817_v35  ;;  %v4811_v63 = vadd.f32 1.0, %v10027_v10  ;;  %v7006_v20 = vld [vmem:[%s13318_s3 + $0xab8] sm:$0xff]  ;;  %v7005_v10 = vld [vmem:[%s13318_s3 + $0xab0] sm:$0xff] }
0x13ad   :  { %v4820_v28 = vmul.f32 0.5, %v4812_v25  ;;  %v9595_v35 = vpack.c.bf16 %v7006_v20, %v7004_v48  ;;  %v7008_v25 = vld [vmem:[%s13318_s3 + $0xac8] sm:$0xff]  ;;  %v6947_v20 = vld [vmem:[%s13318_s3 + $0x900] sm:$0xff] }
0x13ae   :  { %v10029_v38 = vpop.eup %10028  ;;  %v4819_v47 = vmul.f32 0.5, %v4811_v63  ;;  %9548 = vmatprep.subr.bf16.mxu0 %v9547_v26  ;;  %9644 = vmatprep.subr.bf16.mxu1 %v9547_v26  ;;  %v9597_v63 = vpack.c.bf16 %v7005_v10, %v7003_v51  ;;  %v6949_v51 = vld [vmem:[%s13318_s3 + $0x910] sm:$0xff]  ;;  %v6954_v10 = vld [vmem:[%s13318_s3 + $0x938] sm:$0xff] }
0x13af   :  { %v10031_v8 = vpop.eup %10030  ;;  %v4814_v29 = vadd.f32 1.0, %v10029_v38  ;;  %9550 = vmatpush3.bf16.msra.mxu0 %v9547_v26  ;;  %9646 = vmatpush3.bf16.msra.mxu1 %v9547_v26  ;;  %v7007_v38 = vld [vmem:[%s13318_s3 + $0xac0] sm:$0xff] }
0x13b0   :  { %v9551_v54 = vpack.c.bf16 %v4820_v28, %v4819_v47  ;;  %v4813_v30 = vadd.f32 1.0, %v10031_v8  ;;  %v7009_v47 = vld [vmem:[%s13318_s3 + $0xad0] sm:$0xff]  ;;  %v7012_v8 = vld [vmem:[%s13318_s3 + $0xae8] sm:$0xff] }
0x13b1   :  { %v4822_v27 = vmul.f32 0.5, %v4814_v29  ;;  %v7014_v29 = vld [vmem:[%s13318_s3 + $0xaf8] sm:$0xff] }
0x13b2   :  { %v4821_v5 = vmul.f32 0.5, %v4813_v30  ;;  %9552 = vmatprep.subr.bf16.mxu0 %v9551_v54  ;;  %9648 = vmatprep.subr.bf16.mxu1 %v9551_v54  ;;  %v9603_v30 = vpack.c.bf16 %v7014_v29, %v7012_v8  ;;  %v6956_v8 = vld [vmem:[%s13318_s3 + $0x948] sm:$0xff]  ;;  %v6958_v29 = vld [vmem:[%s13318_s3 + $0x958] sm:$0xff] }
0x13b3   :  { %9554 = vmatpush3.bf16.msra.mxu0 %v9551_v54  ;;  %9650 = vmatpush3.bf16.msra.mxu1 %v9551_v54 }
0x13b4   :  { %v9555_v6 = vpack.c.bf16 %v4822_v27, %v4821_v5  ;;  %v7011_v27 = vld [vmem:[%s13318_s3 + $0xae0] sm:$0xff]  ;;  %v7013_v5 = vld [vmem:[%s13318_s3 + $0xaf0] sm:$0xff] }
0x13b6   :  { %9556 = vmatprep.subr.bf16.mxu0 %v9555_v6  ;;  %9652 = vmatprep.subr.bf16.mxu1 %v9555_v6 }
0x13b7   :  { %9558 = vmatpush3.bf16.msra.mxu0 %v9555_v6  ;;  %9654 = vmatpush3.bf16.msra.mxu1 %v9555_v6 }
0x13b8   :  { %9560 = vmatprep.subr.bf16.mxu0 %v9543_v24  ;;  %9687 = vmatprep.subr.bf16.mxu1 %v10174_v21 }
0x13ba   :  { %8420 = vmatmul.mubr.msk.f32.vlgmr.msra.gmra.mrb[60].mxu0 %vm115_vm0, %v10124_v2  ;;  %8464 = vmatmul.mubr.msk.f32.vlgmr.msra.gmra.mrb[84].mxu1 %vm115_vm0, %v10125_v32  ;;  %v6948_v2 = vld [vmem:[%s13318_s3 + $0x908] sm:$0xff]  ;;  %v6950_v32 = vld [vmem:[%s13318_s3 + $0x918] sm:$0xff] }
0x13bb   :  { %9562 = vmatpush3.bf16.msra.mxu0 %v9543_v24  ;;  %8422 = vmatprep.mubr.msk.f32.mxu0 %vm115_vm0, %v10126_v15  ;;  %v9593_v24 = vpack.c.bf16 %v7001_v23, %v6999_v55  ;;  %v9607_v15 = vpack.c.bf16 %v6950_v32, %v6948_v2  ;;  %v6960_v2 = vld [vmem:[%s13318_s3 + $0x968] sm:$0xff]  ;;  %v6962_v32 = vld [vmem:[%s13318_s3 + $0x978] sm:$0xff] }
0x13bc   :  { %9564 = vmatprep.subr.bf16.mxu0 %v9547_v26  ;;  %8466 = vmatprep.mubr.msk.f32.mxu1 %vm115_vm0, %v10127_v33  ;;  %v7052_v33 = vld [vmem:[%s13319_s4 + $0x240] sm:$0xff] }
0x13be   :  { %8423 = vmatmul.mubr.msk.f32.gmra.mrb[62].mxu0 %vm115_vm0, %v10128_v34  ;;  %8467 = vmatmul.mubr.msk.f32.gmra.mrb[86].mxu1 %vm115_vm0, %v10129_v53  ;;  %v7053_v34 = vld [vmem:[%s13319_s4 + $0x248] sm:$0xff]  ;;  %v7054_v53 = vld [vmem:[%s13319_s4 + $0x250] sm:$0xff] }
0x13bf   :  { %9566 = vmatpush3.bf16.msra.mxu0 %v9547_v26  ;;  %8441 = vmatprep.mubr.msk.f32.mxu0 %vm115_vm0, %v10130_v36  ;;  %v7010_v26 = vld [vmem:[%s13318_s3 + $0xad8] sm:$0xff]  ;;  %v9688_v36 = vpack.c.bf16 %v7053_v34, %v7052_v33  ;;  %v9691_v61 = vpack.c.bf16 %v7055_v37, %v7054_v53  ;;  %v9619_v34 = vpack.c.bf16 %v6962_v32, %v6960_v2  ;;  %v6959_v53 = vld [vmem:[%s13318_s3 + $0x960] sm:$0xff]  ;;  %v6964_v37 = vld [vmem:[%s13318_s3 + $0x988] sm:$0xff] }
0x13c0   :  { %9568 = vmatprep.subr.bf16.mxu0 %v9551_v54  ;;  %v9599_v28 = vpack.c.bf16 %v7010_v26, %v7008_v25  ;;  %v9609_v25 = vpack.c.bf16 %v6949_v51, %v6947_v20 }
0x13c1   :  { %9689 = vmatpush1.bf16.msra.mxu1 %v9688_v36  ;;  %v6961_v36 = vld [vmem:[%s13318_s3 + $0x970] sm:$0xff] }
0x13c2   :  { %9690 = vmatprep.subr.bf16.mxu1 %v10174_v21 }
0x13c3   :  { %9570 = vmatpush3.bf16.msra.mxu0 %v9551_v54  ;;  %v9601_v54 = vpack.c.bf16 %v7009_v47, %v7007_v38  ;;  %v6953_v38 = vld [vmem:[%s13318_s3 + $0x930] sm:$0xff] }
0x13c4   :  { %9572 = vmatprep.subr.bf16.mxu0 %v9555_v6 }
0x13c5   :  { %9692 = vmatpush1.bf16.msra.mxu1 %v9691_v61  ;;  %v6966_v61 = vld [vmem:[%s13318_s3 + $0x998] sm:$0xff] }
0x13c6   :  { %9693 = vmatprep.subr.bf16.mxu1 %v10174_v21 }
0x13c7   :  { %9574 = vmatpush3.bf16.msra.mxu0 %v9555_v6  ;;  %v9605_v6 = vpack.c.bf16 %v7013_v5, %v7011_v27  ;;  %v6955_v27 = vld [vmem:[%s13318_s3 + $0x940] sm:$0xff]  ;;  %v6957_v5 = vld [vmem:[%s13318_s3 + $0x950] sm:$0xff] }
0x13c8   :  { %9576 = vmatprep.subr.bf16.mxu0 %v9575_v39  ;;  %v7056_v39 = vld [vmem:[%s13319_s4 + $0x260] sm:$0xff]  ;;  %v9617_v33 = vpack.c.bf16 %v6957_v5, %v6955_v27  ;;  %v7029_v5 = vld [vmem:[%s13318_s3 + $0xb50] sm:$0xff] }
0x13c9   :  { %v9694_v57 = vpack.c.bf16 %v7057_v42, %v7056_v39  ;;  %v9621_v39 = vpack.c.bf16 %v6961_v36, %v6959_v53  ;;  %v9623_v42 = vpack.c.bf16 %v6966_v61, %v6964_v37  ;;  %v7027_v27 = vld [vmem:[%s13318_s3 + $0xb40] sm:$0xff]  ;;  %v7037_v61 = vld [vmem:[%s13318_s3 + $0xb90] sm:$0xff] }
0x13ca   :  { %8442 = vmatmul.mubr.msk.f32.vlgmr.msra.gmra.mrb[64].mxu0 %vm115_vm0, %v10131_v14  ;;  %v9703_v14 = vpack.c.bf16 %v7063_v11, %v7062_v41  ;;  %v6969_v41 = vld [vmem:[%s13318_s3 + $0x9b0] sm:$0xff]  ;;  %v6972_v11 = vld [vmem:[%s13318_s3 + $0x9c8] sm:$0xff]  ;;  %v9665_v2 = vpack.c.bf16 %v7029_v5, %v7027_v27  ;;  %v7035_v37 = vld [vmem:[%s13318_s3 + $0xb80] sm:$0xff] }
0x13cb   :  { %8444 = vmatprep.mubr.msk.f32.mxu0 %vm115_vm0, %v10132_v16  ;;  %9578 = vmatpush1.bf16.msra.mxu0 %v9577_v44  ;;  %v9697_v44 = vpack.c.bf16 %v7059_v62, %v7058_v43  ;;  %v7064_v16 = vld [vmem:[%s13319_s4 + $0x2a0] sm:$0xff]  ;;  %v6965_v43 = vld [vmem:[%s13318_s3 + $0x990] sm:$0xff]  ;;  %v6968_v62 = vld [vmem:[%s13318_s3 + $0x9a8] sm:$0xff] }
0x13cc   :  { %9580 = vmatprep.subr.bf16.mxu0 %v9579_v45  ;;  %9695 = vmatpush1.bf16.msra.mxu1 %v9694_v57  ;;  %v7060_v45 = vld [vmem:[%s13319_s4 + $0x280] sm:$0xff] }
0x13cd   :  { %9696 = vmatprep.subr.bf16.mxu1 %v10174_v21  ;;  %v9700_v59 = vpack.c.bf16 %v7061_v52, %v7060_v45  ;;  %v6963_v57 = vld [vmem:[%s13318_s3 + $0x980] sm:$0xff] }
0x13ce   :  { %8445 = vmatmul.mubr.msk.f32.gmra.mrb[66].mxu0 %vm115_vm0, %v10133_v13  ;;  %v7069_v13 = vld [vmem:[%s13319_s4 + $0x2c8] sm:$0xff]  ;;  %v9625_v45 = vpack.c.bf16 %v6965_v43, %v6963_v57  ;;  %v7039_v43 = vld [vmem:[%s13318_s3 + $0xba0] sm:$0xff] }
0x13cf   :  { %9582 = vmatpush1.bf16.msra.mxu0 %v9581_v12  ;;  %5123 = vmatprep.mubr.f32.mxu0 %v10173_v17  ;;  %v7065_v12 = vld [vmem:[%s13319_s4 + $0x2a8] sm:$0xff] }
0x13d0   :  { %9584 = vmatprep.subr.bf16.mxu0 %v9583_v0  ;;  %9698 = vmatpush1.bf16.msra.mxu1 %v9697_v44  ;;  %v9706_v0 = vpack.c.bf16 %v7065_v12, %v7064_v16  ;;  %v6970_v44 = vld [vmem:[%s13318_s3 + $0x9b8] sm:$0xff] }
0x13d1   :  { %9699 = vmatprep.subr.bf16.mxu1 %v10174_v21  ;;  %v9627_v52 = vpack.c.bf16 %v6970_v44, %v6968_v62  ;;  %v7041_v62 = vld [vmem:[%s13318_s3 + $0xbb0] sm:$0xff]  ;;  %v7044_v44 = vld [vmem:[%s13318_s3 + $0xbc8] sm:$0xff] }
0x13d3   :  { %9586 = vmatpush1.bf16.msra.mxu0 %v9585_v46  ;;  %v9712_v46 = vpack.c.bf16 %v7069_v13, %v7068_v9 }
0x13d4   :  { %9588 = vmatprep.subr.bf16.mxu0 %v9587_v50  ;;  %9701 = vmatpush1.bf16.msra.mxu1 %v9700_v59  ;;  %v7070_v50 = vld [vmem:[%s13319_s4 + $0x2d0] sm:$0xff]  ;;  %v6967_v59 = vld [vmem:[%s13318_s3 + $0x9a0] sm:$0xff] }
0x13d5   :  { %9702 = vmatprep.subr.bf16.mxu1 %v10174_v21  ;;  %v9629_v16 = vpack.c.bf16 %v6969_v41, %v6967_v59  ;;  %v7043_v59 = vld [vmem:[%s13318_s3 + $0xbc0] sm:$0xff]  ;;  %v7045_v41 = vld [vmem:[%s13318_s3 + $0xbd0] sm:$0xff] }
0x13d7   :  { %9590 = vmatpush1.bf16.msra.mxu0 %v9589_v19 }
0x13d8   :  { %9592 = vmatprep.subr.bf16.mxu0 %v9591_v40  ;;  %9704 = vmatpush1.bf16.msra.mxu1 %v9703_v14  ;;  %v9715_v40 = vpack.c.bf16 %v7071_v18, %v7070_v50  ;;  %v6974_v14 = vld [vmem:[%s13318_s3 + $0x9d8] sm:$0xff]  ;;  %v6977_v50 = vld [vmem:[%s13318_s3 + $0x9f0] sm:$0xff]  ;;  %v7020_v18 = vld [vmem:[%s13318_s3 + $0xb08] sm:$0xff] }
0x13d9   :  { %9705 = vmatprep.subr.bf16.mxu1 %v10174_v21  ;;  %v9631_v12 = vpack.c.bf16 %v6974_v14, %v6972_v11  ;;  %v7048_v11 = vld [vmem:[%s13318_s3 + $0xbe8] sm:$0xff]  ;;  %v7050_v14 = vld [vmem:[%s13318_s3 + $0xbf8] sm:$0xff] }
0x13db   :  { %9594 = vmatpush1.bf16.msra.mxu0 %v9593_v24 }
0x13dc   :  { %9596 = vmatprep.subr.bf16.mxu0 %v9595_v35  ;;  %9707 = vmatpush1.bf16.msra.mxu1 %v9706_v0  ;;  %v6952_v35 = vld [vmem:[%s13318_s3 + $0x928] sm:$0xff]  ;;  %v6971_v0 = vld [vmem:[%s13318_s3 + $0x9c0] sm:$0xff] }
0x13dd   :  { %9708 = vmatprep.subr.bf16.mxu1 %v10174_v21  ;;  %v9633_v9 = vpack.c.bf16 %v6973_v1, %v6971_v0  ;;  %v7047_v0 = vld [vmem:[%s13318_s3 + $0xbe0] sm:$0xff]  ;;  %v7049_v1 = vld [vmem:[%s13318_s3 + $0xbf0] sm:$0xff] }
0x13df   :  { %9598 = vmatpush1.bf16.msra.mxu0 %v9597_v63  ;;  %v9611_v63 = vpack.c.bf16 %v6954_v10, %v6952_v35  ;;  %v7019_v35 = vld [vmem:[%s13318_s3 + $0xb00] sm:$0xff]  ;;  %v7021_v10 = vld [vmem:[%s13318_s3 + $0xb10] sm:$0xff] }
0x13e0   :  { %9600 = vmatprep.subr.bf16.mxu0 %v9599_v28  ;;  %9710 = vmatpush1.bf16.msra.mxu1 %v9709_v56  ;;  %v6951_v28 = vld [vmem:[%s13318_s3 + $0x920] sm:$0xff]  ;;  %v6978_v56 = vld [vmem:[%s13318_s3 + $0x9f8] sm:$0xff] }
0x13e1   :  { %9711 = vmatprep.subr.bf16.mxu1 %v10174_v21  ;;  %v9635_v13 = vpack.c.bf16 %v6978_v56, %v6976_v3  ;;  %v9685_v3 = vpack.c.bf16 %v7049_v1, %v7047_v0  ;;  %v7072_v56 = vld [vmem:[%s13319_s4 + $0x2e0] sm:$0xff] }
0x13e3   :  { %9602 = vmatpush1.bf16.msra.mxu0 %v9601_v54  ;;  %v9613_v54 = vpack.c.bf16 %v6953_v38, %v6951_v28  ;;  %v7023_v38 = vld [vmem:[%s13318_s3 + $0xb20] sm:$0xff] }
0x13e4   :  { %9604 = vmatprep.subr.bf16.mxu0 %v9603_v30  ;;  %9713 = vmatpush1.bf16.msra.mxu1 %v9712_v46  ;;  %v9615_v30 = vpack.c.bf16 %v6958_v29, %v6956_v8  ;;  %v6975_v46 = vld [vmem:[%s13318_s3 + $0x9e0] sm:$0xff]  ;;  %v7028_v8 = vld [vmem:[%s13318_s3 + $0xb48] sm:$0xff]  ;;  %v7030_v29 = vld [vmem:[%s13318_s3 + $0xb58] sm:$0xff] }
0x13e5   :  { %9714 = vmatprep.subr.bf16.mxu1 %v10174_v21  ;;  %v9637_v20 = vpack.c.bf16 %v6977_v50, %v6975_v46 }
0x13e7   :  { %9606 = vmatpush1.bf16.msra.mxu0 %v9605_v6 }
0x13e8   :  { %9608 = vmatprep.subr.bf16.mxu0 %v9607_v15  ;;  %9716 = vmatpush1.bf16.msra.mxu1 %v9715_v40  ;;  %v7022_v40 = vld [vmem:[%s13318_s3 + $0xb18] sm:$0xff] }
0x13e9   :  { %9717 = vmatprep.subr.bf16.mxu1 %v10174_v21  ;;  %v9655_v51 = vpack.c.bf16 %v7022_v40, %v7020_v18 }
0x148d   :  { %v12761_v49 = vpop.f32.mrb[60].mxu0  ;;  %v12763_v19 = vpop.f32.mrb[84].mxu1 }
0x148e   :  { %v12765_v22 = vpop.f32.mrb[61].mxu0  ;;  %v12767_v31 = vpop.f32.mrb[85].mxu1 }
0x1491   :  { %v12770_v55 = vpop.f32.mrb[62].mxu0  ;;  %v12772_v23 = vpop.f32.mrb[86].mxu1 }
0x1492   :  { %v12774_v24 = vpop.f32.mrb[63].mxu0  ;;  %v12776_v48 = vpop.f32.mrb[87].mxu1 }
0x149d   :  { %v8443_v26 = vpop.f32.mrb[64].mxu0 }
0x149e   :  { %v5007_v47 = vpop.f32.mrb[65].mxu0 }
0x149f   :  { %5124 = vmatmul.mubr.f32.vlgmr.msra.gmra.mrb[68].mxu0 %v5007_v47  ;;  %v7025_v47 = vld [vmem:[%s13318_s3 + $0xb30] sm:$0xff] }
0x14a0   :  { %9610 = vmatpush1.bf16.msra.mxu0 %v9609_v25  ;;  %5129 = vmatprep.mubr.f32.mxu0 %v10173_v17  ;;  %v7024_v25 = vld [vmem:[%s13318_s3 + $0xb28] sm:$0xff] }
0x14a1   :  { %9612 = vmatprep.subr.bf16.mxu0 %v9611_v63  ;;  %v8446_v6 = vpop.f32.mrb[66].mxu0  ;;  %v9657_v63 = vpack.c.bf16 %v7021_v10, %v7019_v35 }
0x14a2   :  { %v5017_v15 = vpop.f32.mrb[67].mxu0 }
0x14a3   :  { %5130 = vmatmul.mubr.f32.gmra.mrb[70].mxu0 %v8443_v26  ;;  %v7026_v26 = vld [vmem:[%s13318_s3 + $0xb38] sm:$0xff] }
0x14a4   :  { %9614 = vmatpush1.bf16.msra.mxu0 %v9613_v54  ;;  %5135 = vmatprep.mubr.f32.mxu0 %v10173_v17  ;;  %v9659_v28 = vpack.c.bf16 %v7026_v26, %v7024_v25  ;;  %v9661_v54 = vpack.c.bf16 %v7025_v47, %v7023_v38 }
0x14a5   :  { %9616 = vmatprep.subr.bf16.mxu0 %v9615_v30  ;;  %v9663_v30 = vpack.c.bf16 %v7030_v29, %v7028_v8 }
0x14a7   :  { %5136 = vmatmul.mubr.f32.gmra.mrb[72].mxu0 %v5017_v15  ;;  %v7031_v15 = vld [vmem:[%s13318_s3 + $0xb60] sm:$0xff] }
0x14a8   :  { %9618 = vmatpush1.bf16.msra.mxu0 %v9617_v33  ;;  %5141 = vmatprep.mubr.f32.mxu0 %v10173_v17  ;;  %v7033_v33 = vld [vmem:[%s13318_s3 + $0xb70] sm:$0xff] }
0x14a9   :  { %9620 = vmatprep.subr.bf16.mxu0 %v9619_v34  ;;  %v7036_v34 = vld [vmem:[%s13318_s3 + $0xb88] sm:$0xff]  ;;  %v9669_v53 = vpack.c.bf16 %v7033_v33, %v7031_v15 }
0x14ab   :  { %5142 = vmatmul.mubr.f32.gmra.mrb[74].mxu0 %v8446_v6  ;;  %v7032_v6 = vld [vmem:[%s13318_s3 + $0xb68] sm:$0xff] }
0x14ac   :  { %9622 = vmatpush1.bf16.msra.mxu0 %v9621_v39  ;;  %5212 = vmatprep.mubr.f32.mxu0 %v10173_v17  ;;  %v7040_v39 = vld [vmem:[%s13318_s3 + $0xba8] sm:$0xff] }
0x14ad   :  { %9624 = vmatprep.subr.bf16.mxu0 %v9623_v42  ;;  %v9673_v42 = vpack.c.bf16 %v7037_v61, %v7035_v37  ;;  %v7077_v37 = vld [vmem:[%s13322_s7 + $0x3] ss:$0 sm:$0xff] }
0x14b0   :  { %9626 = vmatpush1.bf16.msra.mxu0 %v9625_v45  ;;  %v9677_v45 = vpack.c.bf16 %v7041_v62, %v7039_v43 }
0x14b1   :  { %9628 = vmatprep.subr.bf16.mxu0 %v9627_v52 }
0x14b4   :  { %9630 = vmatpush1.bf16.msra.mxu0 %v9629_v16  ;;  %v9681_v16 = vpack.c.bf16 %v7045_v41, %v7043_v59 }
0x14b5   :  { %9632 = vmatprep.subr.bf16.mxu0 %v9631_v12  ;;  %v9683_v12 = vpack.c.bf16 %v7050_v14, %v7048_v11 }
0x14b8   :  { %9634 = vmatpush1.bf16.msra.mxu0 %v9633_v9 }
0x14b9   :  { %9636 = vmatprep.subr.bf16.mxu0 %v9635_v13 }
0x14bc   :  { %9638 = vmatpush1.bf16.msra.mxu0 %v9637_v20 }
0x14bd   :  { %9656 = vmatprep.subr.bf16.mxu0 %v9655_v51 }
0x14bf   :  { %5213 = vmatmul.mubr.f32.vlgmr.msra.gmra.mrb[68].mxu0 %v12765_v22  ;;  %v7034_v22 = vld [vmem:[%s13318_s3 + $0xb78] sm:$0xff] }
0x14c0   :  { %9658 = vmatpush1.bf16.msra.mxu0 %v9657_v63  ;;  %5218 = vmatprep.mubr.f32.mxu0 %v10173_v17  ;;  %v9667_v32 = vpack.c.bf16 %v7034_v22, %v7032_v6 }
0x14c1   :  { %9660 = vmatprep.subr.bf16.mxu0 %v9659_v28 }
0x14c3   :  { %5219 = vmatmul.mubr.f32.gmra.mrb[70].mxu0 %v12761_v49  ;;  %v7038_v49 = vld [vmem:[%s13318_s3 + $0xb98] sm:$0xff] }
0x14c4   :  { %9662 = vmatpush1.bf16.msra.mxu0 %v9661_v54  ;;  %5224 = vmatprep.mubr.f32.mxu0 %v10173_v17  ;;  %v9671_v36 = vpack.c.bf16 %v7038_v49, %v7036_v34 }
0x14c5   :  { %9664 = vmatprep.subr.bf16.mxu0 %v9663_v30 }
0x14c7   :  { %5225 = vmatmul.mubr.f32.gmra.mrb[72].mxu0 %v12774_v24  ;;  %v7042_v24 = vld [vmem:[%s13318_s3 + $0xbb8] sm:$0xff] }
0x14c8   :  { %9666 = vmatpush1.bf16.msra.mxu0 %v9665_v2  ;;  %5230 = vmatprep.mubr.f32.mxu0 %v10173_v17  ;;  %v9675_v57 = vpack.c.bf16 %v7042_v24, %v7040_v39 }
0x14c9   :  { %9668 = vmatprep.subr.bf16.mxu0 %v9667_v32 }
0x14cb   :  { %5231 = vmatmul.mubr.f32.gmra.mrb[74].mxu0 %v12770_v55  ;;  %v7046_v55 = vld [vmem:[%s13318_s3 + $0xbd8] sm:$0xff] }
0x14cc   :  { %9670 = vmatpush1.bf16.msra.mxu0 %v9669_v53  ;;  %5419 = vmatprep.mubr.f32.mxu0 %v10173_v17  ;;  %v9679_v52 = vpack.c.bf16 %v7046_v55, %v7044_v44 }
0x14cd   :  { %9672 = vmatprep.subr.bf16.mxu0 %v9671_v36 }
0x14d0   :  { %9674 = vmatpush1.bf16.msra.mxu0 %v9673_v42 }
0x14d1   :  { %9676 = vmatprep.subr.bf16.mxu0 %v9675_v57 }
0x14d4   :  { %9678 = vmatpush1.bf16.msra.mxu0 %v9677_v45 }
0x14d5   :  { %9680 = vmatprep.subr.bf16.mxu0 %v9679_v52 }
0x14d8   :  { %9682 = vmatpush1.bf16.msra.mxu0 %v9681_v16 }
0x14d9   :  { %9684 = vmatprep.subr.bf16.mxu0 %v9683_v12 }
0x14dc   :  { %9686 = vmatpush1.bf16.msra.mxu0 %v9685_v3 }
0x14df   :  { %5420 = vmatmul.mubr.f32.vlgmr.msra.gmra.mrb[68].mxu0 %v12767_v31  ;;  %v7073_v31 = vld [vmem:[%s13319_s4 + $0x2e8] sm:$0xff] }
0x14e0   :  { %5425 = vmatprep.mubr.f32.mxu0 %v10173_v17  ;;  %v9718_v9 = vpack.c.bf16 %v7073_v31, %v7072_v56  ;;  %v7082_v56 = vld [vmem:[%s13320_s5 + $0x480] sm:$0xff]  ;;  %v7083_v31 = vld [vmem:[%s13320_s5 + $0x488] sm:$0xff] }
0x14e2   :  { %9719 = vmatpush1.bf16.msra.mxu1 %v9718_v9  ;;  %v7098_v9 = vld [vmem:[%s13320_s5 + $0x500] sm:$0xff] }
0x14e3   :  { %5426 = vmatmul.mubr.f32.gmra.mrb[70].mxu0 %v12763_v19  ;;  %9720 = vmatprep.subr.bf16.mxu1 %v10174_v21  ;;  %v7074_v19 = vld [vmem:[%s13319_s4 + $0x2f0] sm:$0xff] }
0x14e4   :  { %5431 = vmatprep.mubr.f32.mxu0 %v10173_v17 }
0x14e7   :  { %5432 = vmatmul.mubr.f32.gmra.mrb[72].mxu0 %v12776_v48  ;;  %v7051_v48 = vld [vmem:[%s13321_s6 + $0x6] sm:$0x3] }
0x14e8   :  { %5437 = vmatprep.mubr.f32.mxu0 %v10173_v17  ;;  %v7075_v17 = vld [vmem:[%s13319_s4 + $0x2f8] sm:$0xff]  ;;  %v5458_v13 = vrot.slane %v7051_v48, %v10732_v58  ;;  %v5462_v46 = vrot.slane %v7051_v48, %v10737_v60  ;;  %v7084_v48 = vld [vmem:[%s13320_s5 + $0x490] sm:$0xff] }
0x14eb   :  { %5438 = vmatmul.mubr.f32.gmra.mrb[74].mxu0 %v12772_v23  ;;  %v9721_v23 = vpack.c.bf16 %v7075_v17, %v7074_v19  ;;  %v9723_v19 = vpack.c.bf16 %v7083_v31, %v7082_v56  ;;  %v7099_v17 = vld [vmem:[%s13320_s5 + $0x508] sm:$0xff] }
0x14ed   :  { %9722 = vmatpush1.bf16.msra.mxu1 %v9721_v23  ;;  %v9755_v23 = vpack.c.bf16 %v7099_v17, %v7098_v9 }
0x14ee   :  { %9724 = vmatprep.subr.bf16.mxu1 %v9723_v19 }
0x14ef   :  { %9756 = vmatprep.subr.bf16.mxu0 %v9755_v23 }
0x14f0   :  { %9758 = vmatpush3.bf16.msra.mxu0 %v9755_v23 }
0x15b2   :  { %v5421_v50 = vpop.f32.mrb[68].mxu0 }
0x15b3   :  { %v5465_v21 = vadd.f32 %v5458_v13, %v5421_v50  ;;  %v5423_v18 = vpop.f32.mrb[69].mxu0 }
0x15b4   :  { %v5466_v40 = vadd.f32 %v5462_v46, %v5423_v18 }
0x15b5   :  { %v5473_v20 = vmul.f32 0.2, %v5465_v21 }
0x15b6   :  { %v5474_v51 = vmul.f32 0.2, %v5466_v40  ;;  %v5427_v35 = vpop.f32.mrb[70].mxu0 }
0x15b7   :  { %v5467_v10 = vadd.f32 %v5458_v13, %v5427_v35  ;;  %v5429_v25 = vpop.f32.mrb[71].mxu0  ;;  %v5481_v28 = vmax.f32 %v5465_v21, %v5473_v20  ;;  %v7101_v21 = vld [vmem:[%s13320_s5 + $0x518] sm:$0xff]  ;;  %v7087_v20 = vld [vmem:[%s13320_s5 + $0x4a8] sm:$0xff] }
0x15b8   :  { %v5482_v26 = vmax.f32 %v5466_v40, %v5474_v51  ;;  %v5468_v63 = vadd.f32 %v5462_v46, %v5429_v25  ;;  %v7086_v40 = vld [vmem:[%s13320_s5 + $0x4a0] sm:$0xff] }
0x15b9   :  { %v5475_v38 = vmul.f32 0.2, %v5467_v10  ;;  %v7102_v51 = vld [vmem:[%s13320_s5 + $0x520] sm:$0xff]  ;;  %v9731_v35 = vpack.c.bf16 %v7087_v20, %v7086_v40 }
0x15ba   :  { %v5476_v47 = vmul.f32 0.2, %v5468_v63  ;;  %v5433_v8 = vpop.f32.mrb[72].mxu0  ;;  %7078 = vmatprep.mubr.msk.f32.mxu1 %vm115_vm0, %v5482_v26  ;;  %v7088_v26 = vld [vmem:[%s13320_s5 + $0x4b0] sm:$0xff] }
0x15bb   :  { %v5469_v58 = vadd.f32 %v5458_v13, %v5433_v8  ;;  %v5435_v29 = vpop.f32.mrb[73].mxu0  ;;  %5599 = vmatmul.mubr.f32.vlgmr.msra.gmra.mrb[88].mxu1 %v5481_v28  ;;  %v5483_v30 = vmax.f32 %v5467_v10, %v5475_v38  ;;  %v7103_v10 = vld [vmem:[%s13320_s5 + $0x528] sm:$0xff]  ;;  %v7104_v28 = vld [vmem:[%s13320_s5 + $0x530] sm:$0xff] }
0x15bc   :  { %v5484_v60 = vmax.f32 %v5468_v63, %v5476_v47  ;;  %v5470_v54 = vadd.f32 %v5462_v46, %v5435_v29  ;;  %9726 = vmatpush3.bf16.msra.mxu1 %v9723_v19  ;;  %v9763_v25 = vpack.c.bf16 %v7103_v10, %v7102_v51  ;;  %v7089_v63 = vld [vmem:[%s13320_s5 + $0x4b8] sm:$0xff]  ;;  %v7091_v29 = vld [vmem:[%s13320_s5 + $0x4c8] sm:$0xff] }
0x15bd   :  { %v5477_v27 = vmul.f32 0.2, %v5469_v58  ;;  %v9735_v38 = vpack.c.bf16 %v7089_v63, %v7088_v26  ;;  %v7105_v47 = vld [vmem:[%s13320_s5 + $0x538] sm:$0xff] }
0x15be   :  { %v5478_v5 = vmul.f32 0.2, %v5470_v54  ;;  %v5439_v6 = vpop.f32.mrb[74].mxu0  ;;  %7079 = vmatprep.mubr.msk.f32.mxu1 %vm115_vm0, %v5484_v60  ;;  %v9767_v8 = vpack.c.bf16 %v7105_v47, %v7104_v28  ;;  %v7106_v60 = vld [vmem:[%s13320_s5 + $0x540] sm:$0xff] }
0x15bf   :  { %v5471_v22 = vadd.f32 %v5458_v13, %v5439_v6  ;;  %v5441_v2 = vpop.f32.mrb[75].mxu0  ;;  %5604 = vmatmul.mubr.f32.gmra.mrb[90].mxu1 %v5483_v30  ;;  %v5485_v33 = vmax.f32 %v5469_v58, %v5477_v27  ;;  %v7085_v13 = vld [vmem:[%s13320_s5 + $0x498] sm:$0xff]  ;;  %v7090_v58 = vld [vmem:[%s13320_s5 + $0x4c0] sm:$0xff]  ;;  %v7107_v30 = vld [vmem:[%s13320_s5 + $0x548] sm:$0xff] }
0x15c0   :  { %v5486_v32 = vmax.f32 %v5470_v54, %v5478_v5  ;;  %v5472_v15 = vadd.f32 %v5462_v46, %v5441_v2  ;;  %v7100_v46 = vld [vmem:[%s13320_s5 + $0x510] sm:$0xff]  ;;  %v9727_v50 = vpack.c.bf16 %v7085_v13, %v7084_v48  ;;  %v9739_v54 = vpack.c.bf16 %v7091_v29, %v7090_v58  ;;  %v7093_v5 = vld [vmem:[%s13320_s5 + $0x4d8] sm:$0xff] }
0x15c1   :  { %v5479_v34 = vmul.f32 0.2, %v5471_v22  ;;  %v9759_v18 = vpack.c.bf16 %v7101_v21, %v7100_v46  ;;  %v7092_v27 = vld [vmem:[%s13320_s5 + $0x4d0] sm:$0xff]  ;;  %v9771_v6 = vpack.c.bf16 %v7107_v30, %v7106_v60 }
0x15c2   :  { %v5480_v49 = vmul.f32 0.2, %v5472_v15  ;;  %7080 = vmatprep.mubr.msk.f32.mxu1 %vm115_vm0, %v5486_v32  ;;  %9728 = vmatprep.subr.bf16.mxu1 %v9727_v50  ;;  %v7108_v2 = vld [vmem:[%s13320_s5 + $0x550] sm:$0xff]  ;;  %v7109_v32 = vld [vmem:[%s13320_s5 + $0x558] sm:$0xff] }
0x15c3   :  { %5609 = vmatmul.mubr.f32.gmra.mrb[92].mxu1 %v5485_v33  ;;  %v5487_v36 = vmax.f32 %v5471_v22, %v5479_v34  ;;  %9760 = vmatprep.subr.bf16.mxu0 %v9759_v18  ;;  %v9743_v22 = vpack.c.bf16 %v7093_v5, %v7092_v27  ;;  %v7094_v33 = vld [vmem:[%s13320_s5 + $0x4e0] sm:$0xff]  ;;  %v7095_v34 = vld [vmem:[%s13320_s5 + $0x4e8] sm:$0xff] }
0x15c4   :  { %v5488_v53 = vmax.f32 %v5472_v15, %v5480_v49  ;;  %9730 = vmatpush3.bf16.msra.mxu1 %v9727_v50  ;;  %9762 = vmatpush3.bf16.msra.mxu0 %v9759_v18  ;;  %v9775_v15 = vpack.c.bf16 %v7109_v32, %v7108_v2  ;;  %v7110_v49 = vld [vmem:[%s13320_s5 + $0x560] sm:$0xff] }
0x15c5   :  { %9732 = vmatprep.subr.bf16.mxu1 %v9731_v35  ;;  %9764 = vmatprep.subr.bf16.mxu0 %v9763_v25 }
0x15c6   :  { %7081 = vmatprep.mubr.msk.f32.mxu1 %vm115_vm0, %v5488_v53  ;;  %v7111_v53 = vld [vmem:[%s13320_s5 + $0x568] sm:$0xff] }
0x15c7   :  { %5614 = vmatmul.mubr.f32.gmra.mrb[94].mxu1 %v5487_v36  ;;  %v9747_v36 = vpack.c.bf16 %v7095_v34, %v7094_v33  ;;  %v7130_v34 = vld [vmem:[%s13320_s5 + $0x580] sm:$0xff] }
0x15c8   :  { %9734 = vmatpush3.bf16.msra.mxu1 %v9731_v35  ;;  %9766 = vmatpush3.bf16.msra.mxu0 %v9763_v25 }
0x15c9   :  { %9736 = vmatprep.subr.bf16.mxu1 %v9735_v38  ;;  %9768 = vmatprep.subr.bf16.mxu0 %v9767_v8 }
0x15cc   :  { %9738 = vmatpush3.bf16.msra.mxu1 %v9735_v38  ;;  %9770 = vmatpush3.bf16.msra.mxu0 %v9767_v8 }
0x15cd   :  { %9740 = vmatprep.subr.bf16.mxu1 %v9739_v54  ;;  %9772 = vmatprep.subr.bf16.mxu0 %v9771_v6 }
0x15d0   :  { %9742 = vmatpush3.bf16.msra.mxu1 %v9739_v54  ;;  %9774 = vmatpush3.bf16.msra.mxu0 %v9771_v6 }
0x15d1   :  { %9744 = vmatprep.subr.bf16.mxu1 %v9743_v22  ;;  %9776 = vmatprep.subr.bf16.mxu0 %v9775_v15 }
0x15d4   :  { %9746 = vmatpush3.bf16.msra.mxu1 %v9743_v22  ;;  %9778 = vmatpush3.bf16.msra.mxu0 %v9775_v15 }
0x15d5   :  { %9748 = vmatprep.subr.bf16.mxu1 %v9747_v36 }
0x15d8   :  { %9750 = vmatpush3.bf16.msra.mxu1 %v9747_v36  ;;  %v10137_v36 = vld [vmem:[%s13317_s2 + $0x48] sm:$0xff] }
0x168e   :  { %v5600_v61 = vpop.f32.mrb[88].mxu1 }
0x168f   :  { %v5601_v39 = vadd.f32 %v7077_v37, %v5600_v61  ;;  %v5602_v24 = vpop.f32.mrb[89].mxu1  ;;  %v7096_v61 = vld [vmem:[%s13320_s5 + $0x4f0] sm:$0xff] }
0x1690   :  { %v7112_v24 = vld [vmem:[%s13320_s5 + $0x570] sm:$0xff] }
0x1691   :  { %v5619_v42 = vmul.f32 0.2, %v5601_v39 }
0x1692   :  { %v5605_v57 = vpop.f32.mrb[90].mxu1 }
0x1693   :  { %v13009_v43 = vmax.f32 %v5601_v39, %v5619_v42  ;;  %v5606_v62 = vadd.f32 %v7077_v37, %v5605_v57  ;;  %v5607_v44 = vpop.f32.mrb[91].mxu1  ;;  %v7097_v39 = vld [vmem:[%s13320_s5 + $0x4f8] sm:$0xff] }
0x1694   :  { %v7113_v42 = vld [vmem:[%s13320_s5 + $0x578] sm:$0xff]  ;;  %v9751_v57 = vpack.c.bf16 %v7097_v39, %v7096_v61  ;;  %v10139_v39 = vld [vmem:[%s13317_s2 + $0x68] sm:$0xff] }
0x1695   :  { %v5620_v55 = vmul.f32 0.2, %v5606_v62  ;;  %5627 = vmin.xlane.f32.xlu0 %v13009_v43 }
0x1696   :  { %v5610_v45 = vpop.f32.mrb[92].mxu1  ;;  %9752 = vmatprep.subr.bf16.mxu1 %v9751_v57 }
0x1697   :  { %v13012_v52 = vmax.f32 %v5606_v62, %v5620_v55  ;;  %v5611_v59 = vadd.f32 %v7077_v37, %v5610_v45  ;;  %v5612_v41 = vpop.f32.mrb[93].mxu1  ;;  %v9783_v62 = vpack.c.bf16 %v7113_v42, %v7112_v24  ;;  %9754 = vmatpush3.bf16.msra.mxu1 %v9751_v57  ;;  %v10140_v24 = vld [vmem:[%s13317_s2 + $0x70] sm:$0xff]  ;;  %v7133_v57 = vld [vmem:[%s13320_s5 + $0x598] sm:$0xff] }
0x1698   :  { %v7132_v42 = vld [vmem:[%s13320_s5 + $0x590] sm:$0xff] }
0x1699   :  { %v5621_v11 = vmul.f32 0.2, %v5611_v59  ;;  %5644 = vmax.xlane.f32.xlu0 %v13009_v43  ;;  %5629 = vmin.xlane.f32.xlu1 %v13012_v52 }
0x169a   :  { %v5615_v14 = vpop.f32.mrb[94].mxu1 }
0x169b   :  { %v13016_v16 = vmax.f32 %v5611_v59, %v5621_v11  ;;  %v5616_v12 = vadd.f32 %v7077_v37, %v5615_v14  ;;  %v5617_v0 = vpop.f32.mrb[95].mxu1  ;;  %v9779_v37 = vpack.c.bf16 %v7111_v53, %v7110_v49  ;;  %v7131_v49 = vld [vmem:[%s13320_s5 + $0x588] sm:$0xff]  ;;  %v10136_v53 = vld [vmem:[%s13317_s2 + $0x58] sm:$0xff] }
0x169c   :  { %v9803_v61 = vpack.c.bf16 %v7131_v49, %v7130_v34 }
0x169d   :  { %v5622_v1 = vmul.f32 0.2, %v5616_v12  ;;  %5646 = vmax.xlane.f32.xlu1 %v13012_v52  ;;  %5631 = vmin.xlane.f32.xlu0 %v13016_v16 }
0x169e   :  { %9780 = vmatprep.subr.bf16.mxu0 %v9779_v37 }
0x169f   :  { %v13020_v3 = vmax.f32 %v5616_v12, %v5622_v1  ;;  %9782 = vmatpush3.bf16.msra.mxu0 %v9779_v37  ;;  %v10138_v37 = vld [vmem:[%s13317_s2 + $0x60] sm:$0xff] }
0x16a0   :  { %9784 = vmatprep.subr.bf16.mxu0 %v9783_v62 }
0x16a1   :  { %5648 = vmax.xlane.f32.xlu0 %v13016_v16  ;;  %5633 = vmin.xlane.f32.xlu1 %v13020_v3 }
0x16a3   :  { %9786 = vmatpush3.bf16.msra.mxu0 %v9783_v62  ;;  %v10141_v62 = vld [vmem:[%s13317_s2 + $0x78] sm:$0xff] }
0x16a5   :  { %5650 = vmax.xlane.f32.xlu1 %v13020_v3 }
0x1722   :  { %v5628_v44 = vpop.xlane.xlu0 %5627 }
0x1726   :  { %v5645_v55 = vpop.xlane.xlu0 %5644  ;;  %v5630_v45 = vpop.xlane.xlu1 %5629 }
0x1727   :  { %v5635_v14 = vmin.f32 %v5628_v44, %v5630_v45  ;;  %v10142_v44 = vld [vmem:[%s13317_s2] sm:$0xff] }
0x1728   :  { %v7134_v45 = vld [vmem:[%s13320_s5 + $0x5a0] sm:$0xff] }
0x172a   :  { %v5647_v59 = vpop.xlane.xlu1 %5646  ;;  %v5632_v41 = vpop.xlane.xlu0 %5631 }
0x172b   :  { %v5652_v31 = vmax.f32 %v5645_v55, %v5647_v59  ;;  %v9807_v55 = vpack.c.bf16 %v7133_v57, %v7132_v42  ;;  %v7135_v59 = vld [vmem:[%s13320_s5 + $0x5a8] sm:$0xff] }
0x172e   :  { %v5634_v11 = vpop.xlane.xlu1 %5633  ;;  %v5649_v1 = vpop.xlane.xlu0 %5648 }
0x172f   :  { %v5636_v12 = vmin.f32 %v5632_v41, %v5634_v11  ;;  %v10143_v41 = vld [vmem:[%s13317_s2 + $0x8] sm:$0xff]  ;;  %v10144_v11 = vld [vmem:[%s13317_s2 + $0x10] sm:$0xff] }
0x1731   :  { %v5637_v0 = vmin.f32 %v5635_v14, %v5636_v12  ;;  %v9811_v14 = vpack.c.bf16 %v7135_v59, %v7134_v45  ;;  %v7136_v12 = vld [vmem:[%s13320_s5 + $0x5b0] sm:$0xff] }
0x1732   :  { %v5651_v56 = vpop.xlane.xlu1 %5650 }
0x1733   :  { %v5638_v9 = vrot.slane %v5637_v0, 4  ;;  %v5653_v19 = vmax.f32 %v5649_v1, %v5651_v56  ;;  %v10145_v1 = vld [vmem:[%s13317_s2 + $0x18] sm:$0xff]  ;;  %v10146_v56 = vld [vmem:[%s13317_s2 + $0x20] sm:$0xff] }
0x1735   :  { %v5639_v17 = vmin.f32 %v5637_v0, %v5638_v9  ;;  %v5654_v23 = vmax.f32 %v5652_v31, %v5653_v19  ;;  %v7137_v0 = vld [vmem:[%s13320_s5 + $0x5b8] sm:$0xff]  ;;  %v7138_v9 = vld [vmem:[%s13320_s5 + $0x5c0] sm:$0xff]  ;;  %v7139_v19 = vld [vmem:[%s13320_s5 + $0x5c8] sm:$0xff] }
0x1736   :  { %v9815_v31 = vpack.c.bf16 %v7137_v0, %v7136_v12 }
0x1737   :  { %v5640_v48 = vrot.slane %v5639_v17, 2  ;;  %v5655_v13 = vrot.slane %v5654_v23, 4 }
0x1739   :  { %v5641_v46 = vmin.f32 %v5639_v17, %v5640_v48  ;;  %v5656_v50 = vmax.f32 %v5654_v23, %v5655_v13  ;;  %v10147_v17 = vld [vmem:[%s13317_s2 + $0x28] sm:$0xff]  ;;  %v10148_v23 = vld [vmem:[%s13317_s2 + $0x30] sm:$0xff]  ;;  %v9819_v48 = vpack.c.bf16 %v7139_v19, %v7138_v9 }
0x173a   :  { %v7140_v13 = vld [vmem:[%s13320_s5 + $0x5d0] sm:$0xff] }
0x173b   :  { %v5657_v21 = vrot.slane %v5656_v50, 2  ;;  %v5642_v18 = vrot.slane %v5641_v46, 1 }
0x173d   :  { %v5658_v40 = vmax.f32 %v5656_v50, %v5657_v21  ;;  %v5643_v51 = vmin.f32 %v5641_v46, %v5642_v18  ;;  %v7141_v46 = vld [vmem:[%s13320_s5 + $0x5d8] sm:$0xff]  ;;  %v7142_v18 = vld [vmem:[%s13320_s5 + $0x5e0] sm:$0xff] }
0x173e   :  { %v10149_v50 = vld [vmem:[%s13317_s2 + $0x38] sm:$0xff]  ;;  %v9823_v21 = vpack.c.bf16 %v7141_v46, %v7140_v13 }
0x173f   :  { %v5659_v20 = vrot.slane %v5658_v40, 1 }
0x1741   :  { %v5660_v35 = vmax.f32 %v5658_v40, %v5659_v20  ;;  %v7143_v40 = vld [vmem:[%s13320_s5 + $0x5e8] sm:$0xff] }
0x1742   :  { %v9827_v20 = vpack.c.bf16 %v7143_v40, %v7142_v18 }
0x1743   :  { %v5661_v10 = vsub.f32 %v5660_v35, %v5643_v51  ;;  %v7145_v35 = vld [vmem:[%s13320_s5 + $0x5f8] sm:$0xff] }
0x1745   :  { %10032 = vrcp.f32 %v5661_v10 }
0x174f   :  { %v10033_v25 = vpop.eup %10032 }
0x1750   :  { %v5663_v26 = vmul.f32 %v10033_v25, %v10869_v7  ;;  %v10150_v25 = vld [vmem:[%s13317_s2 + $0x80] sm:$0xff] }
0x1752   :  { %v5664_v63 = vmul.f32 %v5663_v26, %v5643_v51  ;;  %v5666_v38 = vmul.f32 %v5663_v26, %v13009_v43  ;;  %v5667_v47 = vmul.f32 %v5663_v26, %v13012_v52  ;;  %v5668_v29 = vmul.f32 %v5663_v26, %v13016_v16  ;;  %v10134_v43 = vld [vmem:[%s13317_s2 + $0x50] sm:$0xff]  ;;  %v10135_v52 = vld [vmem:[%s13317_s2 + $0x40] sm:$0xff] }
0x1753   :  { %v7144_v51 = vld [vmem:[%s13320_s5 + $0x5f0] sm:$0xff] }
0x1754   :  { %v5665_v28 = vsub.f32 %v10866_v4, %v5664_v63  ;;  %v5669_v4 = vmul.f32 %v5663_v26, %v13020_v3  ;;  %v9831_v10 = vpack.c.bf16 %v7145_v35, %v7144_v51 }
0x1756   :  { %v13125_v8 = vadd.f32 %v5666_v38, %v5665_v28  ;;  %v13127_v58 = vadd.f32 %v5667_v47, %v5665_v28  ;;  %v13132_v60 = vadd.f32 %v5668_v29, %v5665_v28  ;;  %v13139_v7 = vadd.f32 %v5669_v4, %v5665_v28  ;;  %v10153_v4 = vld [vmem:[%s13317_s2 + $0x98] sm:$0xff] }
0x1758   :  { %8501 = vmatprep.mubr.f32.mxu1 %v13125_v8  ;;  %8539 = vmatprep.mubr.f32.mxu0 %v13125_v8 }
0x1759   :  { %8502 = vmatmul.mubr.f32.vlgmr.msra.gmra.mrb[96].mxu1 %v13127_v58  ;;  %8540 = vmatmul.mubr.f32.vlgmr.msra.gmra.mrb[76].mxu0 %v13127_v58 }
0x175a   :  { %8504 = vmatprep.mubr.f32.mxu1 %v13132_v60  ;;  %8542 = vmatprep.mubr.f32.mxu0 %v13132_v60 }
0x175d   :  { %8505 = vmatmul.mubr.f32.gmra.mrb[98].mxu1 %v13139_v7  ;;  %8543 = vmatmul.mubr.f32.gmra.mrb[78].mxu0 %v13139_v7 }
0x175e   :  { %8556 = vmatprep.mubr.msk.f32.mxu1 %vm1230_vm1, %v10134_v43  ;;  %8553 = vmatprep.mubr.msk.f32.mxu0 %vm1230_vm1, %v10135_v52  ;;  %v10155_v43 = vld [vmem:[%s13317_s2 + $0xa8] sm:$0xff]  ;;  %v10156_v52 = vld [vmem:[%s13317_s2 + $0xb0] sm:$0xff] }
0x182c   :  { %v8503_v16 = vpop.f32.mrb[96].mxu1  ;;  %v8541_v3 = vpop.f32.mrb[76].mxu0 }
0x182d   :  { %v5757_v54 = vpop.f32.mrb[97].mxu1  ;;  %v5859_v30 = vpop.f32.mrb[77].mxu0 }
0x182e   :  { %v9795_v27 = vpack.c.bf16 %v8503_v16, %v5757_v54  ;;  %v9787_v5 = vpack.c.bf16 %v8541_v3, %v5859_v30  ;;  %v10157_v16 = vld [vmem:[%s13317_s2 + $0xb8] sm:$0xff]  ;;  %v6304_v30 = vstv %s7154_s10 }
0x1830   :  { %v8506_v6 = vpop.f32.mrb[98].mxu1  ;;  %v8544_v22 = vpop.f32.mrb[78].mxu0  ;;  %9788 = vmatprep.subr.bf16.mxu0 %v9787_v5  ;;  %9843 = vmatprep.subr.bf16.mxu1 %v9787_v5 }
0x1831   :  { %v5767_v2 = vpop.f32.mrb[99].mxu1  ;;  %v5869_v32 = vpop.f32.mrb[79].mxu0  ;;  %9790 = vmatpush3.bf16.msra.mxu0 %v9787_v5  ;;  %9845 = vmatpush3.bf16.msra.mxu1 %v9787_v5 }
0x1832   :  { %v9799_v15 = vpack.c.bf16 %v8506_v6, %v5767_v2  ;;  %v9791_v33 = vpack.c.bf16 %v8544_v22, %v5869_v32 }
0x1834   :  { %9792 = vmatprep.subr.bf16.mxu0 %v9791_v33  ;;  %9844 = vmatprep.subr.bf16.mxu1 %v9791_v33 }
0x1835   :  { %9794 = vmatpush3.bf16.msra.mxu0 %v9791_v33  ;;  %9846 = vmatpush3.bf16.msra.mxu1 %v9791_v33 }
0x1836   :  { %9796 = vmatprep.subr.bf16.mxu1 %v9795_v27 }
0x1838   :  { %8557 = vmatmul.mubr.msk.f32.vlgmr.msra.gmra.mrb[100].mxu1 %vm1230_vm1, %v10136_v53  ;;  %8554 = vmatmul.mubr.msk.f32.vlgmr.msra.gmra.mrb[80].mxu0 %vm1230_vm1, %v10137_v36 }
0x1839   :  { %9798 = vmatpush3.bf16.msra.mxu1 %v9795_v27  ;;  %8559 = vmatprep.mubr.msk.f32.mxu1 %vm1230_vm1, %v10138_v37 }
0x183a   :  { %9800 = vmatprep.subr.bf16.mxu1 %v9799_v15 }
0x183c   :  { %8560 = vmatmul.mubr.msk.f32.gmra.mrb[102].mxu1 %vm1230_vm1, %v10139_v39 }
0x183d   :  { %9802 = vmatpush3.bf16.msra.mxu1 %v9799_v15  ;;  %8562 = vmatprep.mubr.msk.f32.mxu1 %vm1230_vm1, %v10140_v24 }
0x183e   :  { %9804 = vmatprep.subr.bf16.mxu1 %v9803_v61 }
0x1840   :  { %8563 = vmatmul.mubr.msk.f32.gmra.mrb[104].mxu1 %vm1230_vm1, %v10141_v62 }
0x1841   :  { %8573 = vmatprep.mubr.msk.f32.mxu1 %vm1230_vm1, %v10142_v44 }
0x1844   :  { %8574 = vmatmul.mubr.msk.f32.vlgmr.msra.gmra.mrb[106].mxu1 %vm1230_vm1, %v10143_v41 }
0x1845   :  { %9806 = vmatpush3.bf16.msra.mxu1 %v9803_v61  ;;  %8576 = vmatprep.mubr.msk.f32.mxu1 %vm1230_vm1, %v10144_v11 }
0x1846   :  { %9808 = vmatprep.subr.bf16.mxu1 %v9807_v55 }
0x1848   :  { %8577 = vmatmul.mubr.msk.f32.gmra.mrb[100].mxu1 %vm1230_vm1, %v10145_v1 }
0x1849   :  { %9810 = vmatpush3.bf16.msra.mxu1 %v9807_v55  ;;  %8579 = vmatprep.mubr.msk.f32.mxu1 %vm1230_vm1, %v10146_v56 }
0x184a   :  { %9812 = vmatprep.subr.bf16.mxu1 %v9811_v14 }
0x184c   :  { %8580 = vmatmul.mubr.msk.f32.gmra.mrb[102].mxu1 %vm1230_vm1, %v10147_v17 }
0x184d   :  { %9814 = vmatpush3.bf16.msra.mxu1 %v9811_v14  ;;  %8582 = vmatprep.mubr.msk.f32.mxu1 %vm1230_vm1, %v10148_v23 }
0x184e   :  { %9816 = vmatprep.subr.bf16.mxu1 %v9815_v31 }
0x1850   :  { %8583 = vmatmul.mubr.msk.f32.gmra.mrb[104].mxu1 %vm1230_vm1, %v10149_v50 }
0x1851   :  { %9818 = vmatpush3.bf16.msra.mxu1 %v9815_v31  ;;  %8617 = vmatprep.mubr.f32.mxu1 %v13125_v8 }
0x1852   :  { %9820 = vmatprep.subr.bf16.mxu1 %v9819_v48 }
0x1855   :  { %9822 = vmatpush3.bf16.msra.mxu1 %v9819_v48 }
0x1856   :  { %9824 = vmatprep.subr.bf16.mxu1 %v9823_v21 }
0x1859   :  { %9826 = vmatpush3.bf16.msra.mxu1 %v9823_v21 }
0x185a   :  { %9828 = vmatprep.subr.bf16.mxu1 %v9827_v20 }
0x185d   :  { %9830 = vmatpush3.bf16.msra.mxu1 %v9827_v20 }
0x185e   :  { %9832 = vmatprep.subr.bf16.mxu1 %v9831_v10 }
0x1861   :  { %9834 = vmatpush3.bf16.msra.mxu1 %v9831_v10 }
0x1864   :  { %8618 = vmatmul.mubr.f32.vlgmr.msra.gmra.mrb[108].mxu1 %v13127_v58  ;;  %v10151_v58 = vld [vmem:[%s13317_s2 + $0x88] sm:$0xff] }
0x1865   :  { %8620 = vmatprep.mubr.f32.mxu1 %v13132_v60  ;;  %v10152_v60 = vld [vmem:[%s13317_s2 + $0x90] sm:$0xff] }
0x1868   :  { %8621 = vmatmul.mubr.f32.gmra.mrb[110].mxu1 %v13139_v7  ;;  %v10154_v7 = vld [vmem:[%s13317_s2 + $0xa0] sm:$0xff] }
0x1869   :  { %8631 = vmatprep.mubr.msk.f32.mxu1 %vm1230_vm1, %v10150_v25 }
0x190b   :  { %v8555_v26 = vpop.f32.mrb[80].mxu0 }
0x190c   :  { %v5944_v3 = vpop.f32.mrb[81].mxu0 }
0x1937   :  { %v8619_v63 = vpop.f32.mrb[108].mxu1 }
0x1938   :  { %v6171_v28 = vpop.f32.mrb[109].mxu1 }
0x1939   :  { %v9835_v38 = vpack.c.bf16 %v8619_v63, %v6171_v28 }
0x193b   :  { %v8622_v47 = vpop.f32.mrb[110].mxu1  ;;  %9836 = vmatprep.subr.bf16.mxu1 %v9835_v38 }
0x193c   :  { %v6181_v8 = vpop.f32.mrb[111].mxu1  ;;  %9838 = vmatpush3.bf16.msra.mxu1 %v9835_v38 }
0x193d   :  { %v9839_v29 = vpack.c.bf16 %v8622_v47, %v6181_v8 }
0x193f   :  { %9840 = vmatprep.subr.bf16.mxu1 %v9839_v29 }
0x1940   :  { %9842 = vmatpush3.bf16.msra.mxu1 %v9839_v29 }
0x1943   :  { %8632 = vmatmul.mubr.msk.f32.vlgmr.msra.gmra.mrb[106].mxu1 %vm1230_vm1, %v10151_v58 }
0x1944   :  { %8634 = vmatprep.mubr.msk.f32.mxu1 %vm1230_vm1, %v10152_v60 }
0x1947   :  { %8635 = vmatmul.mubr.msk.f32.gmra.mrb[100].mxu1 %vm1230_vm1, %v10153_v4 }
0x1948   :  { %8637 = vmatprep.mubr.msk.f32.mxu1 %vm1230_vm1, %v10154_v7 }
0x194b   :  { %8638 = vmatmul.mubr.msk.f32.gmra.mrb[102].mxu1 %vm1230_vm1, %v10155_v43 }
0x194c   :  { %8640 = vmatprep.mubr.msk.f32.mxu1 %vm1230_vm1, %v10156_v52 }
0x194f   :  { %8641 = vmatmul.mubr.msk.f32.gmra.mrb[104].mxu1 %vm1230_vm1, %v10157_v16 }
0x1a16   :  { %v8633_v54 = vpop.f32.mrb[106].mxu1 }
0x1a17   :  { %v9847_v27 = vadd.f32 %v8633_v54, %v8555_v26  ;;  %v6256_v5 = vpop.f32.mrb[107].mxu1 }
0x1a18   :  { %v9848_v6 = vadd.f32 %v6256_v5, %v5944_v3 }
0x1a19   :  { %v6306_v22 = vadd.f32 %v9847_v27, %v6304_v30 }
0x1a1a   :  { %v6305_v2 = vadd.f32 %v9848_v6, %v6304_v30  ;;  %v8636_v32 = vpop.f32.mrb[100].mxu1 }
0x1a1b   :  { %v6314_v15 = vmul.f32 0.5, %v6306_v22  ;;  %v6308_v33 = vadd.f32 %v8636_v32, %v6304_v30  ;;  %v6266_v34 = vpop.f32.mrb[101].mxu1 }
0x1a1c   :  { %v6313_v49 = vmul.f32 0.5, %v6305_v2  ;;  %v6307_v53 = vadd.f32 %v6304_v30, %v6266_v34 }
0x1a1d   :  { %10034 = vtanh.f32 %v6314_v15  ;;  %v6316_v36 = vmul.f32 0.5, %v6308_v33 }
0x1a1e   :  { %10036 = vtanh.f32 %v6313_v49  ;;  %v6315_v37 = vmul.f32 0.5, %v6307_v53  ;;  %v8639_v61 = vpop.f32.mrb[102].mxu1 }
0x1a1f   :  { %10038 = vtanh.f32 %v6316_v36  ;;  %v6310_v39 = vadd.f32 %v8639_v61, %v6304_v30  ;;  %v6276_v24 = vpop.f32.mrb[103].mxu1 }
0x1a20   :  { %10040 = vtanh.f32 %v6315_v37  ;;  %v6309_v42 = vadd.f32 %v6304_v30, %v6276_v24 }
0x1a21   :  { %v6318_v57 = vmul.f32 0.5, %v6310_v39 }
0x1a22   :  { %v6317_v62 = vmul.f32 0.5, %v6309_v42  ;;  %v8642_v44 = vpop.f32.mrb[104].mxu1 }
0x1a23   :  { %10042 = vtanh.f32 %v6318_v57  ;;  %v6312_v55 = vadd.f32 %v8642_v44, %v6304_v30  ;;  %v6286_v45 = vpop.f32.mrb[105].mxu1 }
0x1a24   :  { %10044 = vtanh.f32 %v6317_v62  ;;  %v6311_v59 = vadd.f32 %v6304_v30, %v6286_v45 }
0x1a25   :  { %v6320_v41 = vmul.f32 0.5, %v6312_v55 }
0x1a26   :  { %v6319_v11 = vmul.f32 0.5, %v6311_v59 }
0x1a27   :  { %v10035_v14 = vpop.eup %10034  ;;  %10046 = vtanh.f32 %v6320_v41 }
0x1a28   :  { %v10037_v12 = vpop.eup %10036  ;;  %v6330_v0 = vadd.f32 1.0, %v10035_v14  ;;  %10048 = vtanh.f32 %v6319_v11 }
0x1a29   :  { %v10039_v1 = vpop.eup %10038  ;;  %v6329_v56 = vadd.f32 1.0, %v10037_v12 }
0x1a2a   :  { %v10041_v31 = vpop.eup %10040  ;;  %v6338_v9 = vmul.f32 0.5, %v6330_v0  ;;  %v6332_v19 = vadd.f32 1.0, %v10039_v1 }
0x1a2b   :  { %v6337_v17 = vmul.f32 0.5, %v6329_v56  ;;  %v6331_v23 = vadd.f32 1.0, %v10041_v31 }
0x1a2c   :  { %6346 = vst [vmem:[%s13324_s9 + $0x8] sm:$0xff] %v6338_v9  ;;  %v6340_v48 = vmul.f32 0.5, %v6332_v19 }
0x1a2d   :  { %v10043_v13 = vpop.eup %10042  ;;  %6345 = vst [vmem:[%s13324_s9] sm:$0xff] %v6337_v17  ;;  %v6339_v46 = vmul.f32 0.5, %v6331_v23 }
0x1a2e   :  { %v10045_v50 = vpop.eup %10044  ;;  %6348 = vst [vmem:[%s13324_s9 + $0x18] sm:$0xff] %v6340_v48  ;;  %v6334_v21 = vadd.f32 1.0, %v10043_v13 }
0x1a2f   :  { %6347 = vst [vmem:[%s13324_s9 + $0x10] sm:$0xff] %v6339_v46  ;;  %v6333_v18 = vadd.f32 1.0, %v10045_v50 }
0x1a30   :  { %v6342_v40 = vmul.f32 0.5, %v6334_v21 }
0x1a31   :  { %v10047_v20 = vpop.eup %10046  ;;  %v6341_v51 = vmul.f32 0.5, %v6333_v18 }
0x1a32   :  { %v10049_v35 = vpop.eup %10048  ;;  %6350 = vst [vmem:[%s13324_s9 + $0x28] sm:$0xff] %v6342_v40  ;;  %v6336_v10 = vadd.f32 1.0, %v10047_v20 }
0x1a33   :  { %6349 = vst [vmem:[%s13324_s9 + $0x20] sm:$0xff] %v6341_v51  ;;  %v6335_v25 = vadd.f32 1.0, %v10049_v35 }
0x1a34   :  { %v6344_v26 = vmul.f32 0.5, %v6336_v10 }
0x1a35   :  { %v6343_v63 = vmul.f32 0.5, %v6335_v25 }
0x1a36   :  { %6352 = vst [vmem:[%s13324_s9 + $0x38] sm:$0xff] %v6344_v26 }
0x1a37   :  { %6351 = vst [vmem:[%s13324_s9 + $0x30] sm:$0xff] %v6343_v63 }
0x1a38   :  { %6357 = vsyncpa [#allocation3], 1 }

</bundles_post_ra>
